<compile_context>
chip_gen: v5e
topology: v5e:2x2
jax: 0.10.0
libtpu: 0.0.40
codegen_flags: <defaults>
</compile_context>

<pallas_src>
import functools

import numpy as np
import jax
import jax.numpy as jnp
from jax import lax
from jax.experimental import pallas as pl
from jax.experimental.pallas import tpu as pltpu

# ---------------- model dims (small, synthetic) ----------------
WORD_VOCAB = 20
TAG_VOCAB = 10
NUM_LABELS = 5
WORD_DIM = 16
POS_DIM = 8
HIDDEN = 32                 # hidden_size
OUTPUT = 2 * HIDDEN         # bidirectional output size
BATCH = 2
SEQ = 8
N_HEAD1 = 8                 # label_attn1 heads
HEAD_DIM1 = HIDDEN // N_HEAD1


# ===================== fused forward Pallas kernel =====================
def fused_forward_kernel(
        x_ref,            # (S*B, 2*Din1)  row t*B+b = [x_b(t) | x_b(S-1-t)]
        m1_ref,           # (2H, NH*L)     Wq1 folded into scaled block-diag K1
        g1_ref,           # (NH*L, NH*L)   head-block ones (per-head softmax sums)
        vbd_ref,          # (NH*L, H)      block-diag per-head V1
        m2_ref,           # (2H, L)        Wq2 folded into scaled K2^T
        win1_ref, whh1_ref, b1_ref,        # LSTM1 packed: (2*Din1,8H),(2H,8H),(1,8H)
        win2_ref, whh2_ref, b2_ref,        # LSTM2 packed: (2H,8H),(2H,8H),(1,8H)
        out_ref,          # (S*B, L)       rows (t, b)
        *, S, B, H):
    f32 = jnp.float32

    def bilstm(x2, win_ref, whh_ref, b_ref):
        # x2: (S*B, 2*Din) with row t*B+b = [in_b(t) | in_b(S-1-t)].
        # Hoisted input projection for every step / both directions / whole
        # batch: one (S*B, 2*Din) @ (2*Din, 8H) matmul against the
        # block-diagonal [W_ih_f ; W_ih_b] slab (interleaved gate columns).
        pre = jnp.dot(x2, win_ref[...], preferred_element_type=f32) + b_ref[...]  # (S*B, 8H)
        whh = whh_ref[...]                                 # (2H, 8H) block-diag
        h = jnp.zeros((B, 2 * H), f32)                     # [h_f | h_b] per batch row
        c = jnp.zeros((B, 2 * H), f32)                     # [c_f | c_b]
        h_rows = [None] * S
        # Statically unrolled serial recurrence; fwd chain (time t) and bwd
        # chain (time S-1-t) plus all batch rows advance in ONE matmul/step.
        # TODO(synk): for scaled SEQ switch to lax.fori_loop + a VMEM scratch
        # (S*B, 2H) to bound live ranges instead of Python lists + concat.
        for t in range(S):
            g = pre[t * B:(t + 1) * B, :] + jnp.dot(h, whh, preferred_element_type=f32)
            sg = jax.nn.sigmoid(g)     # gates: [i_f i_b | f_f f_b | g_f g_b | o_f o_b]
            tg = jnp.tanh(g)
            c = sg[:, 2 * H:4 * H] * c + sg[:, 0:2 * H] * tg[:, 4 * H:6 * H]
            h = sg[:, 6 * H:8 * H] * jnp.tanh(c)
            h_rows[t] = h              # row b = [h_f(t) | h_b(S-1-t)] of batch b
        # Re-assemble forward-time-ordered states, rows (t, b).
        hf = jnp.concatenate([h_rows[t][:, 0:H] for t in range(S)], axis=0)            # (S*B, H)
        hb = jnp.concatenate([h_rows[S - 1 - t][:, H:2 * H] for t in range(S)], axis=0)  # (S*B, H)
        return hf, hb

    # ---------------- BiLSTM 1 ----------------
    hf1, hb1 = bilstm(x_ref[...], win1_ref, whh1_ref, b1_ref)

    # -------- label attention 1: all 8 heads, folded query projection --------
    m1 = m1_ref[...]
    s1 = (jnp.dot(hf1, m1[0:H, :], preferred_element_type=f32)
          + jnp.dot(hb1, m1[H:2 * H, :], preferred_element_type=f32))      # (S*B, NH*L)
    # Global row max (shift-invariant; per-head max only needed at much larger
    # score magnitudes where a head's whole exp block could underflow).
    mx = jnp.max(s1, axis=-1, keepdims=True)
    e1 = jnp.exp(s1 - mx)
    denom = jnp.dot(e1, g1_ref[...], preferred_element_type=f32)           # per-head sums, broadcast
    p1 = e1 * pl.reciprocal(denom, approx=True)
    a1 = jnp.dot(p1, vbd_ref[...], preferred_element_type=f32)             # (S*B, H)

    # ---------------- BiLSTM 2 ----------------
    # Build [a1(t) | a1(S-1-t)] rows once (static slices, outside the loop).
    a1_rev = jnp.concatenate([a1[(S - 1 - t) * B:(S - t) * B, :] for t in range(S)], axis=0)
    a2in = jnp.concatenate([a1, a1_rev], axis=-1)                          # (S*B, 2H)
    hf2, hb2 = bilstm(a2in, win2_ref, whh2_ref, b2_ref)

    # -------- label attention 2: single head, scores only (= logits) --------
    m2 = m2_ref[...]
    out_ref[...] = (jnp.dot(hf2, m2[0:H, :], preferred_element_type=f32)
                    + jnp.dot(hb2, m2[H:2 * H, :], preferred_element_type=f32))
    # TODO(synk): for scaled NUM_LABELS pad the last output dim to a multiple
    # of 128 (lane-dense stores); negligible at L=5.


# ======================= parameters & forward =======================
def init_params(key):
    keys = iter(jax.random.split(key, 32))

    def nrm(shape, scale=0.4):
        return scale * jax.random.normal(next(keys), shape, dtype=jnp.float32)

    def lstm_params(din, h):
        # transposed PyTorch weights: W_ih^T (din,4h), W_hh^T (h,4h), b_ih+b_hh (1,4h)
        return (nrm((din, 4 * h)), nrm((h, 4 * h)), nrm((1, 4 * h)),
                nrm((din, 4 * h)), nrm((h, 4 * h)), nrm((1, 4 * h)))

    def attn_params(din, hid):
        return (nrm((din, hid)), nrm((din, hid)), nrm((din, hid)))

    return {
        'word_emb': nrm((WORD_VOCAB, WORD_DIM)),
        'tag_emb': nrm((TAG_VOCAB, POS_DIM)),
        'label_emb': nrm((NUM_LABELS, OUTPUT)),
        'lstm1': lstm_params(WORD_DIM + POS_DIM, HIDDEN),
        'lstm2': lstm_params(HIDDEN, HIDDEN),
        'attn1': attn_params(OUTPUT, HIDDEN),
        'attn2': attn_params(OUTPUT, HIDDEN),
    }


def _pack_bilstm(p, H):
    """Pack a BiLSTM into block-diagonal slabs with interleaved gate columns.

    Column layout of the 8H gate axis: [i_f i_b | f_f f_b | g_f g_b | o_f o_b]
    so that i/f/g/o of BOTH directions are contiguous (B,2H) slices in-kernel.
    """
    wih_f, whh_f, b_f, wih_b, whh_b, b_b = p

    def interleave(fm, bm):
        parts = []
        for gi in range(4):
            parts.append(fm[:, gi * H:(gi + 1) * H])
            parts.append(bm[:, gi * H:(gi + 1) * H])
        return jnp.concatenate(parts, axis=-1)

    zi = jnp.zeros_like(wih_f)
    zh = jnp.zeros_like(whh_f)
    w_in = jnp.concatenate([interleave(wih_f, zi), interleave(zi, wih_b)], axis=0)   # (2*Din, 8H)
    w_hh = jnp.concatenate([interleave(whh_f, zh), interleave(zh, whh_b)], axis=0)   # (2H, 8H)
    b = interleave(b_f, b_b)                                                         # (1, 8H)
    return w_in, w_hh, b


@jax.jit
def label_attention_forward(params, word_ids, tag_ids):
    B, S = word_ids.shape
    din1 = WORD_DIM + POS_DIM
    L = NUM_LABELS
    H = HIDDEN

    # Embedding lookups + concat (XLA gather; tiny).
    word_emb = jnp.take(params['word_emb'], word_ids, axis=0)          # (B,S,word_dim)
    tag_emb = jnp.take(params['tag_emb'], tag_ids, axis=0)             # (B,S,pos_dim)
    rnn_input = jnp.concatenate([word_emb, tag_emb], axis=-1)          # (B,S,Din1)

    # Layout plumbing (wrapper-side): rows (t, b) = [x_b(t) | x_b(S-1-t)], so
    # the kernel's single input-projection matmul covers both directions and
    # the whole batch, and per-step slabs are contiguous row slices.
    x2 = jnp.concatenate([rnn_input, rnn_input[:, ::-1, :]], axis=-1)  # (B,S,2*Din1)
    x2 = jnp.transpose(x2, (1, 0, 2)).reshape(S * B, 2 * din1)         # (S*B, 2*Din1)

    # ---- parameter-only precompute: label-side constants (batch-invariant) ----
    label = params['label_emb']                                        # (L, 2H)
    wq1, wk1, wv1 = params['attn1']
    wq2, wk2, _wv2 = params['attn2']        # attn2 value projection is dead (scores only)
    k1 = jnp.dot(label, wk1)                                           # (L, H)
    v1 = jnp.dot(label, wv1)                                           # (L, H)
    scale1 = float(1.0 / np.sqrt(HEAD_DIM1))        # attn1 head dim = 4
    scale2 = float(1.0 / np.sqrt(H))                # attn2: n_head=1 -> head dim = H

    col_head = np.arange(N_HEAD1 * L) // L                             # head of each score col
    feat_head = np.arange(H) // HEAD_DIM1                              # head of each feature col
    kmask = jnp.asarray(feat_head[:, None] == col_head[None, :], jnp.float32)   # (H, NH*L)
    vmask = jnp.asarray(col_head[:, None] == feat_head[None, :], jnp.float32)   # (NH*L, H)
    kbd = jnp.tile(k1.T * scale1, (1, N_HEAD1)) * kmask                # (H, NH*L) block-diag K
    vbd = jnp.tile(v1, (N_HEAD1, 1)) * vmask                           # (NH*L, H) block-diag V
    # Folded trace-time algebra (performance review items 2 & 3):
    m1 = jnp.dot(wq1, kbd)                                             # (2H, NH*L)
    g1 = jnp.asarray(col_head[:, None] == col_head[None, :], jnp.float32)   # (NH*L, NH*L)
    m2 = jnp.dot(wq2, jnp.dot(label, wk2).T * scale2)                  # (2H, L)

    lstm1_packed = _pack_bilstm(params['lstm1'], H)
    lstm2_packed = _pack_bilstm(params['lstm2'], H)

    # Single fused kernel, no grid: on single-TC v5e/v6e a batch grid is just a
    # serial loop, so the batch is instead stacked into the recurrence rows.
    # TODO(synk): on v7x (2 TCs) add a leading batch grid axis with
    # pltpu.CORE_PARALLEL (and per-core batch stacking) to split across cores;
    # budget VMEM against 64 MiB physical / 32 MiB scoped per TC when scaling.
    logits2d = pl.pallas_call(
        functools.partial(fused_forward_kernel, S=S, B=B, H=H),
        out_shape=jax.ShapeDtypeStruct((S * B, L), jnp.float32),
    )(x2, m1, g1, vbd, m2, *lstm1_packed, *lstm2_packed)

    logits = jnp.transpose(logits2d.reshape(S, B, L), (1, 0, 2))       # (B, S, L)
    preds = jnp.argmax(logits, axis=-1)                                # (B, S)
    return logits, preds
    # TODO(synk): CRF decode path (use_crf=True) is sequential host-side
    # Viterbi; only the default use_crf=False path is implemented.


# ============== pure-JAX reference (numerical cross-check) ==============
def _reference_forward(params, word_ids, tag_ids):
    P = lax.Precision.HIGHEST
    word_emb = jnp.take(params['word_emb'], word_ids, axis=0)
    tag_emb = jnp.take(params['tag_emb'], tag_ids, axis=0)
    x = jnp.concatenate([word_emb, tag_emb], axis=-1)

    def lstm_dir(seq, wih, whh, b, reverse):
        H = whh.shape[0]
        seq = seq[::-1] if reverse else seq

        def step(carry, xt):
            h, c = carry
            g = jnp.dot(xt, wih, precision=P) + jnp.dot(h, whh, precision=P) + b[0]
            i = jax.nn.sigmoid(g[0:H])
            f = jax.nn.sigmoid(g[H:2 * H])
            gg = jnp.tanh(g[2 * H:3 * H])
            o = jax.nn.sigmoid(g[3 * H:4 * H])
            c = f * c + i * gg
            h = o * jnp.tanh(c)
            return (h, c), h

        _, hs = lax.scan(step, (jnp.zeros((H,), jnp.float32),
                                jnp.zeros((H,), jnp.float32)), seq)
        return hs[::-1] if reverse else hs

    def bilstm(xb, p):
        wih_f, whh_f, b_f, wih_b, whh_b, b_b = p
        hf = jax.vmap(lambda s: lstm_dir(s, wih_f, whh_f, b_f, False))(xb)
        hb = jax.vmap(lambda s: lstm_dir(s, wih_b, whh_b, b_b, True))(xb)
        return jnp.concatenate([hf, hb], axis=-1)

    def mha(query, label, wq, wk, wv, n_head):
        q = jnp.einsum('bsd,dh->bsh', query, wq, precision=P)
        k = jnp.dot(label, wk, precision=P)
        v = jnp.dot(label, wv, precision=P)
        d = q.shape[-1] // n_head
        outs, scores = [], []
        for h in range(n_head):
            sl = slice(h * d, (h + 1) * d)
            s = jnp.einsum('bqd,kd->bqk', q[..., sl], k[:, sl],
                           precision=P) / float(np.sqrt(d))
            scores.append(s)
            p_attn = jax.nn.softmax(s, axis=-1)
            outs.append(jnp.einsum('bqk,kd->bqd', p_attn, v[:, sl], precision=P))
        return jnp.concatenate(outs, axis=-1), jnp.stack(scores, axis=1)

    label = params['label_emb']
    r1 = bilstm(x, params['lstm1'])
    a1, _ = mha(r1, label, *params['attn1'], n_head=N_HEAD1)
    r2 = bilstm(a1, params['lstm2'])
    _, sc = mha(r2, label, *params['attn2'], n_head=1)
    return sc[:, 0]


if __name__ == "__main__":
    key = jax.random.PRNGKey(0)
    pkey, kk1, kk2, kk3 = jax.random.split(key, 4)
    params = init_params(pkey)

    word_ids = jax.random.randint(kk1, (BATCH, SEQ), 1, WORD_VOCAB, dtype=jnp.int32)
    word_ids = word_ids.at[1, 6:].set(0)   # some padding (id 0) in batch element 1
    tag_ids = jax.random.randint(kk2, (BATCH, SEQ), 0, TAG_VOCAB, dtype=jnp.int32)
    label_ids = jax.random.randint(kk3, (BATCH, SEQ), 0, NUM_LABELS, dtype=jnp.int32)

    logits, preds = label_attention_forward(params, word_ids, tag_ids)
    jax.block_until_ready((logits, preds))
    assert logits.shape == (BATCH, SEQ, NUM_LABELS)
    assert bool(jnp.all(jnp.isfinite(logits)))

    # numerical cross-check against the pure-JAX reference
    ref_logits = jax.jit(_reference_forward)(params, word_ids, tag_ids)
    err = float(jnp.max(jnp.abs(logits - ref_logits)))
    ref_mag = float(jnp.max(jnp.abs(ref_logits)))
    assert err <= 5e-2 * max(ref_mag, 1.0) + 1e-4, (
        f"kernel/reference mismatch: max abs err {err:.3e} (ref magnitude {ref_mag:.3e})")

    # eval-branch postprocessing (mirrors the PyTorch inference path, host side)
    mask = (word_ids != 0)
    lengths = [int(l) for l in mask.sum(axis=1)]
    answers = [row[:l] for row, l in zip(label_ids.tolist(), lengths)]
    predictions = [row[:l] for row, l in zip(preds.tolist(), lengths)]
    assert len(answers) == len(predictions) == BATCH

    print("KERNEL_OK")
</pallas_src>

<mosaic_0001>
module attributes {stable_mosaic.version = 11 : i64} {
  func.func @fused_forward_kernel(%arg0: memref<16x48xf32, #tpu.memory_space<vmem>>, %arg1: memref<64x40xf32, #tpu.memory_space<vmem>>, %arg2: memref<40x40xf32, #tpu.memory_space<vmem>>, %arg3: memref<40x32xf32, #tpu.memory_space<vmem>>, %arg4: memref<64x5xf32, #tpu.memory_space<vmem>>, %arg5: memref<48x256xf32, #tpu.memory_space<vmem>>, %arg6: memref<64x256xf32, #tpu.memory_space<vmem>>, %arg7: memref<1x256xf32, #tpu.memory_space<vmem>>, %arg8: memref<64x256xf32, #tpu.memory_space<vmem>>, %arg9: memref<64x256xf32, #tpu.memory_space<vmem>>, %arg10: memref<1x256xf32, #tpu.memory_space<vmem>>, %arg11: memref<16x5xf32, #tpu.memory_space<vmem>>) attributes {dimension_semantics = [], scalar_prefetch = 0 : i64, scratch_operands = 0 : i64, tpu.core_type = #tpu.core_type<tc>} {
    %c0 = arith.constant 0 : index
    %c0_0 = arith.constant 0 : index
    %0 = vector.load %arg0[%c0, %c0_0] : memref<16x48xf32, #tpu.memory_space<vmem>>, vector<16x48xf32>
    %c0_1 = arith.constant 0 : index
    %c0_2 = arith.constant 0 : index
    %1 = vector.load %arg5[%c0_1, %c0_2] : memref<48x256xf32, #tpu.memory_space<vmem>>, vector<48x256xf32>
    %cst = arith.constant dense<0.000000e+00> : vector<16x256xf32>
    %2 = tpu.matmul %0, %1, %cst {dimension_numbers = #tpu.dot_dimension_numbers<[1], [0], [0], [1], [0, 0, 1, 1], [], []>} : vector<16x48xf32>, vector<48x256xf32>, vector<16x256xf32> -> vector<16x256xf32>
    %c0_3 = arith.constant 0 : index
    %c0_4 = arith.constant 0 : index
    %3 = vector.load %arg7[%c0_3, %c0_4] : memref<1x256xf32, #tpu.memory_space<vmem>>, vector<1x256xf32>
    %4 = vector.broadcast %3 : vector<1x256xf32> to vector<16x256xf32>
    %5 = arith.addf %2, %4 : vector<16x256xf32>
    %c0_5 = arith.constant 0 : index
    %c0_6 = arith.constant 0 : index
    %6 = vector.load %arg6[%c0_5, %c0_6] : memref<64x256xf32, #tpu.memory_space<vmem>>, vector<64x256xf32>
    %cst_7 = arith.constant 0.000000e+00 : f32
    %7 = vector.broadcast %cst_7 : f32 to vector<2x64xf32>
    %cst_8 = arith.constant 0.000000e+00 : f32
    %8 = vector.broadcast %cst_8 : f32 to vector<2x64xf32>
    %9 = vector.extract_strided_slice %5 {offsets = [0, 0], sizes = [2, 256], strides = [1, 1]} : vector<16x256xf32> to vector<2x256xf32>
    %cst_9 = arith.constant dense<0.000000e+00> : vector<2x256xf32>
    %10 = tpu.matmul %7, %6, %cst_9 {dimension_numbers = #tpu.dot_dimension_numbers<[1], [0], [0], [1], [0, 0, 1, 1], [], []>} : vector<2x64xf32>, vector<64x256xf32>, vector<2x256xf32> -> vector<2x256xf32>
    %11 = arith.addf %9, %10 : vector<2x256xf32>
    %12 = arith.negf %11 : vector<2x256xf32>
    %13 = math.exp %12 : vector<2x256xf32>
    %cst_10 = arith.constant 1.000000e+00 : f32
    %14 = vector.broadcast %cst_10 : f32 to vector<2x256xf32>
    %15 = arith.addf %14, %13 : vector<2x256xf32>
    %16 = arith.divf %14, %15 : vector<2x256xf32>
    %17 = math.tanh %11 : vector<2x256xf32>
    %18 = vector.extract_strided_slice %16 {offsets = [0, 64], sizes = [2, 64], strides = [1, 1]} : vector<2x256xf32> to vector<2x64xf32>
    %19 = arith.mulf %18, %8 : vector<2x64xf32>
    %20 = vector.extract_strided_slice %16 {offsets = [0, 0], sizes = [2, 64], strides = [1, 1]} : vector<2x256xf32> to vector<2x64xf32>
    %21 = vector.extract_strided_slice %17 {offsets = [0, 128], sizes = [2, 64], strides = [1, 1]} : vector<2x256xf32> to vector<2x64xf32>
    %22 = arith.mulf %20, %21 : vector<2x64xf32>
    %23 = arith.addf %19, %22 : vector<2x64xf32>
    %24 = vector.extract_strided_slice %16 {offsets = [0, 192], sizes = [2, 64], strides = [1, 1]} : vector<2x256xf32> to vector<2x64xf32>
    %25 = math.tanh %23 : vector<2x64xf32>
    %26 = arith.mulf %24, %25 : vector<2x64xf32>
    %27 = vector.extract_strided_slice %5 {offsets = [2, 0], sizes = [2, 256], strides = [1, 1]} : vector<16x256xf32> to vector<2x256xf32>
    %cst_11 = arith.constant dense<0.000000e+00> : vector<2x256xf32>
    %28 = tpu.matmul %26, %6, %cst_11 {dimension_numbers = #tpu.dot_dimension_numbers<[1], [0], [0], [1], [0, 0, 1, 1], [], []>} : vector<2x64xf32>, vector<64x256xf32>, vector<2x256xf32> -> vector<2x256xf32>
    %29 = arith.addf %27, %28 : vector<2x256xf32>
    %30 = arith.negf %29 : vector<2x256xf32>
    %31 = math.exp %30 : vector<2x256xf32>
    %cst_12 = arith.constant 1.000000e+00 : f32
    %32 = vector.broadcast %cst_12 : f32 to vector<2x256xf32>
    %33 = arith.addf %32, %31 : vector<2x256xf32>
    %34 = arith.divf %32, %33 : vector<2x256xf32>
    %35 = math.tanh %29 : vector<2x256xf32>
    %36 = vector.extract_strided_slice %34 {offsets = [0, 64], sizes = [2, 64], strides = [1, 1]} : vector<2x256xf32> to vector<2x64xf32>
    %37 = arith.mulf %36, %23 : vector<2x64xf32>
    %38 = vector.extract_strided_slice %34 {offsets = [0, 0], sizes = [2, 64], strides = [1, 1]} : vector<2x256xf32> to vector<2x64xf32>
    %39 = vector.extract_strided_slice %35 {offsets = [0, 128], sizes = [2, 64], strides = [1, 1]} : vector<2x256xf32> to vector<2x64xf32>
    %40 = arith.mulf %38, %39 : vector<2x64xf32>
    %41 = arith.addf %37, %40 : vector<2x64xf32>
    %42 = vector.extract_strided_slice %34 {offsets = [0, 192], sizes = [2, 64], strides = [1, 1]} : vector<2x256xf32> to vector<2x64xf32>
    %43 = math.tanh %41 : vector<2x64xf32>
    %44 = arith.mulf %42, %43 : vector<2x64xf32>
    %45 = vector.extract_strided_slice %5 {offsets = [4, 0], sizes = [2, 256], strides = [1, 1]} : vector<16x256xf32> to vector<2x256xf32>
    %cst_13 = arith.constant dense<0.000000e+00> : vector<2x256xf32>
    %46 = tpu.matmul %44, %6, %cst_13 {dimension_numbers = #tpu.dot_dimension_numbers<[1], [0], [0], [1], [0, 0, 1, 1], [], []>} : vector<2x64xf32>, vector<64x256xf32>, vector<2x256xf32> -> vector<2x256xf32>
    %47 = arith.addf %45, %46 : vector<2x256xf32>
    %48 = arith.negf %47 : vector<2x256xf32>
    %49 = math.exp %48 : vector<2x256xf32>
    %cst_14 = arith.constant 1.000000e+00 : f32
    %50 = vector.broadcast %cst_14 : f32 to vector<2x256xf32>
    %51 = arith.addf %50, %49 : vector<2x256xf32>
    %52 = arith.divf %50, %51 : vector<2x256xf32>
    %53 = math.tanh %47 : vector<2x256xf32>
    %54 = vector.extract_strided_slice %52 {offsets = [0, 64], sizes = [2, 64], strides = [1, 1]} : vector<2x256xf32> to vector<2x64xf32>
    %55 = arith.mulf %54, %41 : vector<2x64xf32>
    %56 = vector.extract_strided_slice %52 {offsets = [0, 0], sizes = [2, 64], strides = [1, 1]} : vector<2x256xf32> to vector<2x64xf32>
    %57 = vector.extract_strided_slice %53 {offsets = [0, 128], sizes = [2, 64], strides = [1, 1]} : vector<2x256xf32> to vector<2x64xf32>
    %58 = arith.mulf %56, %57 : vector<2x64xf32>
    %59 = arith.addf %55, %58 : vector<2x64xf32>
    %60 = vector.extract_strided_slice %52 {offsets = [0, 192], sizes = [2, 64], strides = [1, 1]} : vector<2x256xf32> to vector<2x64xf32>
    %61 = math.tanh %59 : vector<2x64xf32>
    %62 = arith.mulf %60, %61 : vector<2x64xf32>
    %63 = vector.extract_strided_slice %5 {offsets = [6, 0], sizes = [2, 256], strides = [1, 1]} : vector<16x256xf32> to vector<2x256xf32>
    %cst_15 = arith.constant dense<0.000000e+00> : vector<2x256xf32>
    %64 = tpu.matmul %62, %6, %cst_15 {dimension_numbers = #tpu.dot_dimension_numbers<[1], [0], [0], [1], [0, 0, 1, 1], [], []>} : vector<2x64xf32>, vector<64x256xf32>, vector<2x256xf32> -> vector<2x256xf32>
    %65 = arith.addf %63, %64 : vector<2x256xf32>
    %66 = arith.negf %65 : vector<2x256xf32>
    %67 = math.exp %66 : vector<2x256xf32>
    %cst_16 = arith.constant 1.000000e+00 : f32
    %68 = vector.broadcast %cst_16 : f32 to vector<2x256xf32>
    %69 = arith.addf %68, %67 : vector<2x256xf32>
    %70 = arith.divf %68, %69 : vector<2x256xf32>
    %71 = math.tanh %65 : vector<2x256xf32>
    %72 = vector.extract_strided_slice %70 {offsets = [0, 64], sizes = [2, 64], strides = [1, 1]} : vector<2x256xf32> to vector<2x64xf32>
    %73 = arith.mulf %72, %59 : vector<2x64xf32>
    %74 = vector.extract_strided_slice %70 {offsets = [0, 0], sizes = [2, 64], strides = [1, 1]} : vector<2x256xf32> to vector<2x64xf32>
    %75 = vector.extract_strided_slice %71 {offsets = [0, 128], sizes = [2, 64], strides = [1, 1]} : vector<2x256xf32> to vector<2x64xf32>
    %76 = arith.mulf %74, %75 : vector<2x64xf32>
    %77 = arith.addf %73, %76 : vector<2x64xf32>
    %78 = vector.extract_strided_slice %70 {offsets = [0, 192], sizes = [2, 64], strides = [1, 1]} : vector<2x256xf32> to vector<2x64xf32>
    %79 = math.tanh %77 : vector<2x64xf32>
    %80 = arith.mulf %78, %79 : vector<2x64xf32>
    %81 = vector.extract_strided_slice %5 {offsets = [8, 0], sizes = [2, 256], strides = [1, 1]} : vector<16x256xf32> to vector<2x256xf32>
    %cst_17 = arith.constant dense<0.000000e+00> : vector<2x256xf32>
    %82 = tpu.matmul %80, %6, %cst_17 {dimension_numbers = #tpu.dot_dimension_numbers<[1], [0], [0], [1], [0, 0, 1, 1], [], []>} : vector<2x64xf32>, vector<64x256xf32>, vector<2x256xf32> -> vector<2x256xf32>
    %83 = arith.addf %81, %82 : vector<2x256xf32>
    %84 = arith.negf %83 : vector<2x256xf32>
    %85 = math.exp %84 : vector<2x256xf32>
    %cst_18 = arith.constant 1.000000e+00 : f32
    %86 = vector.broadcast %cst_18 : f32 to vector<2x256xf32>
    %87 = arith.addf %86, %85 : vector<2x256xf32>
    %88 = arith.divf %86, %87 : vector<2x256xf32>
    %89 = math.tanh %83 : vector<2x256xf32>
    %90 = vector.extract_strided_slice %88 {offsets = [0, 64], sizes = [2, 64], strides = [1, 1]} : vector<2x256xf32> to vector<2x64xf32>
    %91 = arith.mulf %90, %77 : vector<2x64xf32>
    %92 = vector.extract_strided_slice %88 {offsets = [0, 0], sizes = [2, 64], strides = [1, 1]} : vector<2x256xf32> to vector<2x64xf32>
    %93 = vector.extract_strided_slice %89 {offsets = [0, 128], sizes = [2, 64], strides = [1, 1]} : vector<2x256xf32> to vector<2x64xf32>
    %94 = arith.mulf %92, %93 : vector<2x64xf32>
    %95 = arith.addf %91, %94 : vector<2x64xf32>
    %96 = vector.extract_strided_slice %88 {offsets = [0, 192], sizes = [2, 64], strides = [1, 1]} : vector<2x256xf32> to vector<2x64xf32>
    %97 = math.tanh %95 : vector<2x64xf32>
    %98 = arith.mulf %96, %97 : vector<2x64xf32>
    %99 = vector.extract_strided_slice %5 {offsets = [10, 0], sizes = [2, 256], strides = [1, 1]} : vector<16x256xf32> to vector<2x256xf32>
    %cst_19 = arith.constant dense<0.000000e+00> : vector<2x256xf32>
    %100 = tpu.matmul %98, %6, %cst_19 {dimension_numbers = #tpu.dot_dimension_numbers<[1], [0], [0], [1], [0, 0, 1, 1], [], []>} : vector<2x64xf32>, vector<64x256xf32>, vector<2x256xf32> -> vector<2x256xf32>
    %101 = arith.addf %99, %100 : vector<2x256xf32>
    %102 = arith.negf %101 : vector<2x256xf32>
    %103 = math.exp %102 : vector<2x256xf32>
    %cst_20 = arith.constant 1.000000e+00 : f32
    %104 = vector.broadcast %cst_20 : f32 to vector<2x256xf32>
    %105 = arith.addf %104, %103 : vector<2x256xf32>
    %106 = arith.divf %104, %105 : vector<2x256xf32>
    %107 = math.tanh %101 : vector<2x256xf32>
    %108 = vector.extract_strided_slice %106 {offsets = [0, 64], sizes = [2, 64], strides = [1, 1]} : vector<2x256xf32> to vector<2x64xf32>
    %109 = arith.mulf %108, %95 : vector<2x64xf32>
    %110 = vector.extract_strided_slice %106 {offsets = [0, 0], sizes = [2, 64], strides = [1, 1]} : vector<2x256xf32> to vector<2x64xf32>
    %111 = vector.extract_strided_slice %107 {offsets = [0, 128], sizes = [2, 64], strides = [1, 1]} : vector<2x256xf32> to vector<2x64xf32>
    %112 = arith.mulf %110, %111 : vector<2x64xf32>
    %113 = arith.addf %109, %112 : vector<2x64xf32>
    %114 = vector.extract_strided_slice %106 {offsets = [0, 192], sizes = [2, 64], strides = [1, 1]} : vector<2x256xf32> to vector<2x64xf32>
    %115 = math.tanh %113 : vector<2x64xf32>
    %116 = arith.mulf %114, %115 : vector<2x64xf32>
    %117 = vector.extract_strided_slice %5 {offsets = [12, 0], sizes = [2, 256], strides = [1, 1]} : vector<16x256xf32> to vector<2x256xf32>
    %cst_21 = arith.constant dense<0.000000e+00> : vector<2x256xf32>
    %118 = tpu.matmul %116, %6, %cst_21 {dimension_numbers = #tpu.dot_dimension_numbers<[1], [0], [0], [1], [0, 0, 1, 1], [], []>} : vector<2x64xf32>, vector<64x256xf32>, vector<2x256xf32> -> vector<2x256xf32>
    %119 = arith.addf %117, %118 : vector<2x256xf32>
    %120 = arith.negf %119 : vector<2x256xf32>
    %121 = math.exp %120 : vector<2x256xf32>
    %cst_22 = arith.constant 1.000000e+00 : f32
    %122 = vector.broadcast %cst_22 : f32 to vector<2x256xf32>
    %123 = arith.addf %122, %121 : vector<2x256xf32>
    %124 = arith.divf %122, %123 : vector<2x256xf32>
    %125 = math.tanh %119 : vector<2x256xf32>
    %126 = vector.extract_strided_slice %124 {offsets = [0, 64], sizes = [2, 64], strides = [1, 1]} : vector<2x256xf32> to vector<2x64xf32>
    %127 = arith.mulf %126, %113 : vector<2x64xf32>
    %128 = vector.extract_strided_slice %124 {offsets = [0, 0], sizes = [2, 64], strides = [1, 1]} : vector<2x256xf32> to vector<2x64xf32>
    %129 = vector.extract_strided_slice %125 {offsets = [0, 128], sizes = [2, 64], strides = [1, 1]} : vector<2x256xf32> to vector<2x64xf32>
    %130 = arith.mulf %128, %129 : vector<2x64xf32>
    %131 = arith.addf %127, %130 : vector<2x64xf32>
    %132 = vector.extract_strided_slice %124 {offsets = [0, 192], sizes = [2, 64], strides = [1, 1]} : vector<2x256xf32> to vector<2x64xf32>
    %133 = math.tanh %131 : vector<2x64xf32>
    %134 = arith.mulf %132, %133 : vector<2x64xf32>
    %135 = vector.extract_strided_slice %5 {offsets = [14, 0], sizes = [2, 256], strides = [1, 1]} : vector<16x256xf32> to vector<2x256xf32>
    %cst_23 = arith.constant dense<0.000000e+00> : vector<2x256xf32>
    %136 = tpu.matmul %134, %6, %cst_23 {dimension_numbers = #tpu.dot_dimension_numbers<[1], [0], [0], [1], [0, 0, 1, 1], [], []>} : vector<2x64xf32>, vector<64x256xf32>, vector<2x256xf32> -> vector<2x256xf32>
    %137 = arith.addf %135, %136 : vector<2x256xf32>
    %138 = arith.negf %137 : vector<2x256xf32>
    %139 = math.exp %138 : vector<2x256xf32>
    %cst_24 = arith.constant 1.000000e+00 : f32
    %140 = vector.broadcast %cst_24 : f32 to vector<2x256xf32>
    %141 = arith.addf %140, %139 : vector<2x256xf32>
    %142 = arith.divf %140, %141 : vector<2x256xf32>
    %143 = math.tanh %137 : vector<2x256xf32>
    %144 = vector.extract_strided_slice %142 {offsets = [0, 64], sizes = [2, 64], strides = [1, 1]} : vector<2x256xf32> to vector<2x64xf32>
    %145 = arith.mulf %144, %131 : vector<2x64xf32>
    %146 = vector.extract_strided_slice %142 {offsets = [0, 0], sizes = [2, 64], strides = [1, 1]} : vector<2x256xf32> to vector<2x64xf32>
    %147 = vector.extract_strided_slice %143 {offsets = [0, 128], sizes = [2, 64], strides = [1, 1]} : vector<2x256xf32> to vector<2x64xf32>
    %148 = arith.mulf %146, %147 : vector<2x64xf32>
    %149 = arith.addf %145, %148 : vector<2x64xf32>
    %150 = vector.extract_strided_slice %142 {offsets = [0, 192], sizes = [2, 64], strides = [1, 1]} : vector<2x256xf32> to vector<2x64xf32>
    %151 = math.tanh %149 : vector<2x64xf32>
    %152 = arith.mulf %150, %151 : vector<2x64xf32>
    %153 = vector.extract_strided_slice %26 {offsets = [0, 0], sizes = [2, 32], strides = [1, 1]} : vector<2x64xf32> to vector<2x32xf32>
    %154 = vector.extract_strided_slice %44 {offsets = [0, 0], sizes = [2, 32], strides = [1, 1]} : vector<2x64xf32> to vector<2x32xf32>
    %155 = vector.extract_strided_slice %62 {offsets = [0, 0], sizes = [2, 32], strides = [1, 1]} : vector<2x64xf32> to vector<2x32xf32>
    %156 = vector.extract_strided_slice %80 {offsets = [0, 0], sizes = [2, 32], strides = [1, 1]} : vector<2x64xf32> to vector<2x32xf32>
    %157 = vector.extract_strided_slice %98 {offsets = [0, 0], sizes = [2, 32], strides = [1, 1]} : vector<2x64xf32> to vector<2x32xf32>
    %158 = vector.extract_strided_slice %116 {offsets = [0, 0], sizes = [2, 32], strides = [1, 1]} : vector<2x64xf32> to vector<2x32xf32>
    %159 = vector.extract_strided_slice %134 {offsets = [0, 0], sizes = [2, 32], strides = [1, 1]} : vector<2x64xf32> to vector<2x32xf32>
    %160 = vector.extract_strided_slice %152 {offsets = [0, 0], sizes = [2, 32], strides = [1, 1]} : vector<2x64xf32> to vector<2x32xf32>
    %161 = tpu.concatenate %153, %154, %155, %156, %157, %158, %159, %160 in 0 : vector<2x32xf32>, vector<2x32xf32>, vector<2x32xf32>, vector<2x32xf32>, vector<2x32xf32>, vector<2x32xf32>, vector<2x32xf32>, vector<2x32xf32> -> vector<16x32xf32>
    %162 = vector.extract_strided_slice %152 {offsets = [0, 32], sizes = [2, 32], strides = [1, 1]} : vector<2x64xf32> to vector<2x32xf32>
    %163 = vector.extract_strided_slice %134 {offsets = [0, 32], sizes = [2, 32], strides = [1, 1]} : vector<2x64xf32> to vector<2x32xf32>
    %164 = vector.extract_strided_slice %116 {offsets = [0, 32], sizes = [2, 32], strides = [1, 1]} : vector<2x64xf32> to vector<2x32xf32>
    %165 = vector.extract_strided_slice %98 {offsets = [0, 32], sizes = [2, 32], strides = [1, 1]} : vector<2x64xf32> to vector<2x32xf32>
    %166 = vector.extract_strided_slice %80 {offsets = [0, 32], sizes = [2, 32], strides = [1, 1]} : vector<2x64xf32> to vector<2x32xf32>
    %167 = vector.extract_strided_slice %62 {offsets = [0, 32], sizes = [2, 32], strides = [1, 1]} : vector<2x64xf32> to vector<2x32xf32>
    %168 = vector.extract_strided_slice %44 {offsets = [0, 32], sizes = [2, 32], strides = [1, 1]} : vector<2x64xf32> to vector<2x32xf32>
    %169 = vector.extract_strided_slice %26 {offsets = [0, 32], sizes = [2, 32], strides = [1, 1]} : vector<2x64xf32> to vector<2x32xf32>
    %170 = tpu.concatenate %162, %163, %164, %165, %166, %167, %168, %169 in 0 : vector<2x32xf32>, vector<2x32xf32>, vector<2x32xf32>, vector<2x32xf32>, vector<2x32xf32>, vector<2x32xf32>, vector<2x32xf32>, vector<2x32xf32> -> vector<16x32xf32>
    %c0_25 = arith.constant 0 : index
    %c0_26 = arith.constant 0 : index
    %171 = vector.load %arg1[%c0_25, %c0_26] : memref<64x40xf32, #tpu.memory_space<vmem>>, vector<64x40xf32>
    %172 = vector.extract_strided_slice %171 {offsets = [0, 0], sizes = [32, 40], strides = [1, 1]} : vector<64x40xf32> to vector<32x40xf32>
    %cst_27 = arith.constant dense<0.000000e+00> : vector<16x40xf32>
    %173 = tpu.matmul %161, %172, %cst_27 {dimension_numbers = #tpu.dot_dimension_numbers<[1], [0], [0], [1], [0, 0, 1, 1], [], []>} : vector<16x32xf32>, vector<32x40xf32>, vector<16x40xf32> -> vector<16x40xf32>
    %174 = vector.extract_strided_slice %171 {offsets = [32, 0], sizes = [32, 40], strides = [1, 1]} : vector<64x40xf32> to vector<32x40xf32>
    %cst_28 = arith.constant dense<0.000000e+00> : vector<16x40xf32>
    %175 = tpu.matmul %170, %174, %cst_28 {dimension_numbers = #tpu.dot_dimension_numbers<[1], [0], [0], [1], [0, 0, 1, 1], [], []>} : vector<16x32xf32>, vector<32x40xf32>, vector<16x40xf32> -> vector<16x40xf32>
    %176 = arith.addf %173, %175 : vector<16x40xf32>
    %cst_29 = arith.constant dense<0xFF800000> : vector<16xf32>
    %177 = vector.multi_reduction <maximumf>, %176, %cst_29 [1] : vector<16x40xf32> to vector<16xf32>
    %178 = vector.shape_cast %177 : vector<16xf32> to vector<16x1xf32>
    %179 = vector.broadcast %178 : vector<16x1xf32> to vector<16x40xf32>
    %180 = arith.subf %176, %179 : vector<16x40xf32>
    %181 = math.exp %180 : vector<16x40xf32>
    %c0_30 = arith.constant 0 : index
    %c0_31 = arith.constant 0 : index
    %182 = vector.load %arg2[%c0_30, %c0_31] : memref<40x40xf32, #tpu.memory_space<vmem>>, vector<40x40xf32>
    %cst_32 = arith.constant dense<0.000000e+00> : vector<16x40xf32>
    %183 = tpu.matmul %181, %182, %cst_32 {dimension_numbers = #tpu.dot_dimension_numbers<[1], [0], [0], [1], [0, 0, 1, 1], [], []>} : vector<16x40xf32>, vector<40x40xf32>, vector<16x40xf32> -> vector<16x40xf32>
    %184 = tpu.reciprocal %183 {approx = true} : vector<16x40xf32> -> vector<16x40xf32>
    %185 = arith.mulf %181, %184 : vector<16x40xf32>
    %c0_33 = arith.constant 0 : index
    %c0_34 = arith.constant 0 : index
    %186 = vector.load %arg3[%c0_33, %c0_34] : memref<40x32xf32, #tpu.memory_space<vmem>>, vector<40x32xf32>
    %cst_35 = arith.constant dense<0.000000e+00> : vector<16x32xf32>
    %187 = tpu.matmul %185, %186, %cst_35 {dimension_numbers = #tpu.dot_dimension_numbers<[1], [0], [0], [1], [0, 0, 1, 1], [], []>} : vector<16x40xf32>, vector<40x32xf32>, vector<16x32xf32> -> vector<16x32xf32>
    %188 = vector.extract_strided_slice %187 {offsets = [14, 0], sizes = [2, 32], strides = [1, 1]} : vector<16x32xf32> to vector<2x32xf32>
    %189 = vector.extract_strided_slice %187 {offsets = [12, 0], sizes = [2, 32], strides = [1, 1]} : vector<16x32xf32> to vector<2x32xf32>
    %190 = vector.extract_strided_slice %187 {offsets = [10, 0], sizes = [2, 32], strides = [1, 1]} : vector<16x32xf32> to vector<2x32xf32>
    %191 = vector.extract_strided_slice %187 {offsets = [8, 0], sizes = [2, 32], strides = [1, 1]} : vector<16x32xf32> to vector<2x32xf32>
    %192 = vector.extract_strided_slice %187 {offsets = [6, 0], sizes = [2, 32], strides = [1, 1]} : vector<16x32xf32> to vector<2x32xf32>
    %193 = vector.extract_strided_slice %187 {offsets = [4, 0], sizes = [2, 32], strides = [1, 1]} : vector<16x32xf32> to vector<2x32xf32>
    %194 = vector.extract_strided_slice %187 {offsets = [2, 0], sizes = [2, 32], strides = [1, 1]} : vector<16x32xf32> to vector<2x32xf32>
    %195 = vector.extract_strided_slice %187 {offsets = [0, 0], sizes = [2, 32], strides = [1, 1]} : vector<16x32xf32> to vector<2x32xf32>
    %196 = tpu.concatenate %188, %189, %190, %191, %192, %193, %194, %195 in 0 : vector<2x32xf32>, vector<2x32xf32>, vector<2x32xf32>, vector<2x32xf32>, vector<2x32xf32>, vector<2x32xf32>, vector<2x32xf32>, vector<2x32xf32> -> vector<16x32xf32>
    %197 = tpu.concatenate %187, %196 in 1 : vector<16x32xf32>, vector<16x32xf32> -> vector<16x64xf32>
    %c0_36 = arith.constant 0 : index
    %c0_37 = arith.constant 0 : index
    %198 = vector.load %arg8[%c0_36, %c0_37] : memref<64x256xf32, #tpu.memory_space<vmem>>, vector<64x256xf32>
    %cst_38 = arith.constant dense<0.000000e+00> : vector<16x256xf32>
    %199 = tpu.matmul %197, %198, %cst_38 {dimension_numbers = #tpu.dot_dimension_numbers<[1], [0], [0], [1], [0, 0, 1, 1], [], []>} : vector<16x64xf32>, vector<64x256xf32>, vector<16x256xf32> -> vector<16x256xf32>
    %c0_39 = arith.constant 0 : index
    %c0_40 = arith.constant 0 : index
    %200 = vector.load %arg10[%c0_39, %c0_40] : memref<1x256xf32, #tpu.memory_space<vmem>>, vector<1x256xf32>
    %201 = vector.broadcast %200 : vector<1x256xf32> to vector<16x256xf32>
    %202 = arith.addf %199, %201 : vector<16x256xf32>
    %c0_41 = arith.constant 0 : index
    %c0_42 = arith.constant 0 : index
    %203 = vector.load %arg9[%c0_41, %c0_42] : memref<64x256xf32, #tpu.memory_space<vmem>>, vector<64x256xf32>
    %cst_43 = arith.constant 0.000000e+00 : f32
    %204 = vector.broadcast %cst_43 : f32 to vector<2x64xf32>
    %cst_44 = arith.constant 0.000000e+00 : f32
    %205 = vector.broadcast %cst_44 : f32 to vector<2x64xf32>
    %206 = vector.extract_strided_slice %202 {offsets = [0, 0], sizes = [2, 256], strides = [1, 1]} : vector<16x256xf32> to vector<2x256xf32>
    %cst_45 = arith.constant dense<0.000000e+00> : vector<2x256xf32>
    %207 = tpu.matmul %204, %203, %cst_45 {dimension_numbers = #tpu.dot_dimension_numbers<[1], [0], [0], [1], [0, 0, 1, 1], [], []>} : vector<2x64xf32>, vector<64x256xf32>, vector<2x256xf32> -> vector<2x256xf32>
    %208 = arith.addf %206, %207 : vector<2x256xf32>
    %209 = arith.negf %208 : vector<2x256xf32>
    %210 = math.exp %209 : vector<2x256xf32>
    %cst_46 = arith.constant 1.000000e+00 : f32
    %211 = vector.broadcast %cst_46 : f32 to vector<2x256xf32>
    %212 = arith.addf %211, %210 : vector<2x256xf32>
    %213 = arith.divf %211, %212 : vector<2x256xf32>
    %214 = math.tanh %208 : vector<2x256xf32>
    %215 = vector.extract_strided_slice %213 {offsets = [0, 64], sizes = [2, 64], strides = [1, 1]} : vector<2x256xf32> to vector<2x64xf32>
    %216 = arith.mulf %215, %205 : vector<2x64xf32>
    %217 = vector.extract_strided_slice %213 {offsets = [0, 0], sizes = [2, 64], strides = [1, 1]} : vector<2x256xf32> to vector<2x64xf32>
    %218 = vector.extract_strided_slice %214 {offsets = [0, 128], sizes = [2, 64], strides = [1, 1]} : vector<2x256xf32> to vector<2x64xf32>
    %219 = arith.mulf %217, %218 : vector<2x64xf32>
    %220 = arith.addf %216, %219 : vector<2x64xf32>
    %221 = vector.extract_strided_slice %213 {offsets = [0, 192], sizes = [2, 64], strides = [1, 1]} : vector<2x256xf32> to vector<2x64xf32>
    %222 = math.tanh %220 : vector<2x64xf32>
    %223 = arith.mulf %221, %222 : vector<2x64xf32>
    %224 = vector.extract_strided_slice %202 {offsets = [2, 0], sizes = [2, 256], strides = [1, 1]} : vector<16x256xf32> to vector<2x256xf32>
    %cst_47 = arith.constant dense<0.000000e+00> : vector<2x256xf32>
    %225 = tpu.matmul %223, %203, %cst_47 {dimension_numbers = #tpu.dot_dimension_numbers<[1], [0], [0], [1], [0, 0, 1, 1], [], []>} : vector<2x64xf32>, vector<64x256xf32>, vector<2x256xf32> -> vector<2x256xf32>
    %226 = arith.addf %224, %225 : vector<2x256xf32>
    %227 = arith.negf %226 : vector<2x256xf32>
    %228 = math.exp %227 : vector<2x256xf32>
    %cst_48 = arith.constant 1.000000e+00 : f32
    %229 = vector.broadcast %cst_48 : f32 to vector<2x256xf32>
    %230 = arith.addf %229, %228 : vector<2x256xf32>
    %231 = arith.divf %229, %230 : vector<2x256xf32>
    %232 = math.tanh %226 : vector<2x256xf32>
    %233 = vector.extract_strided_slice %231 {offsets = [0, 64], sizes = [2, 64], strides = [1, 1]} : vector<2x256xf32> to vector<2x64xf32>
    %234 = arith.mulf %233, %220 : vector<2x64xf32>
    %235 = vector.extract_strided_slice %231 {offsets = [0, 0], sizes = [2, 64], strides = [1, 1]} : vector<2x256xf32> to vector<2x64xf32>
    %236 = vector.extract_strided_slice %232 {offsets = [0, 128], sizes = [2, 64], strides = [1, 1]} : vector<2x256xf32> to vector<2x64xf32>
    %237 = arith.mulf %235, %236 : vector<2x64xf32>
    %238 = arith.addf %234, %237 : vector<2x64xf32>
    %239 = vector.extract_strided_slice %231 {offsets = [0, 192], sizes = [2, 64], strides = [1, 1]} : vector<2x256xf32> to vector<2x64xf32>
    %240 = math.tanh %238 : vector<2x64xf32>
    %241 = arith.mulf %239, %240 : vector<2x64xf32>
    %242 = vector.extract_strided_slice %202 {offsets = [4, 0], sizes = [2, 256], strides = [1, 1]} : vector<16x256xf32> to vector<2x256xf32>
    %cst_49 = arith.constant dense<0.000000e+00> : vector<2x256xf32>
    %243 = tpu.matmul %241, %203, %cst_49 {dimension_numbers = #tpu.dot_dimension_numbers<[1], [0], [0], [1], [0, 0, 1, 1], [], []>} : vector<2x64xf32>, vector<64x256xf32>, vector<2x256xf32> -> vector<2x256xf32>
    %244 = arith.addf %242, %243 : vector<2x256xf32>
    %245 = arith.negf %244 : vector<2x256xf32>
    %246 = math.exp %245 : vector<2x256xf32>
    %cst_50 = arith.constant 1.000000e+00 : f32
    %247 = vector.broadcast %cst_50 : f32 to vector<2x256xf32>
    %248 = arith.addf %247, %246 : vector<2x256xf32>
    %249 = arith.divf %247, %248 : vector<2x256xf32>
    %250 = math.tanh %244 : vector<2x256xf32>
    %251 = vector.extract_strided_slice %249 {offsets = [0, 64], sizes = [2, 64], strides = [1, 1]} : vector<2x256xf32> to vector<2x64xf32>
    %252 = arith.mulf %251, %238 : vector<2x64xf32>
    %253 = vector.extract_strided_slice %249 {offsets = [0, 0], sizes = [2, 64], strides = [1, 1]} : vector<2x256xf32> to vector<2x64xf32>
    %254 = vector.extract_strided_slice %250 {offsets = [0, 128], sizes = [2, 64], strides = [1, 1]} : vector<2x256xf32> to vector<2x64xf32>
    %255 = arith.mulf %253, %254 : vector<2x64xf32>
    %256 = arith.addf %252, %255 : vector<2x64xf32>
    %257 = vector.extract_strided_slice %249 {offsets = [0, 192], sizes = [2, 64], strides = [1, 1]} : vector<2x256xf32> to vector<2x64xf32>
    %258 = math.tanh %256 : vector<2x64xf32>
    %259 = arith.mulf %257, %258 : vector<2x64xf32>
    %260 = vector.extract_strided_slice %202 {offsets = [6, 0], sizes = [2, 256], strides = [1, 1]} : vector<16x256xf32> to vector<2x256xf32>
    %cst_51 = arith.constant dense<0.000000e+00> : vector<2x256xf32>
    %261 = tpu.matmul %259, %203, %cst_51 {dimension_numbers = #tpu.dot_dimension_numbers<[1], [0], [0], [1], [0, 0, 1, 1], [], []>} : vector<2x64xf32>, vector<64x256xf32>, vector<2x256xf32> -> vector<2x256xf32>
    %262 = arith.addf %260, %261 : vector<2x256xf32>
    %263 = arith.negf %262 : vector<2x256xf32>
    %264 = math.exp %263 : vector<2x256xf32>
    %cst_52 = arith.constant 1.000000e+00 : f32
    %265 = vector.broadcast %cst_52 : f32 to vector<2x256xf32>
    %266 = arith.addf %265, %264 : vector<2x256xf32>
    %267 = arith.divf %265, %266 : vector<2x256xf32>
    %268 = math.tanh %262 : vector<2x256xf32>
    %269 = vector.extract_strided_slice %267 {offsets = [0, 64], sizes = [2, 64], strides = [1, 1]} : vector<2x256xf32> to vector<2x64xf32>
    %270 = arith.mulf %269, %256 : vector<2x64xf32>
    %271 = vector.extract_strided_slice %267 {offsets = [0, 0], sizes = [2, 64], strides = [1, 1]} : vector<2x256xf32> to vector<2x64xf32>
    %272 = vector.extract_strided_slice %268 {offsets = [0, 128], sizes = [2, 64], strides = [1, 1]} : vector<2x256xf32> to vector<2x64xf32>
    %273 = arith.mulf %271, %272 : vector<2x64xf32>
    %274 = arith.addf %270, %273 : vector<2x64xf32>
    %275 = vector.extract_strided_slice %267 {offsets = [0, 192], sizes = [2, 64], strides = [1, 1]} : vector<2x256xf32> to vector<2x64xf32>
    %276 = math.tanh %274 : vector<2x64xf32>
    %277 = arith.mulf %275, %276 : vector<2x64xf32>
    %278 = vector.extract_strided_slice %202 {offsets = [8, 0], sizes = [2, 256], strides = [1, 1]} : vector<16x256xf32> to vector<2x256xf32>
    %cst_53 = arith.constant dense<0.000000e+00> : vector<2x256xf32>
    %279 = tpu.matmul %277, %203, %cst_53 {dimension_numbers = #tpu.dot_dimension_numbers<[1], [0], [0], [1], [0, 0, 1, 1], [], []>} : vector<2x64xf32>, vector<64x256xf32>, vector<2x256xf32> -> vector<2x256xf32>
    %280 = arith.addf %278, %279 : vector<2x256xf32>
    %281 = arith.negf %280 : vector<2x256xf32>
    %282 = math.exp %281 : vector<2x256xf32>
    %cst_54 = arith.constant 1.000000e+00 : f32
    %283 = vector.broadcast %cst_54 : f32 to vector<2x256xf32>
    %284 = arith.addf %283, %282 : vector<2x256xf32>
    %285 = arith.divf %283, %284 : vector<2x256xf32>
    %286 = math.tanh %280 : vector<2x256xf32>
    %287 = vector.extract_strided_slice %285 {offsets = [0, 64], sizes = [2, 64], strides = [1, 1]} : vector<2x256xf32> to vector<2x64xf32>
    %288 = arith.mulf %287, %274 : vector<2x64xf32>
    %289 = vector.extract_strided_slice %285 {offsets = [0, 0], sizes = [2, 64], strides = [1, 1]} : vector<2x256xf32> to vector<2x64xf32>
    %290 = vector.extract_strided_slice %286 {offsets = [0, 128], sizes = [2, 64], strides = [1, 1]} : vector<2x256xf32> to vector<2x64xf32>
    %291 = arith.mulf %289, %290 : vector<2x64xf32>
    %292 = arith.addf %288, %291 : vector<2x64xf32>
    %293 = vector.extract_strided_slice %285 {offsets = [0, 192], sizes = [2, 64], strides = [1, 1]} : vector<2x256xf32> to vector<2x64xf32>
    %294 = math.tanh %292 : vector<2x64xf32>
    %295 = arith.mulf %293, %294 : vector<2x64xf32>
    %296 = vector.extract_strided_slice %202 {offsets = [10, 0], sizes = [2, 256], strides = [1, 1]} : vector<16x256xf32> to vector<2x256xf32>
    %cst_55 = arith.constant dense<0.000000e+00> : vector<2x256xf32>
    %297 = tpu.matmul %295, %203, %cst_55 {dimension_numbers = #tpu.dot_dimension_numbers<[1], [0], [0], [1], [0, 0, 1, 1], [], []>} : vector<2x64xf32>, vector<64x256xf32>, vector<2x256xf32> -> vector<2x256xf32>
    %298 = arith.addf %296, %297 : vector<2x256xf32>
    %299 = arith.negf %298 : vector<2x256xf32>
    %300 = math.exp %299 : vector<2x256xf32>
    %cst_56 = arith.constant 1.000000e+00 : f32
    %301 = vector.broadcast %cst_56 : f32 to vector<2x256xf32>
    %302 = arith.addf %301, %300 : vector<2x256xf32>
    %303 = arith.divf %301, %302 : vector<2x256xf32>
    %304 = math.tanh %298 : vector<2x256xf32>
    %305 = vector.extract_strided_slice %303 {offsets = [0, 64], sizes = [2, 64], strides = [1, 1]} : vector<2x256xf32> to vector<2x64xf32>
    %306 = arith.mulf %305, %292 : vector<2x64xf32>
    %307 = vector.extract_strided_slice %303 {offsets = [0, 0], sizes = [2, 64], strides = [1, 1]} : vector<2x256xf32> to vector<2x64xf32>
    %308 = vector.extract_strided_slice %304 {offsets = [0, 128], sizes = [2, 64], strides = [1, 1]} : vector<2x256xf32> to vector<2x64xf32>
    %309 = arith.mulf %307, %308 : vector<2x64xf32>
    %310 = arith.addf %306, %309 : vector<2x64xf32>
    %311 = vector.extract_strided_slice %303 {offsets = [0, 192], sizes = [2, 64], strides = [1, 1]} : vector<2x256xf32> to vector<2x64xf32>
    %312 = math.tanh %310 : vector<2x64xf32>
    %313 = arith.mulf %311, %312 : vector<2x64xf32>
    %314 = vector.extract_strided_slice %202 {offsets = [12, 0], sizes = [2, 256], strides = [1, 1]} : vector<16x256xf32> to vector<2x256xf32>
    %cst_57 = arith.constant dense<0.000000e+00> : vector<2x256xf32>
    %315 = tpu.matmul %313, %203, %cst_57 {dimension_numbers = #tpu.dot_dimension_numbers<[1], [0], [0], [1], [0, 0, 1, 1], [], []>} : vector<2x64xf32>, vector<64x256xf32>, vector<2x256xf32> -> vector<2x256xf32>
    %316 = arith.addf %314, %315 : vector<2x256xf32>
    %317 = arith.negf %316 : vector<2x256xf32>
    %318 = math.exp %317 : vector<2x256xf32>
    %cst_58 = arith.constant 1.000000e+00 : f32
    %319 = vector.broadcast %cst_58 : f32 to vector<2x256xf32>
    %320 = arith.addf %319, %318 : vector<2x256xf32>
    %321 = arith.divf %319, %320 : vector<2x256xf32>
    %322 = math.tanh %316 : vector<2x256xf32>
    %323 = vector.extract_strided_slice %321 {offsets = [0, 64], sizes = [2, 64], strides = [1, 1]} : vector<2x256xf32> to vector<2x64xf32>
    %324 = arith.mulf %323, %310 : vector<2x64xf32>
    %325 = vector.extract_strided_slice %321 {offsets = [0, 0], sizes = [2, 64], strides = [1, 1]} : vector<2x256xf32> to vector<2x64xf32>
    %326 = vector.extract_strided_slice %322 {offsets = [0, 128], sizes = [2, 64], strides = [1, 1]} : vector<2x256xf32> to vector<2x64xf32>
    %327 = arith.mulf %325, %326 : vector<2x64xf32>
    %328 = arith.addf %324, %327 : vector<2x64xf32>
    %329 = vector.extract_strided_slice %321 {offsets = [0, 192], sizes = [2, 64], strides = [1, 1]} : vector<2x256xf32> to vector<2x64xf32>
    %330 = math.tanh %328 : vector<2x64xf32>
    %331 = arith.mulf %329, %330 : vector<2x64xf32>
    %332 = vector.extract_strided_slice %202 {offsets = [14, 0], sizes = [2, 256], strides = [1, 1]} : vector<16x256xf32> to vector<2x256xf32>
    %cst_59 = arith.constant dense<0.000000e+00> : vector<2x256xf32>
    %333 = tpu.matmul %331, %203, %cst_59 {dimension_numbers = #tpu.dot_dimension_numbers<[1], [0], [0], [1], [0, 0, 1, 1], [], []>} : vector<2x64xf32>, vector<64x256xf32>, vector<2x256xf32> -> vector<2x256xf32>
    %334 = arith.addf %332, %333 : vector<2x256xf32>
    %335 = arith.negf %334 : vector<2x256xf32>
    %336 = math.exp %335 : vector<2x256xf32>
    %cst_60 = arith.constant 1.000000e+00 : f32
    %337 = vector.broadcast %cst_60 : f32 to vector<2x256xf32>
    %338 = arith.addf %337, %336 : vector<2x256xf32>
    %339 = arith.divf %337, %338 : vector<2x256xf32>
    %340 = math.tanh %334 : vector<2x256xf32>
    %341 = vector.extract_strided_slice %339 {offsets = [0, 64], sizes = [2, 64], strides = [1, 1]} : vector<2x256xf32> to vector<2x64xf32>
    %342 = arith.mulf %341, %328 : vector<2x64xf32>
    %343 = vector.extract_strided_slice %339 {offsets = [0, 0], sizes = [2, 64], strides = [1, 1]} : vector<2x256xf32> to vector<2x64xf32>
    %344 = vector.extract_strided_slice %340 {offsets = [0, 128], sizes = [2, 64], strides = [1, 1]} : vector<2x256xf32> to vector<2x64xf32>
    %345 = arith.mulf %343, %344 : vector<2x64xf32>
    %346 = arith.addf %342, %345 : vector<2x64xf32>
    %347 = vector.extract_strided_slice %339 {offsets = [0, 192], sizes = [2, 64], strides = [1, 1]} : vector<2x256xf32> to vector<2x64xf32>
    %348 = math.tanh %346 : vector<2x64xf32>
    %349 = arith.mulf %347, %348 : vector<2x64xf32>
    %350 = vector.extract_strided_slice %223 {offsets = [0, 0], sizes = [2, 32], strides = [1, 1]} : vector<2x64xf32> to vector<2x32xf32>
    %351 = vector.extract_strided_slice %241 {offsets = [0, 0], sizes = [2, 32], strides = [1, 1]} : vector<2x64xf32> to vector<2x32xf32>
    %352 = vector.extract_strided_slice %259 {offsets = [0, 0], sizes = [2, 32], strides = [1, 1]} : vector<2x64xf32> to vector<2x32xf32>
    %353 = vector.extract_strided_slice %277 {offsets = [0, 0], sizes = [2, 32], strides = [1, 1]} : vector<2x64xf32> to vector<2x32xf32>
    %354 = vector.extract_strided_slice %295 {offsets = [0, 0], sizes = [2, 32], strides = [1, 1]} : vector<2x64xf32> to vector<2x32xf32>
    %355 = vector.extract_strided_slice %313 {offsets = [0, 0], sizes = [2, 32], strides = [1, 1]} : vector<2x64xf32> to vector<2x32xf32>
    %356 = vector.extract_strided_slice %331 {offsets = [0, 0], sizes = [2, 32], strides = [1, 1]} : vector<2x64xf32> to vector<2x32xf32>
    %357 = vector.extract_strided_slice %349 {offsets = [0, 0], sizes = [2, 32], strides = [1, 1]} : vector<2x64xf32> to vector<2x32xf32>
    %358 = tpu.concatenate %350, %351, %352, %353, %354, %355, %356, %357 in 0 : vector<2x32xf32>, vector<2x32xf32>, vector<2x32xf32>, vector<2x32xf32>, vector<2x32xf32>, vector<2x32xf32>, vector<2x32xf32>, vector<2x32xf32> -> vector<16x32xf32>
    %359 = vector.extract_strided_slice %349 {offsets = [0, 32], sizes = [2, 32], strides = [1, 1]} : vector<2x64xf32> to vector<2x32xf32>
    %360 = vector.extract_strided_slice %331 {offsets = [0, 32], sizes = [2, 32], strides = [1, 1]} : vector<2x64xf32> to vector<2x32xf32>
    %361 = vector.extract_strided_slice %313 {offsets = [0, 32], sizes = [2, 32], strides = [1, 1]} : vector<2x64xf32> to vector<2x32xf32>
    %362 = vector.extract_strided_slice %295 {offsets = [0, 32], sizes = [2, 32], strides = [1, 1]} : vector<2x64xf32> to vector<2x32xf32>
    %363 = vector.extract_strided_slice %277 {offsets = [0, 32], sizes = [2, 32], strides = [1, 1]} : vector<2x64xf32> to vector<2x32xf32>
    %364 = vector.extract_strided_slice %259 {offsets = [0, 32], sizes = [2, 32], strides = [1, 1]} : vector<2x64xf32> to vector<2x32xf32>
    %365 = vector.extract_strided_slice %241 {offsets = [0, 32], sizes = [2, 32], strides = [1, 1]} : vector<2x64xf32> to vector<2x32xf32>
    %366 = vector.extract_strided_slice %223 {offsets = [0, 32], sizes = [2, 32], strides = [1, 1]} : vector<2x64xf32> to vector<2x32xf32>
    %367 = tpu.concatenate %359, %360, %361, %362, %363, %364, %365, %366 in 0 : vector<2x32xf32>, vector<2x32xf32>, vector<2x32xf32>, vector<2x32xf32>, vector<2x32xf32>, vector<2x32xf32>, vector<2x32xf32>, vector<2x32xf32> -> vector<16x32xf32>
    %c0_61 = arith.constant 0 : index
    %c0_62 = arith.constant 0 : index
    %368 = vector.load %arg4[%c0_61, %c0_62] : memref<64x5xf32, #tpu.memory_space<vmem>>, vector<64x5xf32>
    %369 = vector.extract_strided_slice %368 {offsets = [0, 0], sizes = [32, 5], strides = [1, 1]} : vector<64x5xf32> to vector<32x5xf32>
    %cst_63 = arith.constant dense<0.000000e+00> : vector<16x5xf32>
    %370 = tpu.matmul %358, %369, %cst_63 {dimension_numbers = #tpu.dot_dimension_numbers<[1], [0], [0], [1], [0, 0, 1, 1], [], []>} : vector<16x32xf32>, vector<32x5xf32>, vector<16x5xf32> -> vector<16x5xf32>
    %371 = vector.extract_strided_slice %368 {offsets = [32, 0], sizes = [32, 5], strides = [1, 1]} : vector<64x5xf32> to vector<32x5xf32>
    %cst_64 = arith.constant dense<0.000000e+00> : vector<16x5xf32>
    %372 = tpu.matmul %367, %371, %cst_64 {dimension_numbers = #tpu.dot_dimension_numbers<[1], [0], [0], [1], [0, 0, 1, 1], [], []>} : vector<16x32xf32>, vector<32x5xf32>, vector<16x5xf32> -> vector<16x5xf32>
    %373 = arith.addf %370, %372 : vector<16x5xf32>
    %c0_65 = arith.constant 0 : index
    %c0_66 = arith.constant 0 : index
    %374 = vector.load %arg11[%c0_65, %c0_66] : memref<16x5xf32, #tpu.memory_space<vmem>>, vector<16x5xf32>
    tpu.vector_store %arg11[%c0_65, %c0_66], %373 {strides = array<i32>} : memref<16x5xf32, #tpu.memory_space<vmem>>, vector<16x5xf32>,
    return
  }
}

</mosaic_0001>

<bundles_post_ra>
// kernel: label_attention_forward.1
= control target key start
LH: loop header
LB: loop body
LE: loop exit
PB: predicated region body
PF: predicated region fallthrough
CT: control target
= control target key end

     0   :  { %vm58_vm0 = vcmask 392192   ;;  %v2472_v29 = vmov 0.0   ;;  %vm127_vm9 = vcmask 523264   ;;  %s2474_s27 = smov 32   ;;  %s3467_s6 = inlined_call_operand.vmem [shape: f32[64,256], index: 6, kind: input, shape index: {}]   ;;  %s3468_s5 = inlined_call_operand.vmem [shape: f32[48,256], index: 5, kind: input, shape index: {}]   ;;  %s3469_s0 = inlined_call_operand.vmem [shape: f32[16,48], index: 0, kind: input, shape index: {}]   ;;  %s3470_s7 = inlined_call_operand.vmem [shape: f32[1,256], index: 7, kind: input, shape index: {}]   ;;  %s3471_s1 = inlined_call_operand.vmem [shape: f32[64,40], index: 1, kind: input, shape index: {}]   ;;  %s3472_s2 = inlined_call_operand.vmem [shape: f32[40,40], index: 2, kind: input, shape index: {}]   ;;  %s3473_s3 = inlined_call_operand.vmem [shape: f32[40,32], index: 3, kind: input, shape index: {}]   ;;  %s3474_s8 = inlined_call_operand.vmem [shape: f32[64,256], index: 8, kind: input, shape index: {}]   ;;  %s3475_s9 = inlined_call_operand.vmem [shape: f32[64,256], index: 9, kind: input, shape index: {}]   ;;  %s3476_s10 = inlined_call_operand.vmem [shape: f32[1,256], index: 10, kind: input, shape index: {}]   ;;  %s3477_s4 = inlined_call_operand.vmem [shape: f32[64,5], index: 4, kind: input, shape index: {}]   ;;  %s3478_s11 = inlined_call_operand.vmem [shape: f32[16,5], index: 11, kind: output, shape index: {}]  }
   0x1   :  { %v2538_v0 = vld [vmem:[%s3467_s6 + $0x70] sm:$0xff]  ;;  %v2543_v1 = vld [vmem:[%s3467_s6 + $0x60] sm:$0xff]  ;;  %v2557_v4 = vld [vmem:[%s3467_s6 + $0x78] sm:$0xff] }
   0x2   :  { %139 = vmatpush.msra.mxu2 %v2538_v0  ;;  %v50_v2 = vld [vmem:[%s3468_s5 + $0x50] sm:$0xff]  ;;  %v48_v5 = vld [vmem:[%s3468_s5 + $0x40] sm:$0xff]  ;;  %159 = vmatpush.msra.mxu3 %v2557_v4  ;;  %v2567_v6 = vld [vmem:[%s3467_s6 + $0x68] sm:$0xff] }
   0x3   :  { %v2552_v3 = vld [vmem:[%s3467_s6 + $0x50] sm:$0xff]  ;;  %75 = vmatpush.msra.mxu0 %v50_v2  ;;  %v2575_v8 = vld [vmem:[%s3467_s6 + $0x40] sm:$0xff]  ;;  %v2580_v9 = vld [vmem:[%s3467_s6 + $0x58] sm:$0xff] }
   0x4   :  { %140 = vmatpush.msra.mxu2 %v2543_v1  ;;  %v46_v7 = vld [vmem:[%s3468_s5 + $0x30] sm:$0xff]  ;;  %160 = vmatpush.msra.mxu3 %v2567_v6  ;;  %v44_v10 = vld [vmem:[%s3468_s5 + $0x20] sm:$0xff]  ;;  %v51_v11 = vld [vmem:[%s3468_s5 + $0x58] sm:$0xff] }
   0x5   :  { %76 = vmatpush.msra.mxu0 %v48_v5  ;;  %v2593_v12 = vld [vmem:[%s3467_s6 + $0x30] sm:$0xff]  ;;  %v2598_v13 = vld [vmem:[%s3467_s6 + $0x48] sm:$0xff]  ;;  %98 = vmatpush.msra.mxu1 %v51_v11  ;;  %v47_v16 = vld [vmem:[%s3468_s5 + $0x38] sm:$0xff] }
   0x6   :  { %141 = vmatpush.msra.mxu2 %v2552_v3  ;;  %v49_v14 = vld [vmem:[%s3468_s5 + $0x48] sm:$0xff]  ;;  %161 = vmatpush.msra.mxu3 %v2580_v9  ;;  %v42_v15 = vld [vmem:[%s3468_s5 + $0x10] sm:$0xff]  ;;  %v2614_v17 = vld [vmem:[%s3467_s6 + $0x20] sm:$0xff] }
   0x7   :  { %77 = vmatpush.msra.mxu0 %v46_v7  ;;  %v2619_v18 = vld [vmem:[%s3467_s6 + $0x38] sm:$0xff]  ;;  %99 = vmatpush.msra.mxu1 %v49_v14  ;;  %v40_v19 = vld [vmem:[%s3468_s5] sm:$0xff]  ;;  %v45_v20 = vld [vmem:[%s3468_s5 + $0x28] sm:$0xff] }
   0x8   :  { %142 = vmatpush.msra.mxu2 %v2575_v8  ;;  %162 = vmatpush.msra.mxu3 %v2598_v13  ;;  %v2632_v21 = vld [vmem:[%s3467_s6 + $0x10] sm:$0xff]  ;;  %v2637_v22 = vld [vmem:[%s3467_s6 + $0x28] sm:$0xff]  ;;  %v38_v23 = vld [vmem:[%s3469_s0] sm:$0xff] }
   0x9   :  { %78 = vmatpush.msra.mxu0 %v44_v10  ;;  %100 = vmatpush.msra.mxu1 %v47_v16  ;;  %v43_v24 = vld [vmem:[%s3468_s5 + $0x18] sm:$0xff]  ;;  %v2650_v25 = vld [vmem:[%s3467_s6] sm:$0xff]  ;;  %v41_v27 = vld [vmem:[%s3468_s5 + $0x8] sm:$0xff] }
   0xa   :  { %143 = vmatpush.msra.mxu2 %v2593_v12  ;;  %163 = vmatpush.msra.mxu3 %v2619_v18  ;;  %v2655_v26 = vld [vmem:[%s3467_s6 + $0x18] sm:$0xff]  ;;  %v2666_v28 = vld [vmem:[%s3467_s6 + $0x8] sm:$0xff]  ;;  %v2741_v30 = vld [vmem:[%s3470_s7] sm:$0x3]  ;;  %s2473_s7 = smov 64  }
   0xb   :  { %79 = vmatpush.msra.mxu0 %v42_v15  ;;  %101 = vmatpush.msra.mxu1 %v45_v20  ;;  %v54_v31 = vperm.slane %v2741_v30, 0  ;;  %v55_v39 = vperm.slane %v2741_v30, 1  ;;  %v39_v59 = vld [vmem:[%s3469_s0 + $0x8] sm:$0xff] }
   0xc   :  { %144 = vmatpush.msra.mxu2 %v2614_v17  ;;  %164 = vmatpush.msra.mxu3 %v2637_v22 }
   0xd   :  { %80 = vmatpush.msra.mxu0 %v40_v19  ;;  %102 = vmatpush.msra.mxu1 %v43_v24 }
   0xe   :  { %145 = vmatpush.msra.mxu2 %v2632_v21  ;;  %2181 = vmatmul.msk.f32.vlgmr.msra.gmra.mxu0 %vm58_vm0, %v38_v23 }
   0xf   :  { %165 = vmatpush.msra.mxu3 %v2655_v26  ;;  %103 = vmatpush.msra.mxu1 %v41_v27 }
  0x10   :  { %146 = vmatpush.msra.mxu2 %v2650_v25  ;;  %2183 = vmatmul.msk.f32.vlgmr.msra.gmra.mxu1 %vm58_vm0, %v38_v23 }
  0x11   :  { %147 = vmatmul.f32.vlgmr.msra.gmra.mxu2 %v2472_v29  ;;  %166 = vmatpush.msra.mxu3 %v2666_v28 }
  0x12   :  { %167 = vmatmul.f32.vlgmr.msra.gmra.mxu3 %v2472_v29  ;;  %234 = vmatpush.msrb.mxu0 %v2538_v0 }
  0x13   :  { %254 = vmatpush.msrb.mxu1 %v2557_v4  ;;  %339 = vmatpush.msrb.mxu2 %v2538_v0 }
  0x14   :  { %235 = vmatpush.msrb.mxu0 %v2543_v1  ;;  %359 = vmatpush.msrb.mxu3 %v2557_v4 }
  0x15   :  { %255 = vmatpush.msrb.mxu1 %v2567_v6  ;;  %340 = vmatpush.msrb.mxu2 %v2543_v1 }
  0x16   :  { %236 = vmatpush.msrb.mxu0 %v2552_v3  ;;  %360 = vmatpush.msrb.mxu3 %v2567_v6 }
  0x17   :  { %256 = vmatpush.msrb.mxu1 %v2580_v9  ;;  %341 = vmatpush.msrb.mxu2 %v2552_v3 }
  0x18   :  { %237 = vmatpush.msrb.mxu0 %v2575_v8  ;;  %361 = vmatpush.msrb.mxu3 %v2580_v9 }
  0x19   :  { %257 = vmatpush.msrb.mxu1 %v2598_v13  ;;  %342 = vmatpush.msrb.mxu2 %v2575_v8 }
  0x1a   :  { %238 = vmatpush.msrb.mxu0 %v2593_v12  ;;  %362 = vmatpush.msrb.mxu3 %v2598_v13 }
  0x1b   :  { %258 = vmatpush.msrb.mxu1 %v2619_v18  ;;  %343 = vmatpush.msrb.mxu2 %v2593_v12 }
  0x1c   :  { %239 = vmatpush.msrb.mxu0 %v2614_v17  ;;  %363 = vmatpush.msrb.mxu3 %v2619_v18 }
  0x1d   :  { %259 = vmatpush.msrb.mxu1 %v2637_v22  ;;  %344 = vmatpush.msrb.mxu2 %v2614_v17 }
  0x1e   :  { %240 = vmatpush.msrb.mxu0 %v2632_v21  ;;  %364 = vmatpush.msrb.mxu3 %v2637_v22 }
  0x1f   :  { %260 = vmatpush.msrb.mxu1 %v2655_v26  ;;  %345 = vmatpush.msrb.mxu2 %v2632_v21 }
  0x20   :  { %241 = vmatpush.msrb.mxu0 %v2650_v25  ;;  %365 = vmatpush.msrb.mxu3 %v2655_v26 }
  0x21   :  { %261 = vmatpush.msrb.mxu1 %v2666_v28  ;;  %346 = vmatpush.msrb.mxu2 %v2650_v25 }
  0x22   :  { %366 = vmatpush.msrb.mxu3 %v2666_v28  ;;  %444 = vmatpush.msra.mxu0 %v2538_v0 }
  0x23   :  { %464 = vmatpush.msra.mxu1 %v2557_v4  ;;  %549 = vmatpush.msra.mxu2 %v2538_v0 }
  0x24   :  { %445 = vmatpush.msra.mxu0 %v2543_v1  ;;  %569 = vmatpush.msra.mxu3 %v2557_v4 }
  0x25   :  { %465 = vmatpush.msra.mxu1 %v2567_v6  ;;  %550 = vmatpush.msra.mxu2 %v2543_v1 }
  0x26   :  { %446 = vmatpush.msra.mxu0 %v2552_v3  ;;  %570 = vmatpush.msra.mxu3 %v2567_v6 }
  0x27   :  { %466 = vmatpush.msra.mxu1 %v2580_v9  ;;  %551 = vmatpush.msra.mxu2 %v2552_v3 }
  0x28   :  { %447 = vmatpush.msra.mxu0 %v2575_v8  ;;  %571 = vmatpush.msra.mxu3 %v2580_v9 }
  0x29   :  { %467 = vmatpush.msra.mxu1 %v2598_v13  ;;  %552 = vmatpush.msra.mxu2 %v2575_v8 }
  0x2a   :  { %448 = vmatpush.msra.mxu0 %v2593_v12  ;;  %572 = vmatpush.msra.mxu3 %v2598_v13 }
  0x2b   :  { %468 = vmatpush.msra.mxu1 %v2619_v18  ;;  %553 = vmatpush.msra.mxu2 %v2593_v12 }
  0x2c   :  { %449 = vmatpush.msra.mxu0 %v2614_v17  ;;  %573 = vmatpush.msra.mxu3 %v2619_v18 }
  0x2d   :  { %469 = vmatpush.msra.mxu1 %v2637_v22  ;;  %554 = vmatpush.msra.mxu2 %v2614_v17 }
  0x2e   :  { %450 = vmatpush.msra.mxu0 %v2632_v21  ;;  %574 = vmatpush.msra.mxu3 %v2637_v22 }
  0x2f   :  { %470 = vmatpush.msra.mxu1 %v2655_v26  ;;  %555 = vmatpush.msra.mxu2 %v2632_v21 }
  0x30   :  { %451 = vmatpush.msra.mxu0 %v2650_v25  ;;  %575 = vmatpush.msra.mxu3 %v2655_v26 }
  0x31   :  { %471 = vmatpush.msra.mxu1 %v2666_v28  ;;  %556 = vmatpush.msra.mxu2 %v2650_v25 }
  0x32   :  { %576 = vmatpush.msra.mxu3 %v2666_v28  ;;  %2182 = vmatmul.msk.f32.gmra.mxu0 %vm58_vm0, %v39_v59 }
  0x33   :  { %2184 = vmatmul.msk.f32.gmra.mxu1 %vm58_vm0, %v39_v59 }
  0x8b   :  { %v82_v32 = vpop.f32.mrf.mxu0 }
  0x8c   :  { %v2746_v33 = vadd.f32 %v82_v32, %v54_v31 }
  0x8d   :  { %v105_v40 = vpop.f32.mrf.mxu1 }
  0x8e   :  { %v2752_v41 = vadd.f32 %v105_v40, %v55_v39 }
  0x94   :  { %v148_v34 = vpop.f32.mrf.mxu2 }
  0x95   :  { %v171_v35 = vadd.f32 %v148_v34, %v2746_v33  ;;  %v168_v42 = vpop.f32.mrf.mxu3 }
  0x96   :  { %v172_v44 = vadd.f32 %v168_v42, %v2752_v41 }
  0x97   :  { %v2185_v36 = vmul.f32 -1.442695, %v171_v35 }
  0x98   :  { %v2186_v56 = vmul.f32 -1.442695, %v172_v44 }
  0x99   :  { %2272 = vpow2.f32 %v2185_v36 }
  0x9f   :  { %v2273_v37 = vpop.eup %2272 }
  0xa0   :  { %v179_v38 = vadd.f32 1.0, %v2273_v37 }
  0xa2   :  { %2274 = vrcp.f32 %v179_v38  ;;  %v192_v47 = vand.u32 2147483648, %v179_v38  ;;  %v190_v49 = vand.u32 2147483647, %v179_v38  ;;  %vm186_vm2 = vweird.f32 %v179_v38 }
  0xa3   :  { %2276 = vtanh.f32 %v172_v44 }
  0xa4   :  { %v193_v52 = vor.u32 1.1754944e-38, %v192_v47  ;;  %vm191_vm4 = vcmp.eq.f32.partialorder %v190_v49, 8.507059e+37  ;;  %2278 = vpow2.f32 %v2186_v56 }
  0xa8   :  { %v2275_v43 = vpop.eup %2274 }
  0xa9   :  { %v182_v45 = vmul.f32 %v2275_v43, %v179_v38  ;;  %vm187_vm1 = vweird.f32 %v2275_v43  ;;  %v2277_v51 = vpop.eup %2276 }
  0xaa   :  { %vm188_vm3 = vmor %vm186_vm2, %vm187_vm1  ;;  %v2279_v57 = vpop.eup %2278 }
  0xab   :  { %v183_v46 = vsub.f32 1.0, %v182_v45  ;;  %v180_v58 = vadd.f32 1.0, %v2279_v57 }
  0xad   :  { %v184_v48 = vmul.f32 %v2275_v43, %v183_v46  ;;  %2280 = vrcp.f32 %v180_v58  ;;  %vm201_vm5 = vweird.f32 %v180_v58  ;;  %v207_v10 = vand.u32 2147483648, %v180_v58 }
  0xae   :  { %v205_v14 = vand.u32 2147483647, %v180_v58 }
  0xaf   :  { %v185_v50 = vadd.f32 %v2275_v43, %v184_v48  ;;  %v208_v15 = vor.u32 1.1754944e-38, %v207_v10  ;;  %v2786_v27 = vpop.f32.mrf.mxu0 }
  0xb0   :  { %vm206_vm8 = vcmp.eq.f32.partialorder %v205_v14, 8.507059e+37  ;;  %v2789_v36 = vpop.f32.mrf.mxu1 }
  0xb1   :  { %v189_v53 = vsel %vm188_vm3, %v2275_v43, %v185_v50 }
  0xb2   :  { %v194_v54 = vsel %vm191_vm4, %v193_v52, %v189_v53 }
  0xb3   :  { %v213_v55 = vmul.f32 %v2277_v51, %v194_v54  ;;  %v2281_v60 = vpop.eup %2280  ;;  %v212_v2 = vmul.f32 0.0, %v194_v54 }
  0xb4   :  { %v197_v61 = vmul.f32 %v2281_v60, %v180_v58  ;;  %vm202_vm6 = vweird.f32 %v2281_v60 }
  0xb5   :  { %215 = vrot.lane.b32.xlu0 %v213_v55, %s2473_s7  ;;  %vm203_vm7 = vmor %vm201_vm5, %vm202_vm6 }
  0xb6   :  { %v198_v62 = vsub.f32 1.0, %v197_v61 }
  0xb8   :  { %v199_v63 = vmul.f32 %v2281_v60, %v198_v62 }
  0xba   :  { %v200_v11 = vadd.f32 %v2281_v60, %v199_v63 }
  0xbc   :  { %v204_v16 = vsel %vm203_vm7, %v2281_v60, %v200_v11 }
  0xbd   :  { %v209_v20 = vsel %vm206_vm8, %v208_v15, %v204_v16 }
 0x127   :  { %v216_v5 = vpop.permute.xlu0 %215 }
 0x128   :  { %v2761_v7 = vadd.f32 %v216_v5, %v212_v2 }
 0x12a   :  { %2282 = vtanh.f32 %v2761_v7  ;;  %v314_v53 = vrot.slane %v2761_v7, 6 }
 0x130   :  { %v2283_v19 = vpop.eup %2282 }
 0x131   :  { %v2764_v23 = vmul.f32 %v2283_v19, %v209_v20 }
 0x133   :  { %222 = vrot.lane.b32.xlu0 %v2764_v23, %s2473_s7 }
 0x1a5   :  { %v223_v24 = vpop.permute.xlu0 %222 }
 0x1a6   :  { %2187 = vmatmul.msk.f32.vlgmr.msrb.gmra.mxu0 %vm127_vm9, %v223_v24  ;;  %2188 = vmatmul.msk.f32.vlgmr.msrb.gmra.mxu1 %vm127_vm9, %v223_v24 }
 0x1a7   :  { %647 = vmatpush.msrb.mxu0 %v2538_v0  ;;  %667 = vmatpush.msrb.mxu1 %v2557_v4 }
 0x1a9   :  { %648 = vmatpush.msrb.mxu0 %v2543_v1  ;;  %668 = vmatpush.msrb.mxu1 %v2567_v6 }
 0x1ab   :  { %649 = vmatpush.msrb.mxu0 %v2552_v3  ;;  %669 = vmatpush.msrb.mxu1 %v2580_v9 }
 0x1ad   :  { %650 = vmatpush.msrb.mxu0 %v2575_v8  ;;  %670 = vmatpush.msrb.mxu1 %v2598_v13 }
 0x1af   :  { %651 = vmatpush.msrb.mxu0 %v2593_v12  ;;  %671 = vmatpush.msrb.mxu1 %v2619_v18 }
 0x1b1   :  { %652 = vmatpush.msrb.mxu0 %v2614_v17  ;;  %672 = vmatpush.msrb.mxu1 %v2637_v22 }
 0x1b3   :  { %653 = vmatpush.msrb.mxu0 %v2632_v21  ;;  %673 = vmatpush.msrb.mxu1 %v2655_v26 }
 0x1b5   :  { %654 = vmatpush.msrb.mxu0 %v2650_v25  ;;  %674 = vmatpush.msrb.mxu1 %v2666_v28 }
 0x223   :  { %v243_v32 = vpop.f32.mrf.mxu0  ;;  %v263_v42 = vpop.f32.mrf.mxu1 }
 0x224   :  { %v268_v34 = vrot.slane %v243_v32, 6  ;;  %v269_v43 = vrot.slane %v263_v42, 6 }
 0x226   :  { %v272_v35 = vadd.f32 %v268_v34, %v2746_v33  ;;  %v273_v45 = vadd.f32 %v269_v43, %v2752_v41 }
 0x228   :  { %v2189_v37 = vmul.f32 -1.442695, %v272_v35  ;;  %v2190_v59 = vmul.f32 -1.442695, %v273_v45 }
 0x22a   :  { %2284 = vpow2.f32 %v2189_v37 }
 0x230   :  { %v2285_v38 = vpop.eup %2284 }
 0x231   :  { %v280_v40 = vadd.f32 1.0, %v2285_v38 }
 0x233   :  { %2286 = vrcp.f32 %v280_v40  ;;  %v293_v48 = vand.u32 2147483648, %v280_v40  ;;  %v291_v50 = vand.u32 2147483647, %v280_v40  ;;  %vm287_vm11 = vweird.f32 %v280_v40 }
 0x234   :  { %2288 = vtanh.f32 %v273_v45 }
 0x235   :  { %v294_v52 = vor.u32 1.1754944e-38, %v293_v48  ;;  %vm292_vm13 = vcmp.eq.f32.partialorder %v291_v50, 8.507059e+37  ;;  %2290 = vpow2.f32 %v2190_v59 }
 0x239   :  { %v2287_v44 = vpop.eup %2286 }
 0x23a   :  { %v283_v46 = vmul.f32 %v2287_v44, %v280_v40  ;;  %vm288_vm10 = vweird.f32 %v2287_v44  ;;  %v2289_v55 = vpop.eup %2288 }
 0x23b   :  { %vm289_vm12 = vmor %vm287_vm11, %vm288_vm10  ;;  %v2291_v60 = vpop.eup %2290  ;;  %vm948_vm11 = vcmask 1041408  }
 0x23c   :  { %v284_v47 = vsub.f32 1.0, %v283_v46  ;;  %v281_v61 = vadd.f32 1.0, %v2291_v60 }
 0x23e   :  { %v285_v49 = vmul.f32 %v2287_v44, %v284_v47  ;;  %2292 = vrcp.f32 %v281_v61  ;;  %v308_v14 = vand.u32 2147483648, %v281_v61  ;;  %vm302_vm15 = vweird.f32 %v281_v61 }
 0x23f   :  { %v306_v15 = vand.u32 2147483647, %v281_v61 }
 0x240   :  { %v286_v51 = vadd.f32 %v2287_v44, %v285_v49  ;;  %v309_v19 = vor.u32 1.1754944e-38, %v308_v14 }
 0x241   :  { %vm307_vm1 = vcmp.eq.f32.partialorder %v306_v15, 8.507059e+37 }
 0x242   :  { %v290_v54 = vsel %vm289_vm12, %v2287_v44, %v286_v51  ;;  %vm950_vm12 = vcmask 1043456  }
 0x243   :  { %v295_v56 = vsel %vm292_vm13, %v294_v52, %v290_v54 }
 0x244   :  { %v317_v57 = vmul.f32 %v2289_v55, %v295_v56  ;;  %v316_v58 = vmul.f32 %v314_v53, %v295_v56  ;;  %v2293_v62 = vpop.eup %2292 }
 0x245   :  { %v298_v63 = vmul.f32 %v2293_v62, %v281_v61  ;;  %vm303_vm14 = vweird.f32 %v2293_v62 }
 0x246   :  { %319 = vrot.lane.b32.xlu1 %v317_v57, %s2473_s7  ;;  %vm304_vm0 = vmor %vm302_vm15, %vm303_vm14 }
 0x247   :  { %v299_v2 = vsub.f32 1.0, %v298_v63 }
 0x249   :  { %v300_v5 = vmul.f32 %v2293_v62, %v299_v2 }
 0x24b   :  { %v301_v7 = vadd.f32 %v2293_v62, %v300_v5 }
 0x24d   :  { %v305_v16 = vsel %vm304_vm0, %v2293_v62, %v301_v7 }
 0x24e   :  { %v310_v24 = vsel %vm307_vm1, %v309_v19, %v305_v16 }
 0x2b8   :  { %v320_v10 = vpop.permute.xlu1 %319 }
 0x2b9   :  { %v2794_v11 = vadd.f32 %v320_v10, %v316_v58 }
 0x2bb   :  { %2294 = vtanh.f32 %v2794_v11  ;;  %v419_v56 = vrot.slane %v2794_v11, 6 }
 0x2c1   :  { %v2295_v20 = vpop.eup %2294 }
 0x2c2   :  { %v2797_v32 = vmul.f32 %v2295_v20, %v310_v24 }
 0x2c4   :  { %v326_v34 = vrot.slane %v2797_v32, 2 }
 0x2c6   :  { %327 = vrot.lane.b32.xlu1 %v326_v34, %s2473_s7 }
 0x338   :  { %v328_v35 = vpop.permute.xlu1 %327 }
 0x339   :  { %2191 = vmatmul.msk.f32.vlgmr.msrb.gmra.mxu2 %vm127_vm9, %v328_v35  ;;  %2192 = vmatmul.msk.f32.vlgmr.msrb.gmra.mxu3 %vm127_vm9, %v328_v35 }
 0x33a   :  { %752 = vmatpush.msrb.mxu2 %v2538_v0  ;;  %772 = vmatpush.msrb.mxu3 %v2557_v4 }
 0x33c   :  { %753 = vmatpush.msrb.mxu2 %v2543_v1  ;;  %773 = vmatpush.msrb.mxu3 %v2567_v6 }
 0x33e   :  { %754 = vmatpush.msrb.mxu2 %v2552_v3  ;;  %774 = vmatpush.msrb.mxu3 %v2580_v9 }
 0x340   :  { %755 = vmatpush.msrb.mxu2 %v2575_v8  ;;  %775 = vmatpush.msrb.mxu3 %v2598_v13 }
 0x342   :  { %756 = vmatpush.msrb.mxu2 %v2593_v12  ;;  %776 = vmatpush.msrb.mxu3 %v2619_v18 }
 0x344   :  { %757 = vmatpush.msrb.mxu2 %v2614_v17  ;;  %777 = vmatpush.msrb.mxu3 %v2637_v22 }
 0x346   :  { %758 = vmatpush.msrb.mxu2 %v2632_v21  ;;  %778 = vmatpush.msrb.mxu3 %v2655_v26 }
 0x348   :  { %759 = vmatpush.msrb.mxu2 %v2650_v25  ;;  %779 = vmatpush.msrb.mxu3 %v2666_v28 }
 0x3bc   :  { %v348_v37 = vpop.f32.mrf.mxu2  ;;  %v368_v45 = vpop.f32.mrf.mxu3 }
 0x3bd   :  { %v373_v38 = vrot.slane %v348_v37, 4  ;;  %v374_v46 = vrot.slane %v368_v45, 4 }
 0x3bf   :  { %v377_v40 = vadd.f32 %v373_v38, %v2746_v33  ;;  %v378_v48 = vadd.f32 %v374_v46, %v2752_v41 }
 0x3c1   :  { %v2193_v42 = vmul.f32 -1.442695, %v377_v40  ;;  %v2194_v62 = vmul.f32 -1.442695, %v378_v48  ;;  %v949_v40 = vsel %vm948_vm11, %v2764_v23, %v2797_v32 }
 0x3c3   :  { %2296 = vpow2.f32 %v2193_v42 }
 0x3c9   :  { %v2297_v43 = vpop.eup %2296 }
 0x3ca   :  { %v385_v44 = vadd.f32 1.0, %v2297_v43 }
 0x3cc   :  { %2298 = vrcp.f32 %v385_v44  ;;  %v398_v51 = vand.u32 2147483648, %v385_v44  ;;  %v396_v53 = vand.u32 2147483647, %v385_v44  ;;  %vm392_vm3 = vweird.f32 %v385_v44 }
 0x3cd   :  { %2300 = vtanh.f32 %v378_v48 }
 0x3ce   :  { %v399_v55 = vor.u32 1.1754944e-38, %v398_v51  ;;  %vm397_vm5 = vcmp.eq.f32.partialorder %v396_v53, 8.507059e+37  ;;  %2302 = vpow2.f32 %v2194_v62 }
 0x3d2   :  { %v2299_v47 = vpop.eup %2298 }
 0x3d3   :  { %v388_v49 = vmul.f32 %v2299_v47, %v385_v44  ;;  %vm393_vm2 = vweird.f32 %v2299_v47  ;;  %v2301_v58 = vpop.eup %2300 }
 0x3d4   :  { %vm394_vm4 = vmor %vm392_vm3, %vm393_vm2  ;;  %v2303_v63 = vpop.eup %2302 }
 0x3d5   :  { %v389_v50 = vsub.f32 1.0, %v388_v49  ;;  %v386_v2 = vadd.f32 1.0, %v2303_v63 }
 0x3d7   :  { %v390_v52 = vmul.f32 %v2299_v47, %v389_v50  ;;  %2304 = vrcp.f32 %v386_v2  ;;  %v413_v19 = vand.u32 2147483648, %v386_v2  ;;  %vm407_vm7 = vweird.f32 %v386_v2 }
 0x3d8   :  { %v411_v20 = vand.u32 2147483647, %v386_v2 }
 0x3d9   :  { %v391_v54 = vadd.f32 %v2299_v47, %v390_v52  ;;  %v414_v34 = vor.u32 1.1754944e-38, %v413_v19 }
 0x3da   :  { %vm412_vm10 = vcmp.eq.f32.partialorder %v411_v20, 8.507059e+37 }
 0x3db   :  { %v395_v57 = vsel %vm394_vm4, %v2299_v47, %v391_v54 }
 0x3dc   :  { %v400_v59 = vsel %vm397_vm5, %v399_v55, %v395_v57  ;;  %vm952_vm5 = vcmask 1045504  }
 0x3dd   :  { %v422_v60 = vmul.f32 %v2301_v58, %v400_v59  ;;  %v421_v61 = vmul.f32 %v419_v56, %v400_v59  ;;  %v2305_v5 = vpop.eup %2304 }
 0x3de   :  { %v403_v10 = vmul.f32 %v2305_v5, %v386_v2  ;;  %vm408_vm6 = vweird.f32 %v2305_v5 }
 0x3df   :  { %424 = vrot.lane.b32.xlu2 %v422_v60, %s2473_s7  ;;  %vm409_vm8 = vmor %vm407_vm7, %vm408_vm6 }
 0x3e0   :  { %v404_v7 = vsub.f32 1.0, %v403_v10 }
 0x3e2   :  { %v405_v14 = vmul.f32 %v2305_v5, %v404_v7 }
 0x3e4   :  { %v406_v11 = vadd.f32 %v2305_v5, %v405_v14 }
 0x3e6   :  { %v410_v24 = vsel %vm409_vm8, %v2305_v5, %v406_v11 }
 0x3e7   :  { %v415_v37 = vsel %vm412_vm10, %v414_v34, %v410_v24  ;;  %v2875_v24 = vadd.f32 %v2786_v27, %v54_v31 }
 0x439   :  { %v425_v15 = vpop.permute.xlu2 %424 }
 0x43a   :  { %v2823_v16 = vadd.f32 %v425_v15, %v421_v61 }
 0x43c   :  { %2306 = vtanh.f32 %v2823_v16  ;;  %v524_v45 = vrot.slane %v2823_v16, 6  ;;  %v969_v16 = vrot.slane %v2797_v32, 6 }
 0x442   :  { %v2307_v35 = vpop.eup %2306 }
 0x443   :  { %v2826_v38 = vmul.f32 %v2307_v35, %v415_v37 }
 0x445   :  { %v431_v42 = vrot.slane %v2826_v38, 4  ;;  %v2834_v43 = vsel %vm950_vm12, %v949_v40, %v2826_v38  ;;  %v967_v15 = vrot.slane %v2826_v38, 2 }
 0x447   :  { %432 = vrot.lane.b32.xlu2 %v431_v42, %s2473_s7  ;;  %v2881_v42 = vadd.f32 %v2789_v36, %v55_v39 }
 0x4a1   :  { %v433_v44 = vpop.permute.xlu2 %432 }
 0x4a2   :  { %2195 = vmatmul.msk.f32.vlgmr.msra.gmra.mxu0 %vm127_vm9, %v433_v44  ;;  %2196 = vmatmul.msk.f32.vlgmr.msra.gmra.mxu1 %vm127_vm9, %v433_v44 }
 0x4a3   :  { %857 = vmatpush.msra.mxu0 %v2538_v0  ;;  %877 = vmatpush.msra.mxu1 %v2557_v4 }
 0x4a5   :  { %858 = vmatpush.msra.mxu0 %v2543_v1  ;;  %878 = vmatpush.msra.mxu1 %v2567_v6 }
 0x4a7   :  { %859 = vmatpush.msra.mxu0 %v2552_v3  ;;  %879 = vmatpush.msra.mxu1 %v2580_v9 }
 0x4a9   :  { %860 = vmatpush.msra.mxu0 %v2575_v8  ;;  %880 = vmatpush.msra.mxu1 %v2598_v13 }
 0x4ab   :  { %861 = vmatpush.msra.mxu0 %v2593_v12  ;;  %881 = vmatpush.msra.mxu1 %v2619_v18 }
 0x4ad   :  { %862 = vmatpush.msra.mxu0 %v2614_v17  ;;  %882 = vmatpush.msra.mxu1 %v2637_v22 }
 0x4af   :  { %863 = vmatpush.msra.mxu0 %v2632_v21  ;;  %883 = vmatpush.msra.mxu1 %v2655_v26 }
 0x4b1   :  { %864 = vmatpush.msra.mxu0 %v2650_v25  ;;  %884 = vmatpush.msra.mxu1 %v2666_v28 }
 0x51f   :  { %v453_v0 = vpop.f32.mrf.mxu0  ;;  %v473_v9 = vpop.f32.mrf.mxu1 }
 0x520   :  { %v478_v1 = vrot.slane %v453_v0, 2  ;;  %v479_v12 = vrot.slane %v473_v9, 2 }
 0x522   :  { %v482_v3 = vadd.f32 %v478_v1, %v2746_v33  ;;  %v483_v17 = vadd.f32 %v479_v12, %v2752_v41 }
 0x524   :  { %v2197_v4 = vmul.f32 -1.442695, %v482_v3  ;;  %v2198_v41 = vmul.f32 -1.442695, %v483_v17 }
 0x526   :  { %2308 = vpow2.f32 %v2197_v4 }
 0x52c   :  { %v2309_v6 = vpop.eup %2308 }
 0x52d   :  { %v490_v8 = vadd.f32 1.0, %v2309_v6 }
 0x52f   :  { %2310 = vrcp.f32 %v490_v8  ;;  %v503_v22 = vand.u32 2147483648, %v490_v8  ;;  %v501_v26 = vand.u32 2147483647, %v490_v8  ;;  %vm497_vm14 = vweird.f32 %v490_v8 }
 0x530   :  { %2312 = vtanh.f32 %v483_v17 }
 0x531   :  { %v504_v33 = vor.u32 1.1754944e-38, %v503_v22  ;;  %vm502_vm0 = vcmp.eq.f32.partialorder %v501_v26, 8.507059e+37  ;;  %2314 = vpow2.f32 %v2198_v41 }
 0x535   :  { %v2311_v13 = vpop.eup %2310 }
 0x536   :  { %v493_v18 = vmul.f32 %v2311_v13, %v490_v8  ;;  %vm498_vm13 = vweird.f32 %v2311_v13  ;;  %v2313_v47 = vpop.eup %2312 }
 0x537   :  { %vm499_vm15 = vmor %vm497_vm14, %vm498_vm13  ;;  %v2315_v51 = vpop.eup %2314 }
 0x538   :  { %v494_v21 = vsub.f32 1.0, %v493_v18  ;;  %v491_v52 = vadd.f32 1.0, %v2315_v51 }
 0x53a   :  { %v495_v25 = vmul.f32 %v2311_v13, %v494_v21  ;;  %2316 = vrcp.f32 %v491_v52  ;;  %v518_v60 = vand.u32 2147483648, %v491_v52  ;;  %vm512_vm2 = vweird.f32 %v491_v52 }
 0x53b   :  { %v516_v61 = vand.u32 2147483647, %v491_v52 }
 0x53c   :  { %v496_v28 = vadd.f32 %v2311_v13, %v495_v25  ;;  %v519_v63 = vor.u32 1.1754944e-38, %v518_v60 }
 0x53d   :  { %vm517_vm4 = vcmp.eq.f32.partialorder %v516_v61, 8.507059e+37 }
 0x53e   :  { %v500_v46 = vsel %vm499_vm15, %v2311_v13, %v496_v28 }
 0x53f   :  { %v505_v48 = vsel %vm502_vm0, %v504_v33, %v500_v46 }
 0x540   :  { %v527_v49 = vmul.f32 %v2313_v47, %v505_v48  ;;  %v526_v50 = vmul.f32 %v524_v45, %v505_v48  ;;  %v2317_v53 = vpop.eup %2316 }
 0x541   :  { %v508_v54 = vmul.f32 %v2317_v53, %v491_v52  ;;  %vm513_vm1 = vweird.f32 %v2317_v53 }
 0x542   :  { %529 = vrot.lane.b32.xlu0 %v527_v49, %s2473_s7  ;;  %vm514_vm3 = vmor %vm512_vm2, %vm513_vm1 }
 0x543   :  { %v509_v55 = vsub.f32 1.0, %v508_v54 }
 0x545   :  { %v510_v56 = vmul.f32 %v2317_v53, %v509_v55 }
 0x547   :  { %v511_v59 = vadd.f32 %v2317_v53, %v510_v56 }
 0x549   :  { %v515_v62 = vsel %vm514_vm3, %v2317_v53, %v511_v59 }
 0x54a   :  { %v520_v5 = vsel %vm517_vm4, %v519_v63, %v515_v62 }
 0x5b4   :  { %v530_v57 = vpop.permute.xlu0 %529 }
 0x5b5   :  { %v532_v58 = vadd.f32 %v530_v57, %v526_v50 }
 0x5b7   :  { %2318 = vtanh.f32 %v532_v58  ;;  %v623_v8 = vrot.slane %v532_v58, 6 }
 0x5bd   :  { %v2319_v2 = vpop.eup %2318 }
 0x5be   :  { %v534_v10 = vmul.f32 %v2319_v2, %v520_v5 }
 0x5c0   :  { %v536_v7 = vrot.slane %v534_v10, 6  ;;  %v2861_v14 = vsel %vm952_vm5, %v2834_v43, %v534_v10 }
 0x5c2   :  { %537 = vrot.lane.b32.xlu1 %v536_v7, %s2473_s7  ;;  %v976_v11 = vsel %vm948_vm11, %v536_v7, %v967_v15 }
 0x5c3   :  { %v2868_v19 = vsel %vm950_vm12, %v976_v11, %v969_v16 }
 0x634   :  { %v538_v20 = vpop.permute.xlu1 %537 }
 0x635   :  { %2199 = vmatmul.msk.f32.vlgmr.msra.gmra.mxu2 %vm127_vm9, %v538_v20  ;;  %2200 = vmatmul.msk.f32.vlgmr.msra.gmra.mxu3 %vm127_vm9, %v538_v20 }
 0x6b8   :  { %v558_v34 = vpop.f32.mrf.mxu2  ;;  %v578_v40 = vpop.f32.mrf.mxu3 }
 0x6b9   :  { %v581_v32 = vadd.f32 %v558_v34, %v2875_v24  ;;  %v582_v44 = vadd.f32 %v578_v40, %v2881_v42 }
 0x6bb   :  { %v2201_v35 = vmul.f32 -1.442695, %v581_v32  ;;  %v2202_v13 = vmul.f32 -1.442695, %v582_v44 }
 0x6bd   :  { %2320 = vpow2.f32 %v2201_v35 }
 0x6c3   :  { %v2321_v37 = vpop.eup %2320 }
 0x6c4   :  { %v589_v38 = vadd.f32 1.0, %v2321_v37 }
 0x6c6   :  { %2322 = vrcp.f32 %v589_v38  ;;  %v602_v27 = vand.u32 2147483648, %v589_v38  ;;  %v600_v3 = vand.u32 2147483647, %v589_v38  ;;  %vm596_vm7 = vweird.f32 %v589_v38 }
 0x6c7   :  { %2324 = vtanh.f32 %v582_v44 }
 0x6c8   :  { %v603_v6 = vor.u32 1.1754944e-38, %v602_v27  ;;  %vm601_vm10 = vcmp.eq.f32.partialorder %v600_v3, 8.507059e+37  ;;  %2326 = vpow2.f32 %v2202_v13 }
 0x6cc   :  { %v2323_v43 = vpop.eup %2322 }
 0x6cd   :  { %v592_v0 = vmul.f32 %v2323_v43, %v589_v38  ;;  %vm597_vm6 = vweird.f32 %v2323_v43  ;;  %v2325_v30 = vpop.eup %2324 }
 0x6ce   :  { %vm598_vm8 = vmor %vm596_vm7, %vm597_vm6  ;;  %v2327_v17 = vpop.eup %2326 }
 0x6cf   :  { %v593_v31 = vsub.f32 1.0, %v592_v0  ;;  %v590_v18 = vadd.f32 1.0, %v2327_v17 }
 0x6d1   :  { %v594_v1 = vmul.f32 %v2323_v43, %v593_v31  ;;  %2328 = vrcp.f32 %v590_v18  ;;  %v617_v46 = vand.u32 2147483648, %v590_v18  ;;  %vm611_vm14 = vweird.f32 %v590_v18 }
 0x6d2   :  { %v615_v47 = vand.u32 2147483647, %v590_v18 }
 0x6d3   :  { %v595_v4 = vadd.f32 %v2323_v43, %v594_v1  ;;  %v618_v49 = vor.u32 1.1754944e-38, %v617_v46 }
 0x6d4   :  { %vm616_vm0 = vcmp.eq.f32.partialorder %v615_v47, 8.507059e+37 }
 0x6d5   :  { %v599_v9 = vsel %vm598_vm8, %v2323_v43, %v595_v4 }
 0x6d6   :  { %v604_v39 = vsel %vm601_vm10, %v603_v6, %v599_v9 }
 0x6d7   :  { %v626_v36 = vmul.f32 %v2325_v30, %v604_v39  ;;  %v625_v12 = vmul.f32 %v623_v8, %v604_v39  ;;  %v2329_v21 = vpop.eup %2328 }
 0x6d8   :  { %v607_v22 = vmul.f32 %v2329_v21, %v590_v18  ;;  %vm612_vm13 = vweird.f32 %v2329_v21 }
 0x6d9   :  { %628 = vrot.lane.b32.xlu2 %v626_v36, %s2473_s7  ;;  %vm613_vm15 = vmor %vm611_vm14, %vm612_vm13 }
 0x6da   :  { %v608_v25 = vsub.f32 1.0, %v607_v22 }
 0x6dc   :  { %v609_v26 = vmul.f32 %v2329_v21, %v608_v25 }
 0x6de   :  { %v610_v45 = vadd.f32 %v2329_v21, %v609_v26 }
 0x6e0   :  { %v614_v48 = vsel %vm613_vm15, %v2329_v21, %v610_v45 }
 0x6e1   :  { %v619_v41 = vsel %vm616_vm0, %v618_v49, %v614_v48 }
 0x733   :  { %v629_v28 = vpop.permute.xlu2 %628 }
 0x734   :  { %v631_v33 = vadd.f32 %v629_v28, %v625_v12 }
 0x736   :  { %2330 = vtanh.f32 %v631_v33  ;;  %v727_v11 = vrot.slane %v631_v33, 6 }
 0x73c   :  { %v2331_v50 = vpop.eup %2330 }
 0x73d   :  { %v2885_v51 = vmul.f32 %v2331_v50, %v619_v41 }
 0x73f   :  { %635 = vrot.lane.b32.xlu0 %v2885_v51, %s2473_s7 }
 0x7b1   :  { %v636_v52 = vpop.permute.xlu0 %635 }
 0x7b2   :  { %2203 = vmatmul.msk.f32.vlgmr.msrb.gmra.mxu0 %vm127_vm9, %v636_v52  ;;  %2204 = vmatmul.msk.f32.vlgmr.msrb.gmra.mxu1 %vm127_vm9, %v636_v52 }
 0x82f   :  { %v656_v53 = vpop.f32.mrf.mxu0  ;;  %v676_v59 = vpop.f32.mrf.mxu1 }
 0x830   :  { %v681_v54 = vrot.slane %v656_v53, 6  ;;  %v682_v60 = vrot.slane %v676_v59, 6 }
 0x832   :  { %v685_v55 = vadd.f32 %v681_v54, %v2875_v24  ;;  %v686_v62 = vadd.f32 %v682_v60, %v2881_v42 }
 0x834   :  { %v2205_v56 = vmul.f32 -1.442695, %v685_v55  ;;  %v2206_v38 = vmul.f32 -1.442695, %v686_v62 }
 0x836   :  { %2332 = vpow2.f32 %v2205_v56 }
 0x83c   :  { %v2333_v57 = vpop.eup %2332 }
 0x83d   :  { %v693_v58 = vadd.f32 1.0, %v2333_v57 }
 0x83f   :  { %2334 = vrcp.f32 %v693_v58  ;;  %v706_v5 = vand.u32 2147483648, %v693_v58  ;;  %v704_v7 = vand.u32 2147483647, %v693_v58  ;;  %vm700_vm2 = vweird.f32 %v693_v58 }
 0x840   :  { %2336 = vtanh.f32 %v686_v62 }
 0x841   :  { %v707_v16 = vor.u32 1.1754944e-38, %v706_v5  ;;  %vm705_vm4 = vcmp.eq.f32.partialorder %v704_v7, 8.507059e+37  ;;  %2338 = vpow2.f32 %v2206_v38 }
 0x845   :  { %v2335_v61 = vpop.eup %2334 }
 0x846   :  { %v696_v63 = vmul.f32 %v2335_v61, %v693_v58  ;;  %vm701_vm1 = vweird.f32 %v2335_v61  ;;  %v2337_v34 = vpop.eup %2336 }
 0x847   :  { %vm702_vm3 = vmor %vm700_vm2, %vm701_vm1  ;;  %v2339_v40 = vpop.eup %2338 }
 0x848   :  { %v697_v2 = vsub.f32 1.0, %v696_v63  ;;  %v694_v43 = vadd.f32 1.0, %v2339_v40 }
 0x84a   :  { %v698_v10 = vmul.f32 %v2335_v61, %v697_v2  ;;  %2340 = vrcp.f32 %v694_v43  ;;  %v721_v6 = vand.u32 2147483648, %v694_v43  ;;  %vm715_vm7 = vweird.f32 %v694_v43 }
 0x84b   :  { %v719_v8 = vand.u32 2147483647, %v694_v43 }
 0x84c   :  { %v699_v15 = vadd.f32 %v2335_v61, %v698_v10  ;;  %v722_v30 = vor.u32 1.1754944e-38, %v721_v6 }
 0x84d   :  { %vm720_vm10 = vcmp.eq.f32.partialorder %v719_v8, 8.507059e+37 }
 0x84e   :  { %v703_v20 = vsel %vm702_vm3, %v2335_v61, %v699_v15 }
 0x84f   :  { %v708_v32 = vsel %vm705_vm4, %v707_v16, %v703_v20 }
 0x850   :  { %v730_v35 = vmul.f32 %v2337_v34, %v708_v32  ;;  %v729_v37 = vmul.f32 %v727_v11, %v708_v32  ;;  %v2341_v44 = vpop.eup %2340 }
 0x851   :  { %v711_v0 = vmul.f32 %v2341_v44, %v694_v43  ;;  %vm716_vm6 = vweird.f32 %v2341_v44 }
 0x852   :  { %732 = vrot.lane.b32.xlu1 %v730_v35, %s2473_s7  ;;  %vm717_vm8 = vmor %vm715_vm7, %vm716_vm6  ;;  %vm993_vm6 = vcmask 261120  }
 0x853   :  { %v712_v31 = vsub.f32 1.0, %v711_v0 }
 0x855   :  { %v713_v27 = vmul.f32 %v2341_v44, %v712_v31  ;;  %v982_v31 = vld [vmem:[%s3471_s1 + $0x18] sm:$0xff] }
 0x856   :  { %1043 = vmatpush.msra.mxu3 %v982_v31 }
 0x857   :  { %v714_v4 = vadd.f32 %v2341_v44, %v713_v27  ;;  %v981_v27 = vld [vmem:[%s3471_s1 + $0x10] sm:$0xff] }
 0x858   :  { %1044 = vmatpush.msra.mxu3 %v981_v27 }
 0x859   :  { %v718_v9 = vsel %vm717_vm8, %v2341_v44, %v714_v4 }
 0x85a   :  { %v723_v36 = vsel %vm720_vm10, %v722_v30, %v718_v9 }
 0x8c4   :  { %v733_v1 = vpop.permute.xlu1 %732 }
 0x8c5   :  { %v735_v3 = vadd.f32 %v733_v1, %v729_v37  ;;  %v980_v1 = vld [vmem:[%s3471_s1 + $0x8] sm:$0xff] }
 0x8c6   :  { %1045 = vmatpush.msra.mxu3 %v980_v1 }
 0x8c7   :  { %2342 = vtanh.f32 %v735_v3  ;;  %v832_v55 = vrot.slane %v735_v3, 6  ;;  %v979_v3 = vld [vmem:[%s3471_s1] sm:$0xff] }
 0x8c8   :  { %1046 = vmatpush.msra.mxu3 %v979_v3 }
 0x8cd   :  { %v2343_v39 = vpop.eup %2342 }
 0x8ce   :  { %v2894_v12 = vmul.f32 %v2343_v39, %v723_v36 }
 0x8d0   :  { %v739_v13 = vrot.slane %v2894_v12, 2  ;;  %v954_v43 = vsel %vm948_vm11, %v2885_v51, %v2894_v12 }
 0x8d2   :  { %740 = vrot.lane.b32.xlu2 %v739_v13, %s2473_s7 }
 0x92c   :  { %v741_v17 = vpop.permute.xlu2 %740 }
 0x92d   :  { %2207 = vmatmul.msk.f32.vlgmr.msrb.gmra.mxu2 %vm127_vm9, %v741_v17  ;;  %2208 = vmatmul.msk.f32.vlgmr.msrb.gmra.mxu3 %vm127_vm9, %v741_v17 }
 0x9b0   :  { %v761_v18 = vpop.f32.mrf.mxu2  ;;  %v781_v33 = vpop.f32.mrf.mxu3 }
 0x9b1   :  { %v786_v21 = vrot.slane %v761_v18, 4  ;;  %v787_v45 = vrot.slane %v781_v33, 4 }
 0x9b3   :  { %v790_v22 = vadd.f32 %v786_v21, %v2875_v24  ;;  %v791_v47 = vadd.f32 %v787_v45, %v2881_v42 }
 0x9b5   :  { %v2209_v25 = vmul.f32 -1.442695, %v790_v22  ;;  %v2210_v61 = vmul.f32 -1.442695, %v791_v47 }
 0x9b7   :  { %2344 = vpow2.f32 %v2209_v25 }
 0x9bd   :  { %v2345_v26 = vpop.eup %2344 }
 0x9be   :  { %v798_v28 = vadd.f32 1.0, %v2345_v26 }
 0x9c0   :  { %2346 = vrcp.f32 %v798_v28  ;;  %v811_v50 = vand.u32 2147483648, %v798_v28  ;;  %v809_v52 = vand.u32 2147483647, %v798_v28  ;;  %vm805_vm14 = vweird.f32 %v798_v28 }
 0x9c1   :  { %2348 = vtanh.f32 %v791_v47 }
 0x9c2   :  { %v812_v54 = vor.u32 1.1754944e-38, %v811_v50  ;;  %vm810_vm0 = vcmp.eq.f32.partialorder %v809_v52, 8.507059e+37  ;;  %2350 = vpow2.f32 %v2210_v61 }
 0x9c6   :  { %v2347_v46 = vpop.eup %2346 }
 0x9c7   :  { %v801_v48 = vmul.f32 %v2347_v46, %v798_v28  ;;  %vm806_vm13 = vweird.f32 %v2347_v46  ;;  %v2349_v57 = vpop.eup %2348 }
 0x9c8   :  { %vm807_vm15 = vmor %vm805_vm14, %vm806_vm13  ;;  %v2351_v62 = vpop.eup %2350 }
 0x9c9   :  { %v802_v49 = vsub.f32 1.0, %v801_v48  ;;  %v799_v63 = vadd.f32 1.0, %v2351_v62 }
 0x9cb   :  { %v803_v41 = vmul.f32 %v2347_v46, %v802_v49  ;;  %2352 = vrcp.f32 %v799_v63  ;;  %v826_v20 = vand.u32 2147483648, %v799_v63  ;;  %vm820_vm2 = vweird.f32 %v799_v63 }
 0x9cc   :  { %v824_v34 = vand.u32 2147483647, %v799_v63 }
 0x9cd   :  { %v804_v53 = vadd.f32 %v2347_v46, %v803_v41  ;;  %v827_v35 = vor.u32 1.1754944e-38, %v826_v20 }
 0x9ce   :  { %vm825_vm4 = vcmp.eq.f32.partialorder %v824_v34, 8.507059e+37 }
 0x9cf   :  { %v808_v56 = vsel %vm807_vm15, %v2347_v46, %v804_v53 }
 0x9d0   :  { %v813_v58 = vsel %vm810_vm0, %v812_v54, %v808_v56 }
 0x9d1   :  { %v835_v59 = vmul.f32 %v2349_v57, %v813_v58  ;;  %v834_v60 = vmul.f32 %v832_v55, %v813_v58  ;;  %v2353_v2 = vpop.eup %2352  ;;  %v986_v58 = vld [vmem:[%s3471_s1 + $0x38] sm:$0xff] }
 0x9d2   :  { %v816_v5 = vmul.f32 %v2353_v2, %v799_v63  ;;  %vm821_vm1 = vweird.f32 %v2353_v2  ;;  %1010 = vmatpush.msra.mxu2 %v986_v58  ;;  %v1175_v58 = vld [vmem:[%s3474_s8 + $0x50] sm:$0xff] }
 0x9d3   :  { %837 = vrot.lane.b32.xlu0 %v835_v59, %s2473_s7  ;;  %vm822_vm3 = vmor %vm820_vm2, %vm821_vm1  ;;  %vm1054_vm2 = vcmask 326656  }
 0x9d4   :  { %v817_v10 = vsub.f32 1.0, %v816_v5 }
 0x9d6   :  { %v818_v7 = vmul.f32 %v2353_v2, %v817_v10 }
 0x9d8   :  { %v819_v11 = vadd.f32 %v2353_v2, %v818_v7 }
 0x9da   :  { %v823_v32 = vsel %vm822_vm3, %v2353_v2, %v819_v11 }
 0x9db   :  { %v828_v38 = vsel %vm825_vm4, %v827_v35, %v823_v32 }
 0xa45   :  { %v838_v15 = vpop.permute.xlu0 %837 }
 0xa46   :  { %v2903_v16 = vadd.f32 %v838_v15, %v834_v60  ;;  %v983_v60 = vld [vmem:[%s3471_s1 + $0x20] sm:$0xff] }
 0xa48   :  { %2354 = vtanh.f32 %v2903_v16  ;;  %v937_v46 = vrot.slane %v2903_v16, 6 }
 0xa4e   :  { %v2355_v37 = vpop.eup %2354 }
 0xa4f   :  { %v2906_v40 = vmul.f32 %v2355_v37, %v828_v38  ;;  %v962_v37 = vrot.slane %v2894_v12, 6  ;;  %v964_v38 = vrot.slane %v2885_v51, 2 }
 0xa51   :  { %v844_v44 = vrot.slane %v2906_v40, 4  ;;  %v2914_v0 = vsel %vm950_vm12, %v954_v43, %v2906_v40  ;;  %v960_v32 = vrot.slane %v2906_v40, 2 }
 0xa53   :  { %845 = vrot.lane.b32.xlu1 %v844_v44, %s2473_s7 }
 0xa5b   :  { %1023 = vrot.lane.b32.xlu1 %v2861_v14, %s2473_s7 }
 0xac5   :  { %v846_v14 = vpop.permute.xlu1 %845 }
 0xac6   :  { %2211 = vmatmul.msk.f32.vlgmr.msra.gmra.mxu0 %vm127_vm9, %v846_v14  ;;  %2212 = vmatmul.msk.f32.vlgmr.msra.gmra.mxu1 %vm127_vm9, %v846_v14 }
 0xacd   :  { %v1024_v4 = vpop.permute.xlu1 %1023 }
 0xace   :  { %2217 = vmatmul.msk.f32.vlgmr.msra.gmra.mxu3 %vm993_vm6, %v1024_v4 }
 0xb43   :  { %v866_v6 = vpop.f32.mrf.mxu0  ;;  %v886_v13 = vpop.f32.mrf.mxu1 }
 0xb44   :  { %v891_v8 = vrot.slane %v866_v6, 2  ;;  %v892_v17 = vrot.slane %v886_v13, 2  ;;  %v1067_v13 = vld [vmem:[%s3472_s2] sm:$0xff] }
 0xb46   :  { %v895_v9 = vadd.f32 %v891_v8, %v2875_v24  ;;  %v896_v21 = vadd.f32 %v892_v17, %v2881_v42  ;;  %v971_v42 = vrot.slane %v2764_v23, 2  ;;  %v985_v23 = vld [vmem:[%s3471_s1 + $0x30] sm:$0xff] }
 0xb47   :  { %1011 = vmatpush.msra.mxu2 %v985_v23  ;;  %v1176_v23 = vld [vmem:[%s3474_s8 + $0x58] sm:$0xff] }
 0xb48   :  { %v2213_v30 = vmul.f32 -1.442695, %v895_v9  ;;  %v978_v52 = vsel %vm952_vm5, %v2868_v19, %v971_v42  ;;  %v2214_v53 = vmul.f32 -1.442695, %v896_v21  ;;  %v984_v19 = vld [vmem:[%s3471_s1 + $0x28] sm:$0xff]  ;;  %v1071_v9 = vld [vmem:[%s3472_s2 + $0x20] sm:$0xff] }
 0xb49   :  { %1012 = vmatpush.msra.mxu2 %v984_v19  ;;  %1089 = vmatpush.msrb.mxu0 %v1071_v9  ;;  %v3029_v19 = vld [vmem:[%s3475_s9 + $0x78] sm:$0xff] }
 0xb4a   :  { %2356 = vpow2.f32 %v2213_v30  ;;  %v1070_v30 = vld [vmem:[%s3472_s2 + $0x18] sm:$0xff] }
 0xb4b   :  { %1013 = vmatpush.msra.mxu2 %v983_v60  ;;  %1090 = vmatpush.msrb.mxu0 %v1070_v30  ;;  %v1173_v60 = vld [vmem:[%s3474_s8 + $0x40] sm:$0xff] }
 0xb4c   :  { %v3230_v30 = vld [vmem:[%s3476_s10] sm:$0x3] }
 0xb50   :  { %v2357_v39 = vpop.eup %2356 }
 0xb51   :  { %v903_v36 = vadd.f32 1.0, %v2357_v39  ;;  %v1048_v51 = vpop.f32.mrf.mxu3  ;;  %v1069_v39 = vld [vmem:[%s3472_s2 + $0x10] sm:$0xff] }
 0xb52   :  { %1091 = vmatpush.msrb.mxu0 %v1069_v39  ;;  %v1183_v39 = vperm.slane %v3230_v30, 0 }
 0xb53   :  { %2358 = vrcp.f32 %v903_v36  ;;  %v916_v26 = vand.u32 2147483648, %v903_v36  ;;  %v914_v33 = vand.u32 2147483647, %v903_v36  ;;  %vm910_vm8 = vweird.f32 %v903_v36 }
 0xb54   :  { %2360 = vtanh.f32 %v896_v21 }
 0xb55   :  { %v917_v24 = vor.u32 1.1754944e-38, %v916_v26  ;;  %vm915_vm13 = vcmp.eq.f32.partialorder %v914_v33, 8.507059e+37  ;;  %2362 = vpow2.f32 %v2214_v53 }
 0xb59   :  { %v2359_v18 = vpop.eup %2358 }
 0xb5a   :  { %v906_v22 = vmul.f32 %v2359_v18, %v903_v36  ;;  %vm911_vm7 = vweird.f32 %v2359_v18  ;;  %v2361_v48 = vpop.eup %2360  ;;  %v1068_v36 = vld [vmem:[%s3472_s2 + $0x8] sm:$0xff] }
 0xb5b   :  { %vm912_vm10 = vmor %vm910_vm8, %vm911_vm7  ;;  %v2363_v54 = vpop.eup %2362  ;;  %1092 = vmatpush.msrb.mxu0 %v1068_v36 }
 0xb5c   :  { %v907_v25 = vsub.f32 1.0, %v906_v22  ;;  %v904_v55 = vadd.f32 1.0, %v2363_v54  ;;  %v1179_v54 = vld [vmem:[%s3474_s8 + $0x70] sm:$0xff] }
 0xb5d   :  { %1093 = vmatpush.msrb.mxu0 %v1067_v13  ;;  %1201 = vmatpush.msrb.mxu2 %v1179_v54 }
 0xb5e   :  { %v908_v28 = vmul.f32 %v2359_v18, %v907_v25  ;;  %2364 = vrcp.f32 %v904_v55  ;;  %v931_v5 = vand.u32 2147483648, %v904_v55  ;;  %vm925_vm15 = vweird.f32 %v904_v55 }
 0xb5f   :  { %v929_v10 = vand.u32 2147483647, %v904_v55 }
 0xb60   :  { %v909_v45 = vadd.f32 %v2359_v18, %v908_v28  ;;  %v932_v15 = vor.u32 1.1754944e-38, %v931_v5  ;;  %v1171_v5 = vld [vmem:[%s3474_s8 + $0x30] sm:$0xff] }
 0xb61   :  { %vm930_vm1 = vcmp.eq.f32.partialorder %v929_v10, 8.507059e+37  ;;  %v1172_v10 = vld [vmem:[%s3474_s8 + $0x38] sm:$0xff] }
 0xb62   :  { %v913_v47 = vsel %vm912_vm10, %v2359_v18, %v909_v45  ;;  %v1109_v45 = vld [vmem:[%s3473_s3 + $0x20] sm:$0xff] }
 0xb63   :  { %v918_v49 = vsel %vm915_vm13, %v917_v24, %v913_v47  ;;  %1127 = vmatpush.msrb.mxu1 %v1109_v45  ;;  %v1108_v24 = vld [vmem:[%s3473_s3 + $0x18] sm:$0xff]  ;;  %v1106_v47 = vld [vmem:[%s3473_s3 + $0x8] sm:$0xff] }
 0xb64   :  { %v940_v50 = vmul.f32 %v2361_v48, %v918_v49  ;;  %v939_v41 = vmul.f32 %v937_v46, %v918_v49  ;;  %v2365_v56 = vpop.eup %2364  ;;  %v1107_v46 = vld [vmem:[%s3473_s3 + $0x10] sm:$0xff]  ;;  %v1105_v48 = vld [vmem:[%s3473_s3] sm:$0xff] }
 0xb65   :  { %v921_v57 = vmul.f32 %v2365_v56, %v904_v55  ;;  %vm926_vm14 = vweird.f32 %v2365_v56  ;;  %1128 = vmatpush.msrb.mxu1 %v1108_v24  ;;  %v1180_v55 = vld [vmem:[%s3474_s8 + $0x78] sm:$0xff] }
 0xb66   :  { %942 = vrot.lane.b32.xlu2 %v940_v50, %s2473_s7  ;;  %vm927_vm0 = vmor %vm925_vm15, %vm926_vm14  ;;  %1224 = vmatpush.msrb.mxu3 %v1180_v55 }
 0xb67   :  { %v922_v59 = vsub.f32 1.0, %v921_v57  ;;  %1129 = vmatpush.msrb.mxu1 %v1107_v46  ;;  %v1178_v57 = vld [vmem:[%s3474_s8 + $0x68] sm:$0xff] }
 0xb68   :  { %1225 = vmatpush.msrb.mxu3 %v1178_v57 }
 0xb69   :  { %v923_v61 = vmul.f32 %v2365_v56, %v922_v59  ;;  %1130 = vmatpush.msrb.mxu1 %v1106_v47  ;;  %v3024_v59 = vld [vmem:[%s3475_s9 + $0x70] sm:$0xff] }
 0xb6a   :  { %1263 = vmatpush.msra.mxu0 %v3024_v59  ;;  %1226 = vmatpush.msrb.mxu3 %v1176_v23 }
 0xb6b   :  { %v924_v2 = vadd.f32 %v2365_v56, %v923_v61  ;;  %1131 = vmatpush.msrb.mxu1 %v1105_v48  ;;  %v1174_v61 = vld [vmem:[%s3474_s8 + $0x48] sm:$0xff] }
 0xb6c   :  { %1227 = vmatpush.msrb.mxu3 %v1174_v61 }
 0xb6d   :  { %v928_v7 = vsel %vm927_vm0, %v2365_v56, %v924_v2  ;;  %v1177_v56 = vld [vmem:[%s3474_s8 + $0x60] sm:$0xff]  ;;  %1283 = vmatpush.msra.mxu1 %v3029_v19  ;;  %v3052_v2 = vld [vmem:[%s3475_s9 + $0x50] sm:$0xff] }
 0xb6e   :  { %991 = vrot.lane.b32.xlu2 %v978_v52, %s2474_s27  ;;  %v933_v11 = vsel %vm930_vm1, %v932_v15, %v928_v7  ;;  %1202 = vmatpush.msrb.mxu2 %v1177_v56  ;;  %v3065_v7 = vld [vmem:[%s3475_s9 + $0x58] sm:$0xff]  ;;  %v3070_v15 = vld [vmem:[%s3475_s9 + $0x40] sm:$0xff] }
 0xb6f   :  { %1228 = vmatpush.msrb.mxu3 %v1172_v10 }
 0xb70   :  { %1203 = vmatpush.msrb.mxu2 %v1175_v58 }
 0xb72   :  { %1204 = vmatpush.msrb.mxu2 %v1173_v60 }
 0xb74   :  { %1205 = vmatpush.msrb.mxu2 %v1171_v5 }
 0xbc0   :  { %v943_v62 = vpop.permute.xlu2 %942 }
 0xbc1   :  { %v945_v63 = vadd.f32 %v943_v62, %v939_v41  ;;  %v3042_v62 = vld [vmem:[%s3475_s9 + $0x60] sm:$0xff] }
 0xbc2   :  { %1264 = vmatpush.msra.mxu0 %v3042_v62 }
 0xbc3   :  { %2366 = vtanh.f32 %v945_v63  ;;  %v3047_v63 = vld [vmem:[%s3475_s9 + $0x68] sm:$0xff] }
 0xbc4   :  { %1284 = vmatpush.msra.mxu1 %v3047_v63  ;;  %1265 = vmatpush.msra.mxu0 %v3052_v2 }
 0xbc6   :  { %1285 = vmatpush.msra.mxu1 %v3065_v7  ;;  %1266 = vmatpush.msra.mxu0 %v3070_v15 }
 0xbc8   :  { %v992_v40 = vpop.permute.xlu2 %991 }
 0xbc9   :  { %v2367_v16 = vpop.eup %2366 }
 0xbca   :  { %v947_v20 = vmul.f32 %v2367_v16, %v933_v11  ;;  %v1169_v16 = vld [vmem:[%s3474_s8 + $0x20] sm:$0xff]  ;;  %v1170_v11 = vld [vmem:[%s3474_s8 + $0x28] sm:$0xff] }
 0xbcb   :  { %1206 = vmatpush.msrb.mxu2 %v1169_v16  ;;  %1229 = vmatpush.msrb.mxu3 %v1170_v11 }
 0xbcc   :  { %v958_v34 = vrot.slane %v947_v20, 6  ;;  %v956_v35 = vsel %vm952_vm5, %v2914_v0, %v947_v20  ;;  %v1167_v20 = vld [vmem:[%s3474_s8 + $0x10] sm:$0xff] }
 0xbcd   :  { %1207 = vmatpush.msrb.mxu2 %v1167_v20 }
 0xbce   :  { %v973_v43 = vsel %vm948_vm11, %v958_v34, %v960_v32  ;;  %v1168_v34 = vld [vmem:[%s3474_s8 + $0x18] sm:$0xff]  ;;  %v1165_v32 = vld [vmem:[%s3474_s8] sm:$0xff] }
 0xbcf   :  { %v974_v44 = vsel %vm950_vm12, %v973_v43, %v962_v37  ;;  %1230 = vmatpush.msrb.mxu3 %v1168_v34  ;;  %1208 = vmatpush.msrb.mxu2 %v1165_v32 }
 0xbd0   :  { %v975_v31 = vsel %vm952_vm5, %v974_v44, %v964_v38 }
 0xbd1   :  { %989 = vrot.lane.b32.xlu0 %v975_v31, %s2474_s27 }
 0xbd9   :  { %1025 = vrot.lane.b32.xlu0 %v956_v35, %s2473_s7 }
 0xc43   :  { %v990_v27 = vpop.permute.xlu0 %989 }
 0xc44   :  { %2215 = vmatmul.msk.f32.vlgmr.msra.gmra.mxu2 %vm993_vm6, %v990_v27 }
 0xc45   :  { %1358 = vmatpush.msra.mxu2 %v3024_v59 }
 0xc47   :  { %1359 = vmatpush.msra.mxu2 %v3042_v62 }
 0xc49   :  { %1360 = vmatpush.msra.mxu2 %v3052_v2 }
 0xc4b   :  { %v1026_v1 = vpop.permute.xlu0 %1025  ;;  %1361 = vmatpush.msra.mxu2 %v3070_v15 }
 0xc4c   :  { %2216 = vmatmul.msk.f32.gmra.mxu2 %vm993_vm6, %v992_v40  ;;  %2218 = vmatmul.msk.f32.gmra.mxu3 %vm993_vm6, %v1026_v1  ;;  %v1166_v40 = vld [vmem:[%s3474_s8 + $0x8] sm:$0xff] }
 0xc4d   :  { %v3110_v1 = vld [vmem:[%s3475_s9 + $0x48] sm:$0xff]  ;;  %1231 = vmatpush.msrb.mxu3 %v1166_v40 }
 0xc4e   :  { %1286 = vmatpush.msra.mxu1 %v3110_v1 }
 0xc4f   :  { %1378 = vmatpush.msra.mxu3 %v3029_v19 }
 0xc51   :  { %1379 = vmatpush.msra.mxu3 %v3047_v63 }
 0xc53   :  { %1380 = vmatpush.msra.mxu3 %v3065_v7 }
 0xc55   :  { %1381 = vmatpush.msra.mxu3 %v3110_v1 }
 0xcc7   :  { %v1015_v12 = vpop.f32.mrf.mxu2 }
 0xcc8   :  { %v1049_v0 = vadd.f32 %v1048_v51, %v1015_v12  ;;  %v3116_v51 = vld [vmem:[%s3475_s9 + $0x30] sm:$0xff]  ;;  %v3121_v12 = vld [vmem:[%s3475_s9 + $0x38] sm:$0xff] }
 0xcc9   :  { %1267 = vmatpush.msra.mxu0 %v3116_v51  ;;  %1287 = vmatpush.msra.mxu1 %v3121_v12 }
 0xcca   :  { %v1055_v3 = vsel %vm1054_vm2, %v1049_v0, -inf  ;;  %1362 = vmatpush.msra.mxu2 %v3116_v51  ;;  %1382 = vmatpush.msra.mxu3 %v3121_v12 }
 0xccb   :  { %1056 = vmax.xlane.f32.xlu1 %v1055_v3  ;;  %v3132_v3 = vld [vmem:[%s3475_s9 + $0x28] sm:$0xff] }
 0xccc   :  { %1288 = vmatpush.msra.mxu1 %v3132_v3  ;;  %1383 = vmatpush.msra.mxu3 %v3132_v3 }
 0xccf   :  { %v1018_v14 = vpop.f32.mrf.mxu2  ;;  %v1051_v4 = vpop.f32.mrf.mxu3 }
 0xcd0   :  { %v1052_v6 = vadd.f32 %v1051_v4, %v1018_v14  ;;  %v3139_v14 = vld [vmem:[%s3475_s9 + $0x10] sm:$0xff]  ;;  %v3146_v4 = vld [vmem:[%s3475_s9 + $0x18] sm:$0xff] }
 0xcd1   :  { %1289 = vmatpush.msra.mxu1 %v3146_v4  ;;  %1384 = vmatpush.msra.mxu3 %v3146_v4 }
 0xcd2   :  { %v1058_v8 = vsel %vm1054_vm2, %v1052_v6, -inf }
 0xcd3   :  { %1059 = vmax.xlane.f32.xlu2 %v1058_v8  ;;  %v3160_v8 = vld [vmem:[%s3475_s9 + $0x8] sm:$0xff] }
 0xcd4   :  { %1290 = vmatpush.msra.mxu1 %v3160_v8  ;;  %1385 = vmatpush.msra.mxu3 %v3160_v8 }
 0xd3e   :  { %v1057_v17 = vpop.xlane.xlu1 %1056 }
 0xd3f   :  { %v1061_v18 = vsub.f32 %v1049_v0, %v1057_v17  ;;  %v3126_v0 = vld [vmem:[%s3475_s9 + $0x20] sm:$0xff] }
 0xd40   :  { %1268 = vmatpush.msra.mxu0 %v3126_v0  ;;  %1363 = vmatpush.msra.mxu2 %v3126_v0 }
 0xd41   :  { %v1063_v21 = vmul.f32 1.442695, %v1061_v18 }
 0xd42   :  { %1269 = vmatpush.msra.mxu0 %v3139_v14  ;;  %1364 = vmatpush.msra.mxu2 %v3139_v14 }
 0xd43   :  { %2368 = vpow2.f32 %v1063_v21 }
 0xd46   :  { %v1060_v22 = vpop.xlane.xlu2 %1059 }
 0xd47   :  { %v1062_v25 = vsub.f32 %v1052_v6, %v1060_v22  ;;  %v3153_v6 = vld [vmem:[%s3475_s9] sm:$0xff] }
 0xd48   :  { %1270 = vmatpush.msra.mxu0 %v3153_v6  ;;  %1365 = vmatpush.msra.mxu2 %v3153_v6 }
 0xd49   :  { %v2369_v26 = vpop.eup %2368  ;;  %v1065_v28 = vmul.f32 1.442695, %v1062_v25  ;;  %v1184_v25 = vperm.slane %v3230_v30, 1 }
 0xd4a   :  { %2219 = vmatmul.msk.f32.vlgmr.msrb.gmra.mxu0 %vm1054_vm2, %v2369_v26 }
 0xd4b   :  { %2370 = vpow2.f32 %v1065_v28  ;;  %1463 = vmatpush.msrb.mxu0 %v3024_v59 }
 0xd4d   :  { %1464 = vmatpush.msrb.mxu0 %v3042_v62 }
 0xd4f   :  { %1465 = vmatpush.msrb.mxu0 %v3052_v2 }
 0xd51   :  { %v2371_v33 = vpop.eup %2370  ;;  %1466 = vmatpush.msrb.mxu0 %v3070_v15 }
 0xd52   :  { %2220 = vmatmul.msk.f32.gmra.mxu0 %vm1054_vm2, %v2371_v33 }
 0xd53   :  { %1467 = vmatpush.msrb.mxu0 %v3116_v51 }
 0xd55   :  { %1468 = vmatpush.msrb.mxu0 %v3126_v0 }
 0xd57   :  { %1469 = vmatpush.msrb.mxu0 %v3139_v14 }
 0xd59   :  { %1470 = vmatpush.msrb.mxu0 %v3153_v6 }
 0xd5a   :  { %1271 = vmatmul.f32.vlgmr.msra.gmra.mxu0 %v2472_v29 }
 0xd5b   :  { %1673 = vmatpush.msra.mxu0 %v3024_v59 }
 0xd5d   :  { %1674 = vmatpush.msra.mxu0 %v3042_v62 }
 0xd5f   :  { %1675 = vmatpush.msra.mxu0 %v3052_v2 }
 0xd61   :  { %1676 = vmatpush.msra.mxu0 %v3070_v15 }
 0xd63   :  { %1677 = vmatpush.msra.mxu0 %v3116_v51 }
 0xd65   :  { %1678 = vmatpush.msra.mxu0 %v3126_v0 }
 0xd67   :  { %1679 = vmatpush.msra.mxu0 %v3139_v14 }
 0xd69   :  { %1680 = vmatpush.msra.mxu0 %v3153_v6 }
 0xdc7   :  { %v1095_v49 = vpop.f32.mrf.mxu0 }
 0xdc8   :  { %2372 = vrcp.f32 %v1095_v49 }
 0xdce   :  { %v2373_v50 = vpop.eup %2372 }
 0xdcf   :  { %v1103_v41 = vmul.f32 %v2373_v50, %v2369_v26  ;;  %v1098_v42 = vpop.f32.mrf.mxu0 }
 0xdd0   :  { %2374 = vrcp.f32 %v1098_v42 }
 0xdd1   :  { %2221 = vmatmul.msk.f32.vlgmr.msrb.gmra.mxu1 %vm1054_vm2, %v1103_v41 }
 0xdd2   :  { %1483 = vmatpush.msrb.mxu1 %v3029_v19 }
 0xdd4   :  { %1484 = vmatpush.msrb.mxu1 %v3047_v63 }
 0xdd6   :  { %v2375_v52 = vpop.eup %2374  ;;  %1485 = vmatpush.msrb.mxu1 %v3065_v7 }
 0xdd7   :  { %v1104_v53 = vmul.f32 %v2375_v52, %v2371_v33  ;;  %v1272_v13 = vpop.f32.mrf.mxu0 }
 0xdd8   :  { %1486 = vmatpush.msrb.mxu1 %v3110_v1 }
 0xdd9   :  { %2222 = vmatmul.msk.f32.gmra.mxu1 %vm1054_vm2, %v1104_v53 }
 0xdda   :  { %1487 = vmatpush.msrb.mxu1 %v3121_v12 }
 0xddc   :  { %1488 = vmatpush.msrb.mxu1 %v3132_v3 }
 0xdde   :  { %1489 = vmatpush.msrb.mxu1 %v3146_v4 }
 0xde0   :  { %1490 = vmatpush.msrb.mxu1 %v3160_v8 }
 0xde1   :  { %1291 = vmatmul.f32.vlgmr.msra.gmra.mxu1 %v2472_v29 }
 0xde2   :  { %1693 = vmatpush.msra.mxu1 %v3029_v19 }
 0xde4   :  { %1694 = vmatpush.msra.mxu1 %v3047_v63 }
 0xde6   :  { %1695 = vmatpush.msra.mxu1 %v3065_v7 }
 0xde8   :  { %1696 = vmatpush.msra.mxu1 %v3110_v1 }
 0xdea   :  { %1697 = vmatpush.msra.mxu1 %v3121_v12 }
 0xdec   :  { %1698 = vmatpush.msra.mxu1 %v3132_v3 }
 0xdee   :  { %1699 = vmatpush.msra.mxu1 %v3146_v4 }
 0xdf0   :  { %1700 = vmatpush.msra.mxu1 %v3160_v8 }
 0xe4e   :  { %v3091_v35 = vpop.f32.mrf.mxu1 }
 0xe4f   :  { %v1145_v55 = vrot.slane %v3091_v35, 6  ;;  %v1147_v56 = vrot.slane %v3091_v35, 2 }
 0xe51   :  { %v1152_v23 = vsel %vm948_vm11, %v1145_v55, %v1147_v56 }
 0xe52   :  { %v1153_v60 = vsel %vm950_vm12, %v1152_v23, %v1145_v55 }
 0xe53   :  { %v1154_v61 = vsel %vm952_vm5, %v1153_v60, %v1147_v56 }
 0xe56   :  { %v3096_v37 = vpop.f32.mrf.mxu1 }
 0xe57   :  { %v1140_v38 = vrot.slane %v3096_v37, 6  ;;  %v1142_v43 = vrot.slane %v3096_v37, 2 }
 0xe59   :  { %v1149_v44 = vsel %vm948_vm11, %v1140_v38, %v1142_v43 }
 0xe5a   :  { %v1150_v31 = vsel %vm950_vm12, %v1149_v44, %v1140_v38 }
 0xe5b   :  { %v1151_v27 = vsel %vm952_vm5, %v1150_v31, %v1142_v43 }
 0xe5c   :  { %1157 = vrot.lane.b32.xlu0 %v1151_v27, %s2474_s27 }
 0xe5e   :  { %v1292_v45 = vpop.f32.mrf.mxu1 }
 0xece   :  { %v1158_v29 = vpop.permute.xlu0 %1157 }
 0xecf   :  { %v1163_v9 = vsel %vm993_vm6, %v3091_v35, %v1158_v29 }
 0xed0   :  { %2223 = vmatmul.msk.f32.vlgmr.msrb.gmra.mxu2 %vm127_vm9, %v1163_v9  ;;  %2225 = vmatmul.msk.f32.vlgmr.msrb.gmra.mxu3 %vm127_vm9, %v1163_v9 }
 0xed1   :  { %1568 = vmatpush.msrb.mxu2 %v3024_v59  ;;  %1588 = vmatpush.msrb.mxu3 %v3029_v19 }
 0xed3   :  { %1569 = vmatpush.msrb.mxu2 %v3042_v62  ;;  %1589 = vmatpush.msrb.mxu3 %v3047_v63 }
 0xed5   :  { %1570 = vmatpush.msrb.mxu2 %v3052_v2  ;;  %1590 = vmatpush.msrb.mxu3 %v3065_v7 }
 0xed7   :  { %1571 = vmatpush.msrb.mxu2 %v3070_v15  ;;  %1591 = vmatpush.msrb.mxu3 %v3110_v1 }
 0xed9   :  { %1572 = vmatpush.msrb.mxu2 %v3116_v51  ;;  %1592 = vmatpush.msrb.mxu3 %v3121_v12 }
 0xedb   :  { %1573 = vmatpush.msrb.mxu2 %v3126_v0  ;;  %1593 = vmatpush.msrb.mxu3 %v3132_v3 }
 0xedd   :  { %1574 = vmatpush.msrb.mxu2 %v3139_v14  ;;  %1594 = vmatpush.msrb.mxu3 %v3146_v4 }
 0xedf   :  { %1575 = vmatpush.msrb.mxu2 %v3153_v6  ;;  %1595 = vmatpush.msrb.mxu3 %v3160_v8 }
 0xf53   :  { %v1210_v36 = vpop.f32.mrf.mxu2  ;;  %v1233_v28 = vpop.f32.mrf.mxu3 }
 0xf54   :  { %v3235_v17 = vadd.f32 %v1210_v36, %v1183_v39  ;;  %v3241_v33 = vadd.f32 %v1233_v28, %v1184_v25 }
 0xf56   :  { %v1295_v18 = vadd.f32 %v1272_v13, %v3235_v17  ;;  %v1296_v46 = vadd.f32 %v1292_v45, %v3241_v33 }
 0xf58   :  { %v2227_v21 = vmul.f32 -1.442695, %v1295_v18  ;;  %v2228_v5 = vmul.f32 -1.442695, %v1296_v46 }
 0xf5a   :  { %2376 = vpow2.f32 %v2227_v21 }
 0xf60   :  { %v2377_v22 = vpop.eup %2376 }
 0xf61   :  { %v1303_v26 = vadd.f32 1.0, %v2377_v22 }
 0xf63   :  { %2378 = vrcp.f32 %v1303_v26  ;;  %v1316_v49 = vand.u32 2147483648, %v1303_v26  ;;  %v1314_v41 = vand.u32 2147483647, %v1303_v26  ;;  %vm1310_vm4 = vweird.f32 %v1303_v26 }
 0xf64   :  { %2380 = vtanh.f32 %v1296_v46 }
 0xf65   :  { %v1317_v52 = vor.u32 1.1754944e-38, %v1316_v49  ;;  %vm1315_vm8 = vcmp.eq.f32.partialorder %v1314_v41, 8.507059e+37  ;;  %2382 = vpow2.f32 %v2228_v5 }
 0xf69   :  { %v2379_v24 = vpop.eup %2378 }
 0xf6a   :  { %v1306_v47 = vmul.f32 %v2379_v24, %v1303_v26  ;;  %vm1311_vm3 = vweird.f32 %v2379_v24  ;;  %v2381_v54 = vpop.eup %2380 }
 0xf6b   :  { %vm1312_vm7 = vmor %vm1310_vm4, %vm1311_vm3  ;;  %v2383_v10 = vpop.eup %2382 }
 0xf6c   :  { %v1307_v48 = vsub.f32 1.0, %v1306_v47  ;;  %v1304_v16 = vadd.f32 1.0, %v2383_v10 }
 0xf6e   :  { %v1308_v50 = vmul.f32 %v2379_v24, %v1307_v48  ;;  %2384 = vrcp.f32 %v1304_v16  ;;  %v1331_v31 = vand.u32 2147483648, %v1304_v16  ;;  %vm1325_vm13 = vweird.f32 %v1304_v16 }
 0xf6f   :  { %v1329_v27 = vand.u32 2147483647, %v1304_v16 }
 0xf70   :  { %v1309_v42 = vadd.f32 %v2379_v24, %v1308_v50  ;;  %v1332_v29 = vor.u32 1.1754944e-38, %v1331_v31 }
 0xf71   :  { %vm1330_vm15 = vcmp.eq.f32.partialorder %v1329_v27, 8.507059e+37 }
 0xf72   :  { %v1313_v53 = vsel %vm1312_vm7, %v2379_v24, %v1309_v42 }
 0xf73   :  { %v1318_v57 = vsel %vm1315_vm8, %v1317_v52, %v1313_v53 }
 0xf74   :  { %v1337_v58 = vmul.f32 %v2381_v54, %v1318_v57  ;;  %v2385_v11 = vpop.eup %2384  ;;  %v1336_v35 = vmul.f32 0.0, %v1318_v57 }
 0xf75   :  { %v1321_v20 = vmul.f32 %v2385_v11, %v1304_v16  ;;  %vm1326_vm10 = vweird.f32 %v2385_v11 }
 0xf76   :  { %1339 = vrot.lane.b32.xlu0 %v1337_v58, %s2473_s7  ;;  %vm1327_vm14 = vmor %vm1325_vm13, %vm1326_vm10 }
 0xf77   :  { %v1322_v34 = vsub.f32 1.0, %v1321_v20 }
 0xf79   :  { %v1323_v32 = vmul.f32 %v2385_v11, %v1322_v34 }
 0xf7b   :  { %v1324_v44 = vadd.f32 %v2385_v11, %v1323_v32 }
 0xf7d   :  { %v1328_v40 = vsel %vm1327_vm14, %v2385_v11, %v1324_v44 }
 0xf7e   :  { %1159 = vrot.lane.b32.xlu0 %v1154_v61, %s2474_s27  ;;  %v1333_v18 = vsel %vm1330_vm15, %v1332_v29, %v1328_v40 }
 0xfe8   :  { %v1340_v38 = vpop.permute.xlu0 %1339 }
 0xfe9   :  { %v3251_v43 = vadd.f32 %v1340_v38, %v1336_v35 }
 0xfeb   :  { %2386 = vtanh.f32 %v3251_v43  ;;  %v1438_v23 = vrot.slane %v3251_v43, 6 }
 0xff0   :  { %v1160_v9 = vpop.permute.xlu0 %1159 }
 0xff1   :  { %v2387_v36 = vpop.eup %2386  ;;  %v1164_v13 = vsel %vm993_vm6, %v3096_v37, %v1160_v9 }
 0xff2   :  { %2224 = vmatmul.msk.f32.gmra.mxu2 %vm127_vm9, %v1164_v13  ;;  %2226 = vmatmul.msk.f32.gmra.mxu3 %vm127_vm9, %v1164_v13  ;;  %v3258_v21 = vmul.f32 %v2387_v36, %v1333_v18 }
 0xff4   :  { %1346 = vrot.lane.b32.xlu0 %v3258_v21, %s2473_s7 }
0x1066   :  { %v1347_v22 = vpop.permute.xlu0 %1346 }
0x1067   :  { %2229 = vmatmul.msk.f32.vlgmr.msra.gmra.mxu2 %vm127_vm9, %v1347_v22  ;;  %2230 = vmatmul.msk.f32.vlgmr.msra.gmra.mxu3 %vm127_vm9, %v1347_v22 }
0x1068   :  { %1771 = vmatpush.msra.mxu2 %v3024_v59  ;;  %1791 = vmatpush.msra.mxu3 %v3029_v19 }
0x106a   :  { %1772 = vmatpush.msra.mxu2 %v3042_v62  ;;  %1792 = vmatpush.msra.mxu3 %v3047_v63 }
0x106c   :  { %1773 = vmatpush.msra.mxu2 %v3052_v2  ;;  %1793 = vmatpush.msra.mxu3 %v3065_v7 }
0x106e   :  { %1774 = vmatpush.msra.mxu2 %v3070_v15  ;;  %1794 = vmatpush.msra.mxu3 %v3110_v1 }
0x1070   :  { %1775 = vmatpush.msra.mxu2 %v3116_v51  ;;  %1795 = vmatpush.msra.mxu3 %v3121_v12 }
0x1072   :  { %1776 = vmatpush.msra.mxu2 %v3126_v0  ;;  %1796 = vmatpush.msra.mxu3 %v3132_v3 }
0x1074   :  { %1777 = vmatpush.msra.mxu2 %v3139_v14  ;;  %1797 = vmatpush.msra.mxu3 %v3146_v4 }
0x1075   :  { %v3280_v37 = vpop.f32.mrf.mxu2  ;;  %v3283_v46 = vpop.f32.mrf.mxu3 }
0x1076   :  { %1778 = vmatpush.msra.mxu2 %v3153_v6  ;;  %1798 = vmatpush.msra.mxu3 %v3160_v8 }
0x10ea   :  { %v1367_v26 = vpop.f32.mrf.mxu2  ;;  %v1387_v49 = vpop.f32.mrf.mxu3 }
0x10eb   :  { %v1392_v28 = vrot.slane %v1367_v26, 6  ;;  %v1393_v50 = vrot.slane %v1387_v49, 6 }
0x10ed   :  { %v1396_v45 = vadd.f32 %v1392_v28, %v3235_v17  ;;  %v1397_v42 = vadd.f32 %v1393_v50, %v3241_v33 }
0x10ef   :  { %v2231_v24 = vmul.f32 -1.442695, %v1396_v45  ;;  %v2232_v11 = vmul.f32 -1.442695, %v1397_v42 }
0x10f1   :  { %2388 = vpow2.f32 %v2231_v24 }
0x10f7   :  { %v2389_v47 = vpop.eup %2388 }
0x10f8   :  { %v1404_v48 = vadd.f32 1.0, %v2389_v47 }
0x10fa   :  { %2390 = vrcp.f32 %v1404_v48  ;;  %v1417_v54 = vand.u32 2147483648, %v1404_v48  ;;  %v1415_v56 = vand.u32 2147483647, %v1404_v48  ;;  %vm1411_vm1 = vweird.f32 %v1404_v48 }
0x10fb   :  { %2392 = vtanh.f32 %v1397_v42 }
0x10fc   :  { %v1418_v58 = vor.u32 1.1754944e-38, %v1417_v54  ;;  %vm1416_vm3 = vcmp.eq.f32.partialorder %v1415_v56, 8.507059e+37  ;;  %2394 = vpow2.f32 %v2232_v11 }
0x1100   :  { %v2391_v41 = vpop.eup %2390 }
0x1101   :  { %v1407_v52 = vmul.f32 %v2391_v41, %v1404_v48  ;;  %vm1412_vm0 = vweird.f32 %v2391_v41  ;;  %v2393_v61 = vpop.eup %2392 }
0x1102   :  { %vm1413_vm2 = vmor %vm1411_vm1, %vm1412_vm0  ;;  %v2395_v20 = vpop.eup %2394 }
0x1103   :  { %v1408_v53 = vsub.f32 1.0, %v1407_v52  ;;  %v1405_v34 = vadd.f32 1.0, %v2395_v20 }
0x1105   :  { %v1409_v55 = vmul.f32 %v2391_v41, %v1408_v53  ;;  %2396 = vrcp.f32 %v1405_v34  ;;  %v1432_v40 = vand.u32 2147483648, %v1405_v34  ;;  %vm1426_vm7 = vweird.f32 %v1405_v34 }
0x1106   :  { %v1430_v29 = vand.u32 2147483647, %v1405_v34 }
0x1107   :  { %v1410_v57 = vadd.f32 %v2391_v41, %v1409_v55  ;;  %v1433_v36 = vor.u32 1.1754944e-38, %v1432_v40 }
0x1108   :  { %vm1431_vm10 = vcmp.eq.f32.partialorder %v1430_v29, 8.507059e+37 }
0x1109   :  { %v1414_v60 = vsel %vm1413_vm2, %v2391_v41, %v1410_v57 }
0x110a   :  { %v1419_v5 = vsel %vm1416_vm3, %v1418_v58, %v1414_v60 }
0x110b   :  { %v1441_v10 = vmul.f32 %v2393_v61, %v1419_v5  ;;  %v1440_v16 = vmul.f32 %v1438_v23, %v1419_v5  ;;  %v2397_v32 = vpop.eup %2396 }
0x110c   :  { %v1422_v35 = vmul.f32 %v2397_v32, %v1405_v34  ;;  %vm1427_vm4 = vweird.f32 %v2397_v32 }
0x110d   :  { %1443 = vrot.lane.b32.xlu0 %v1441_v10, %s2473_s7  ;;  %vm1428_vm8 = vmor %vm1426_vm7, %vm1427_vm4 }
0x110e   :  { %v1423_v38 = vsub.f32 1.0, %v1422_v35 }
0x1110   :  { %v1424_v44 = vmul.f32 %v2397_v32, %v1423_v38 }
0x1112   :  { %v1425_v43 = vadd.f32 %v2397_v32, %v1424_v44 }
0x1114   :  { %v1429_v9 = vsel %vm1428_vm8, %v2397_v32, %v1425_v43 }
0x1115   :  { %v1434_v18 = vsel %vm1431_vm10, %v1433_v36, %v1429_v9 }
0x117f   :  { %v1444_v31 = vpop.permute.xlu0 %1443 }
0x1180   :  { %v3288_v27 = vadd.f32 %v1444_v31, %v1440_v16 }
0x1182   :  { %2398 = vtanh.f32 %v3288_v27  ;;  %v1543_v61 = vrot.slane %v3288_v27, 6 }
0x1188   :  { %v2399_v13 = vpop.eup %2398 }
0x1189   :  { %v3291_v22 = vmul.f32 %v2399_v13, %v1434_v18 }
0x118b   :  { %v1450_v26 = vrot.slane %v3291_v22, 2 }
0x118d   :  { %1451 = vrot.lane.b32.xlu2 %v1450_v26, %s2473_s7 }
0x11e7   :  { %v1452_v28 = vpop.permute.xlu2 %1451 }
0x11e8   :  { %2233 = vmatmul.msk.f32.vlgmr.msrb.gmra.mxu0 %vm127_vm9, %v1452_v28  ;;  %2234 = vmatmul.msk.f32.vlgmr.msrb.gmra.mxu1 %vm127_vm9, %v1452_v28 }
0x11e9   :  { %1876 = vmatpush.msrb.mxu0 %v3024_v59  ;;  %1896 = vmatpush.msrb.mxu1 %v3029_v19 }
0x11eb   :  { %1877 = vmatpush.msrb.mxu0 %v3042_v62  ;;  %1897 = vmatpush.msrb.mxu1 %v3047_v63 }
0x11ed   :  { %1878 = vmatpush.msrb.mxu0 %v3052_v2  ;;  %1898 = vmatpush.msrb.mxu1 %v3065_v7 }
0x11ef   :  { %1879 = vmatpush.msrb.mxu0 %v3070_v15  ;;  %1899 = vmatpush.msrb.mxu1 %v3110_v1 }
0x11f1   :  { %1880 = vmatpush.msrb.mxu0 %v3116_v51  ;;  %1900 = vmatpush.msrb.mxu1 %v3121_v12 }
0x11f3   :  { %1881 = vmatpush.msrb.mxu0 %v3126_v0  ;;  %1901 = vmatpush.msrb.mxu1 %v3132_v3 }
0x11f5   :  { %1882 = vmatpush.msrb.mxu0 %v3139_v14  ;;  %1902 = vmatpush.msrb.mxu1 %v3146_v4 }
0x11f7   :  { %1883 = vmatpush.msrb.mxu0 %v3153_v6  ;;  %1903 = vmatpush.msrb.mxu1 %v3160_v8 }
0x1265   :  { %v1472_v45 = vpop.f32.mrf.mxu0  ;;  %v1492_v41 = vpop.f32.mrf.mxu1 }
0x1266   :  { %v1497_v24 = vrot.slane %v1472_v45, 4  ;;  %v1498_v42 = vrot.slane %v1492_v41, 4 }
0x1268   :  { %v1501_v47 = vadd.f32 %v1497_v24, %v3235_v17  ;;  %v1502_v53 = vadd.f32 %v1498_v42, %v3241_v33  ;;  %v2072_v24 = vsel %vm948_vm11, %v3258_v21, %v3291_v22 }
0x126a   :  { %v2235_v48 = vmul.f32 -1.442695, %v1501_v47  ;;  %v2236_v34 = vmul.f32 -1.442695, %v1502_v53 }
0x126c   :  { %2400 = vpow2.f32 %v2235_v48 }
0x1272   :  { %v2401_v49 = vpop.eup %2400 }
0x1273   :  { %v1509_v50 = vadd.f32 1.0, %v2401_v49 }
0x1275   :  { %2402 = vrcp.f32 %v1509_v50  ;;  %v1522_v56 = vand.u32 2147483648, %v1509_v50  ;;  %v1520_v58 = vand.u32 2147483647, %v1509_v50  ;;  %vm1516_vm14 = vweird.f32 %v1509_v50 }
0x1276   :  { %2404 = vtanh.f32 %v1502_v53 }
0x1277   :  { %v1523_v60 = vor.u32 1.1754944e-38, %v1522_v56  ;;  %vm1521_vm0 = vcmp.eq.f32.partialorder %v1520_v58, 8.507059e+37  ;;  %2406 = vpow2.f32 %v2236_v34 }
0x127b   :  { %v2403_v52 = vpop.eup %2402 }
0x127c   :  { %v1512_v54 = vmul.f32 %v2403_v52, %v1509_v50  ;;  %vm1517_vm13 = vweird.f32 %v2403_v52  ;;  %v2405_v10 = vpop.eup %2404 }
0x127d   :  { %vm1518_vm15 = vmor %vm1516_vm14, %vm1517_vm13  ;;  %v2407_v32 = vpop.eup %2406 }
0x127e   :  { %v1513_v55 = vsub.f32 1.0, %v1512_v54  ;;  %v1510_v35 = vadd.f32 1.0, %v2407_v32 }
0x1280   :  { %v1514_v57 = vmul.f32 %v2403_v52, %v1513_v55  ;;  %2408 = vrcp.f32 %v1510_v35  ;;  %v1537_v9 = vand.u32 2147483648, %v1510_v35  ;;  %vm1531_vm2 = vweird.f32 %v1510_v35 }
0x1281   :  { %v1535_v36 = vand.u32 2147483647, %v1510_v35 }
0x1282   :  { %v1515_v23 = vadd.f32 %v2403_v52, %v1514_v57  ;;  %v1538_v18 = vor.u32 1.1754944e-38, %v1537_v9 }
0x1283   :  { %vm1536_vm4 = vcmp.eq.f32.partialorder %v1535_v36, 8.507059e+37  ;;  %v3369_v36 = vadd.f32 %v3280_v37, %v1183_v39 }
0x1284   :  { %v1519_v5 = vsel %vm1518_vm15, %v2403_v52, %v1515_v23 }
0x1285   :  { %v1524_v16 = vsel %vm1521_vm0, %v1523_v60, %v1519_v5 }
0x1286   :  { %v1546_v11 = vmul.f32 %v2405_v10, %v1524_v16  ;;  %v1545_v20 = vmul.f32 %v1543_v61, %v1524_v16  ;;  %v2409_v38 = vpop.eup %2408 }
0x1287   :  { %v1527_v44 = vmul.f32 %v2409_v38, %v1510_v35  ;;  %vm1532_vm1 = vweird.f32 %v2409_v38 }
0x1288   :  { %1548 = vrot.lane.b32.xlu1 %v1546_v11, %s2473_s7  ;;  %vm1533_vm3 = vmor %vm1531_vm2, %vm1532_vm1 }
0x1289   :  { %v1528_v31 = vsub.f32 1.0, %v1527_v44 }
0x128b   :  { %v1529_v43 = vmul.f32 %v2409_v38, %v1528_v31 }
0x128d   :  { %v1530_v27 = vadd.f32 %v2409_v38, %v1529_v43 }
0x128f   :  { %v1534_v13 = vsel %vm1533_vm3, %v2409_v38, %v1530_v27 }
0x1290   :  { %v1539_v28 = vsel %vm1536_vm4, %v1538_v18, %v1534_v13 }
0x12fa   :  { %v1549_v40 = vpop.permute.xlu1 %1548 }
0x12fb   :  { %v3317_v29 = vadd.f32 %v1549_v40, %v1545_v20  ;;  %v2090_v40 = vrot.slane %v3291_v22, 6 }
0x12fd   :  { %2410 = vtanh.f32 %v3317_v29  ;;  %v1648_v50 = vrot.slane %v3317_v29, 6 }
0x1303   :  { %v2411_v26 = vpop.eup %2410 }
0x1304   :  { %v3320_v45 = vmul.f32 %v2411_v26, %v1539_v28 }
0x1306   :  { %v1555_v47 = vrot.slane %v3320_v45, 4  ;;  %v3328_v48 = vsel %vm950_vm12, %v2072_v24, %v3320_v45  ;;  %v2088_v31 = vrot.slane %v3320_v45, 2  ;;  %v3375_v24 = vadd.f32 %v3283_v46, %v1184_v25 }
0x1308   :  { %1556 = vrot.lane.b32.xlu0 %v1555_v47, %s2473_s7 }
0x137a   :  { %v1557_v49 = vpop.permute.xlu0 %1556 }
0x137b   :  { %2237 = vmatmul.msk.f32.vlgmr.msrb.gmra.mxu2 %vm127_vm9, %v1557_v49  ;;  %2238 = vmatmul.msk.f32.vlgmr.msrb.gmra.mxu3 %vm127_vm9, %v1557_v49 }
0x137c   :  { %1981 = vmatpush.msrb.mxu2 %v3024_v59  ;;  %2001 = vmatpush.msrb.mxu3 %v3029_v19 }
0x137e   :  { %1982 = vmatpush.msrb.mxu2 %v3042_v62  ;;  %2002 = vmatpush.msrb.mxu3 %v3047_v63 }
0x1380   :  { %1983 = vmatpush.msrb.mxu2 %v3052_v2  ;;  %2003 = vmatpush.msrb.mxu3 %v3065_v7 }
0x1382   :  { %1984 = vmatpush.msrb.mxu2 %v3070_v15  ;;  %2004 = vmatpush.msrb.mxu3 %v3110_v1 }
0x1384   :  { %1985 = vmatpush.msrb.mxu2 %v3116_v51  ;;  %2005 = vmatpush.msrb.mxu3 %v3121_v12 }
0x1386   :  { %1986 = vmatpush.msrb.mxu2 %v3126_v0  ;;  %2006 = vmatpush.msrb.mxu3 %v3132_v3 }
0x1388   :  { %1987 = vmatpush.msrb.mxu2 %v3139_v14  ;;  %2007 = vmatpush.msrb.mxu3 %v3146_v4 }
0x138a   :  { %1988 = vmatpush.msrb.mxu2 %v3153_v6  ;;  %2008 = vmatpush.msrb.mxu3 %v3160_v8 }
0x13fe   :  { %v1577_v59 = vpop.f32.mrf.mxu2  ;;  %v1597_v15 = vpop.f32.mrf.mxu3 }
0x13ff   :  { %v1602_v19 = vrot.slane %v1577_v59, 2  ;;  %v1603_v1 = vrot.slane %v1597_v15, 2 }
0x1401   :  { %v1606_v62 = vadd.f32 %v1602_v19, %v3235_v17  ;;  %v1607_v12 = vadd.f32 %v1603_v1, %v3241_v33 }
0x1403   :  { %v2239_v63 = vmul.f32 -1.442695, %v1606_v62  ;;  %v2240_v33 = vmul.f32 -1.442695, %v1607_v12 }
0x1405   :  { %2412 = vpow2.f32 %v2239_v63 }
0x140b   :  { %v2413_v2 = vpop.eup %2412 }
0x140c   :  { %v1614_v7 = vadd.f32 1.0, %v2413_v2 }
0x140e   :  { %2414 = vrcp.f32 %v1614_v7  ;;  %v1627_v14 = vand.u32 2147483648, %v1614_v7  ;;  %v1625_v6 = vand.u32 2147483647, %v1614_v7  ;;  %vm1621_vm8 = vweird.f32 %v1614_v7 }
0x140f   :  { %2416 = vtanh.f32 %v1607_v12 }
0x1410   :  { %v1628_v17 = vor.u32 1.1754944e-38, %v1627_v14  ;;  %vm1626_vm13 = vcmp.eq.f32.partialorder %v1625_v6, 8.507059e+37  ;;  %2418 = vpow2.f32 %v2240_v33 }
0x1414   :  { %v2415_v51 = vpop.eup %2414 }
0x1415   :  { %v1617_v0 = vmul.f32 %v2415_v51, %v1614_v7  ;;  %vm1622_vm7 = vweird.f32 %v2415_v51  ;;  %v2417_v42 = vpop.eup %2416 }
0x1416   :  { %vm1623_vm10 = vmor %vm1621_vm8, %vm1622_vm7  ;;  %v2419_v55 = vpop.eup %2418 }
0x1417   :  { %v1618_v3 = vsub.f32 1.0, %v1617_v0  ;;  %v1615_v56 = vadd.f32 1.0, %v2419_v55 }
0x1419   :  { %v1619_v4 = vmul.f32 %v2415_v51, %v1618_v3  ;;  %2420 = vrcp.f32 %v1615_v56  ;;  %v1642_v16 = vand.u32 2147483648, %v1615_v56  ;;  %vm1636_vm15 = vweird.f32 %v1615_v56 }
0x141a   :  { %v1640_v11 = vand.u32 2147483647, %v1615_v56 }
0x141b   :  { %v1620_v8 = vadd.f32 %v2415_v51, %v1619_v4  ;;  %v1643_v34 = vor.u32 1.1754944e-38, %v1642_v16 }
0x141c   :  { %vm1641_vm1 = vcmp.eq.f32.partialorder %v1640_v11, 8.507059e+37 }
0x141d   :  { %v1624_v41 = vsel %vm1623_vm10, %v2415_v51, %v1620_v8 }
0x141e   :  { %v1629_v52 = vsel %vm1626_vm13, %v1628_v17, %v1624_v41 }
0x141f   :  { %v1651_v53 = vmul.f32 %v2417_v42, %v1629_v52  ;;  %v1650_v54 = vmul.f32 %v1648_v50, %v1629_v52  ;;  %v2421_v57 = vpop.eup %2420 }
0x1420   :  { %v1632_v58 = vmul.f32 %v2421_v57, %v1615_v56  ;;  %vm1637_vm14 = vweird.f32 %v2421_v57 }
0x1421   :  { %1653 = vrot.lane.b32.xlu0 %v1651_v53, %s2473_s7  ;;  %vm1638_vm0 = vmor %vm1636_vm15, %vm1637_vm14 }
0x1422   :  { %v1633_v23 = vsub.f32 1.0, %v1632_v58 }
0x1424   :  { %v1634_v60 = vmul.f32 %v2421_v57, %v1633_v23 }
0x1426   :  { %v1635_v10 = vadd.f32 %v2421_v57, %v1634_v60 }
0x1428   :  { %v1639_v20 = vsel %vm1638_vm0, %v2421_v57, %v1635_v10 }
0x1429   :  { %v1644_v35 = vsel %vm1641_vm1, %v1643_v34, %v1639_v20 }
0x1493   :  { %v1654_v61 = vpop.permute.xlu0 %1653 }
0x1494   :  { %v1656_v5 = vadd.f32 %v1654_v61, %v1650_v54 }
0x1496   :  { %2422 = vtanh.f32 %v1656_v5  ;;  %v1747_v2 = vrot.slane %v1656_v5, 6 }
0x149c   :  { %v2423_v32 = vpop.eup %2422 }
0x149d   :  { %v1658_v38 = vmul.f32 %v2423_v32, %v1644_v35 }
0x149f   :  { %v1660_v44 = vrot.slane %v1658_v38, 6  ;;  %v3356_v43 = vsel %vm952_vm5, %v3328_v48, %v1658_v38 }
0x14a1   :  { %1661 = vrot.lane.b32.xlu0 %v1660_v44, %s2473_s7  ;;  %v2097_v29 = vsel %vm948_vm11, %v1660_v44, %v2088_v31 }
0x14a2   :  { %v3362_v27 = vsel %vm950_vm12, %v2097_v29, %v2090_v40 }
0x1513   :  { %v1662_v9 = vpop.permute.xlu0 %1661 }
0x1514   :  { %2241 = vmatmul.msk.f32.vlgmr.msra.gmra.mxu0 %vm127_vm9, %v1662_v9  ;;  %2242 = vmatmul.msk.f32.vlgmr.msra.gmra.mxu1 %vm127_vm9, %v1662_v9 }
0x1591   :  { %v1682_v13 = vpop.f32.mrf.mxu0  ;;  %v1702_v45 = vpop.f32.mrf.mxu1 }
0x1592   :  { %v1705_v22 = vadd.f32 %v1682_v13, %v3369_v36  ;;  %v1706_v48 = vadd.f32 %v1702_v45, %v3375_v24 }
0x1594   :  { %v2243_v18 = vmul.f32 -1.442695, %v1705_v22  ;;  %v2244_v1 = vmul.f32 -1.442695, %v1706_v48 }
0x1596   :  { %2424 = vpow2.f32 %v2243_v18 }
0x159c   :  { %v2425_v26 = vpop.eup %2424 }
0x159d   :  { %v1713_v28 = vadd.f32 1.0, %v2425_v26 }
0x159f   :  { %2426 = vrcp.f32 %v1713_v28  ;;  %v1726_v37 = vand.u32 2147483648, %v1713_v28  ;;  %v1724_v19 = vand.u32 2147483647, %v1713_v28  ;;  %vm1720_vm3 = vweird.f32 %v1713_v28 }
0x15a0   :  { %2428 = vtanh.f32 %v1706_v48 }
0x15a1   :  { %v1727_v63 = vor.u32 1.1754944e-38, %v1726_v37  ;;  %vm1725_vm7 = vcmp.eq.f32.partialorder %v1724_v19, 8.507059e+37  ;;  %2430 = vpow2.f32 %v2244_v1 }
0x15a5   :  { %v2427_v47 = vpop.eup %2426 }
0x15a6   :  { %v1716_v49 = vmul.f32 %v2427_v47, %v1713_v28  ;;  %vm1721_vm2 = vweird.f32 %v2427_v47  ;;  %v2429_v30 = vpop.eup %2428 }
0x15a7   :  { %vm1722_vm4 = vmor %vm1720_vm3, %vm1721_vm2  ;;  %v2431_v51 = vpop.eup %2430 }
0x15a8   :  { %v1717_v39 = vsub.f32 1.0, %v1716_v49  ;;  %v1714_v12 = vadd.f32 1.0, %v2431_v51 }
0x15aa   :  { %v1718_v59 = vmul.f32 %v2427_v47, %v1717_v39  ;;  %2432 = vrcp.f32 %v1714_v12  ;;  %v1741_v50 = vand.u32 2147483648, %v1714_v12  ;;  %vm1735_vm10 = vweird.f32 %v1714_v12 }
0x15ab   :  { %v1739_v41 = vand.u32 2147483647, %v1714_v12 }
0x15ac   :  { %v1719_v62 = vadd.f32 %v2427_v47, %v1718_v59  ;;  %v1742_v52 = vor.u32 1.1754944e-38, %v1741_v50 }
0x15ad   :  { %vm1740_vm14 = vcmp.eq.f32.partialorder %v1739_v41, 8.507059e+37 }
0x15ae   :  { %v1723_v7 = vsel %vm1722_vm4, %v2427_v47, %v1719_v62 }
0x15af   :  { %v1728_v25 = vsel %vm1725_vm7, %v1727_v63, %v1723_v7 }
0x15b0   :  { %v1750_v46 = vmul.f32 %v2429_v30, %v1728_v25  ;;  %v1749_v15 = vmul.f32 %v1747_v2, %v1728_v25  ;;  %v2433_v0 = vpop.eup %2432 }
0x15b1   :  { %v1731_v3 = vmul.f32 %v2433_v0, %v1714_v12  ;;  %vm1736_vm8 = vweird.f32 %v2433_v0 }
0x15b2   :  { %1752 = vrot.lane.b32.xlu2 %v1750_v46, %s2473_s7  ;;  %vm1737_vm13 = vmor %vm1735_vm10, %vm1736_vm8 }
0x15b3   :  { %v1732_v14 = vsub.f32 1.0, %v1731_v3 }
0x15b5   :  { %v1733_v4 = vmul.f32 %v2433_v0, %v1732_v14 }
0x15b7   :  { %v1734_v17 = vadd.f32 %v2433_v0, %v1733_v4 }
0x15b9   :  { %v1738_v42 = vsel %vm1737_vm13, %v2433_v0, %v1734_v17 }
0x15ba   :  { %v1743_v54 = vsel %vm1740_vm14, %v1742_v52, %v1738_v42 }
0x160c   :  { %v1753_v6 = vpop.permute.xlu2 %1752 }
0x160d   :  { %v1755_v8 = vadd.f32 %v1753_v6, %v1749_v15 }
0x160f   :  { %2434 = vtanh.f32 %v1755_v8  ;;  %v1851_v40 = vrot.slane %v1755_v8, 6 }
0x1615   :  { %v2435_v53 = vpop.eup %2434 }
0x1616   :  { %v3379_v33 = vmul.f32 %v2435_v53, %v1743_v54 }
0x1618   :  { %1759 = vrot.lane.b32.xlu1 %v3379_v33, %s2473_s7 }
0x168a   :  { %v1760_v55 = vpop.permute.xlu1 %1759 }
0x168b   :  { %2245 = vmatmul.msk.f32.vlgmr.msra.gmra.mxu2 %vm127_vm9, %v1760_v55  ;;  %2246 = vmatmul.msk.f32.vlgmr.msra.gmra.mxu3 %vm127_vm9, %v1760_v55 }
0x170e   :  { %v1780_v56 = vpop.f32.mrf.mxu2  ;;  %v1800_v5 = vpop.f32.mrf.mxu3 }
0x170f   :  { %v1805_v57 = vrot.slane %v1780_v56, 6  ;;  %v1806_v10 = vrot.slane %v1800_v5, 6 }
0x1711   :  { %v1809_v58 = vadd.f32 %v1805_v57, %v3369_v36  ;;  %v1810_v11 = vadd.f32 %v1806_v10, %v3375_v24  ;;  %v2092_v10 = vrot.slane %v3258_v21, 2 }
0x1713   :  { %v2247_v23 = vmul.f32 -1.442695, %v1809_v58  ;;  %v2248_v26 = vmul.f32 -1.442695, %v1810_v11 }
0x1715   :  { %2436 = vpow2.f32 %v2247_v23 }
0x171b   :  { %v2437_v60 = vpop.eup %2436 }
0x171c   :  { %v1817_v61 = vadd.f32 1.0, %v2437_v60 }
0x171e   :  { %2438 = vrcp.f32 %v1817_v61  ;;  %v1830_v32 = vand.u32 2147483648, %v1817_v61  ;;  %v1828_v38 = vand.u32 2147483647, %v1817_v61  ;;  %vm1824_vm0 = vweird.f32 %v1817_v61 }
0x171f   :  { %2440 = vtanh.f32 %v1810_v11 }
0x1720   :  { %v1831_v31 = vor.u32 1.1754944e-38, %v1830_v32  ;;  %vm1829_vm2 = vcmp.eq.f32.partialorder %v1828_v38, 8.507059e+37  ;;  %2442 = vpow2.f32 %v2248_v26  ;;  %v2102_v32 = vld [vmem:[%s3477_s4 + $0x10] sm:$0xff] }
0x1724   :  { %v2439_v16 = vpop.eup %2438 }
0x1725   :  { %v1820_v20 = vmul.f32 %v2439_v16, %v1817_v61  ;;  %vm1825_vm15 = vweird.f32 %v2439_v16  ;;  %v2441_v9 = vpop.eup %2440 }
0x1726   :  { %vm1826_vm1 = vmor %vm1824_vm0, %vm1825_vm15  ;;  %v2443_v28 = vpop.eup %2442 }
0x1727   :  { %v1821_v34 = vsub.f32 1.0, %v1820_v20  ;;  %v1818_v45 = vadd.f32 1.0, %v2443_v28 }
0x1729   :  { %v1822_v35 = vmul.f32 %v2439_v16, %v1821_v34  ;;  %2444 = vrcp.f32 %v1818_v45  ;;  %v1845_v62 = vand.u32 2147483648, %v1818_v45  ;;  %vm1839_vm4 = vweird.f32 %v1818_v45  ;;  %v2103_v34 = vld [vmem:[%s3477_s4 + $0x18] sm:$0xff] }
0x172a   :  { %v1843_v63 = vand.u32 2147483647, %v1818_v45  ;;  %2163 = vmatpush.msra.mxu1 %v2103_v34  ;;  %2265 = vmatpush.msra.mxu3 %v2103_v34 }
0x172b   :  { %v1823_v44 = vadd.f32 %v2439_v16, %v1822_v35  ;;  %v1846_v7 = vor.u32 1.1754944e-38, %v1845_v62  ;;  %v2106_v62 = vld [vmem:[%s3477_s4 + $0x30] sm:$0xff] }
0x172c   :  { %vm1844_vm8 = vcmp.eq.f32.partialorder %v1843_v63, 8.507059e+37  ;;  %2164 = vmatpush.msra.mxu1 %v2102_v32  ;;  %2266 = vmatpush.msra.mxu3 %v2102_v32  ;;  %v2105_v63 = vld [vmem:[%s3477_s4 + $0x28] sm:$0xff] }
0x172d   :  { %v1827_v29 = vsel %vm1826_vm1, %v2439_v16, %v1823_v44  ;;  %v2099_v16 = vsel %vm952_vm5, %v3362_v27, %v2092_v10  ;;  %v2101_v27 = vld [vmem:[%s3477_s4 + $0x8] sm:$0xff] }
0x172e   :  { %v1832_v13 = vsel %vm1829_vm2, %v1831_v31, %v1827_v29  ;;  %2165 = vmatpush.msra.mxu1 %v2101_v27  ;;  %2267 = vmatpush.msra.mxu3 %v2101_v27 }
0x172f   :  { %v1854_v22 = vmul.f32 %v2441_v9, %v1832_v13  ;;  %v1853_v18 = vmul.f32 %v1851_v40, %v1832_v13  ;;  %v2445_v47 = vpop.eup %2444 }
0x1730   :  { %v1835_v48 = vmul.f32 %v2445_v47, %v1818_v45  ;;  %vm1840_vm3 = vweird.f32 %v2445_v47 }
0x1731   :  { %1856 = vrot.lane.b32.xlu0 %v1854_v22, %s2473_s7  ;;  %vm1841_vm7 = vmor %vm1839_vm4, %vm1840_vm3 }
0x1732   :  { %v1836_v49 = vsub.f32 1.0, %v1835_v48 }
0x1734   :  { %v1837_v39 = vmul.f32 %v2445_v47, %v1836_v49 }
0x1736   :  { %v1838_v19 = vadd.f32 %v2445_v47, %v1837_v39 }
0x1738   :  { %v1842_v2 = vsel %vm1841_vm7, %v2445_v47, %v1838_v19  ;;  %v2107_v19 = vld [vmem:[%s3477_s4 + $0x38] sm:$0xff] }
0x1739   :  { %v1847_v25 = vsel %vm1844_vm8, %v1846_v7, %v1842_v2  ;;  %2261 = vmatpush.msra.mxu2 %v2107_v19  ;;  %2130 = vmatpush.msra.mxu0 %v2107_v19  ;;  %v2104_v2 = vld [vmem:[%s3477_s4 + $0x20] sm:$0xff] }
0x173b   :  { %2262 = vmatpush.msra.mxu2 %v2106_v62  ;;  %2131 = vmatpush.msra.mxu0 %v2106_v62 }
0x173d   :  { %2263 = vmatpush.msra.mxu2 %v2105_v63  ;;  %2132 = vmatpush.msra.mxu0 %v2105_v63 }
0x173f   :  { %2264 = vmatpush.msra.mxu2 %v2104_v2  ;;  %2133 = vmatpush.msra.mxu0 %v2104_v2 }
0x17a3   :  { %v1857_v37 = vpop.permute.xlu0 %1856 }
0x17a4   :  { %v1859_v59 = vadd.f32 %v1857_v37, %v1853_v18 }
0x17a6   :  { %2446 = vtanh.f32 %v1859_v59  ;;  %v1956_v57 = vrot.slane %v1859_v59, 6 }
0x17ac   :  { %v2447_v30 = vpop.eup %2446 }
0x17ad   :  { %v3388_v46 = vmul.f32 %v2447_v30, %v1847_v25 }
0x17af   :  { %v1863_v15 = vrot.slane %v3388_v46, 2  ;;  %v2075_v49 = vsel %vm948_vm11, %v3379_v33, %v3388_v46 }
0x17b1   :  { %1864 = vrot.lane.b32.xlu2 %v1863_v15, %s2473_s7 }
0x180b   :  { %v1865_v1 = vpop.permute.xlu2 %1864 }
0x180c   :  { %2249 = vmatmul.msk.f32.vlgmr.msrb.gmra.mxu0 %vm127_vm9, %v1865_v1  ;;  %2250 = vmatmul.msk.f32.vlgmr.msrb.gmra.mxu1 %vm127_vm9, %v1865_v1 }
0x1889   :  { %v1885_v51 = vpop.f32.mrf.mxu0  ;;  %v1905_v6 = vpop.f32.mrf.mxu1 }
0x188a   :  { %v1910_v12 = vrot.slane %v1885_v51, 4  ;;  %v1911_v8 = vrot.slane %v1905_v6, 4 }
0x188c   :  { %v1914_v0 = vadd.f32 %v1910_v12, %v3369_v36  ;;  %v1915_v50 = vadd.f32 %v1911_v8, %v3375_v24 }
0x188e   :  { %v2251_v3 = vmul.f32 -1.442695, %v1914_v0  ;;  %v2252_v11 = vmul.f32 -1.442695, %v1915_v50 }
0x1890   :  { %2448 = vpow2.f32 %v2251_v3 }
0x1896   :  { %v2449_v14 = vpop.eup %2448 }
0x1897   :  { %v1922_v4 = vadd.f32 1.0, %v2449_v14 }
0x1899   :  { %2450 = vrcp.f32 %v1922_v4  ;;  %v1935_v52 = vand.u32 2147483648, %v1922_v4  ;;  %v1933_v54 = vand.u32 2147483647, %v1922_v4  ;;  %vm1929_vm13 = vweird.f32 %v1922_v4 }
0x189a   :  { %2452 = vtanh.f32 %v1915_v50 }
0x189b   :  { %v1936_v56 = vor.u32 1.1754944e-38, %v1935_v52  ;;  %vm1934_vm15 = vcmp.eq.f32.partialorder %v1933_v54, 8.507059e+37  ;;  %2454 = vpow2.f32 %v2252_v11 }
0x189f   :  { %v2451_v17 = vpop.eup %2450 }
0x18a0   :  { %v1925_v41 = vmul.f32 %v2451_v17, %v1922_v4  ;;  %vm1930_vm10 = vweird.f32 %v2451_v17  ;;  %v2453_v23 = vpop.eup %2452 }
0x18a1   :  { %vm1931_vm14 = vmor %vm1929_vm13, %vm1930_vm10  ;;  %v2455_v20 = vpop.eup %2454 }
0x18a2   :  { %v1926_v42 = vsub.f32 1.0, %v1925_v41  ;;  %v1923_v21 = vadd.f32 1.0, %v2455_v20 }
0x18a4   :  { %v1927_v53 = vmul.f32 %v2451_v17, %v1926_v42  ;;  %2456 = vrcp.f32 %v1923_v21  ;;  %v1950_v13 = vand.u32 2147483648, %v1923_v21  ;;  %vm1944_vm1 = vweird.f32 %v1923_v21 }
0x18a5   :  { %v1948_v22 = vand.u32 2147483647, %v1923_v21 }
0x18a6   :  { %v1928_v55 = vadd.f32 %v2451_v17, %v1927_v53  ;;  %v1951_v26 = vor.u32 1.1754944e-38, %v1950_v13 }
0x18a7   :  { %vm1949_vm3 = vcmp.eq.f32.partialorder %v1948_v22, 8.507059e+37 }
0x18a8   :  { %v1932_v58 = vsel %vm1931_vm14, %v2451_v17, %v1928_v55 }
0x18a9   :  { %v1937_v60 = vsel %vm1934_vm15, %v1936_v56, %v1932_v58 }
0x18aa   :  { %v1959_v61 = vmul.f32 %v2453_v23, %v1937_v60  ;;  %v1958_v5 = vmul.f32 %v1956_v57, %v1937_v60  ;;  %v2457_v35 = vpop.eup %2456 }
0x18ab   :  { %v1940_v38 = vmul.f32 %v2457_v35, %v1923_v21  ;;  %vm1945_vm0 = vweird.f32 %v2457_v35 }
0x18ac   :  { %1961 = vrot.lane.b32.xlu1 %v1959_v61, %s2473_s7  ;;  %vm1946_vm2 = vmor %vm1944_vm1, %vm1945_vm0  ;;  %vm2174_vm0 = vcmask 39936  }
0x18ad   :  { %v1941_v44 = vsub.f32 1.0, %v1940_v38 }
0x18af   :  { %v1942_v31 = vmul.f32 %v2457_v35, %v1941_v44 }
0x18b1   :  { %v1943_v9 = vadd.f32 %v2457_v35, %v1942_v31 }
0x18b3   :  { %v1947_v18 = vsel %vm1946_vm2, %v2457_v35, %v1943_v9  ;;  %v2085_v9 = vrot.slane %v3379_v33, 2 }
0x18b4   :  { %2112 = vrot.lane.b32.xlu1 %v2099_v16, %s2474_s27  ;;  %v1952_v47 = vsel %vm1949_vm3, %v1951_v26, %v1947_v18 }
0x18bc   :  { %2143 = vrot.lane.b32.xlu1 %v3356_v43, %s2473_s7  ;;  %v2100_v43 = vld [vmem:[%s3477_s4] sm:$0xff] }
0x18bd   :  { %2166 = vmatpush.msra.mxu1 %v2100_v43  ;;  %2268 = vmatpush.msra.mxu3 %v2100_v43 }
0x191e   :  { %v1962_v40 = vpop.permute.xlu1 %1961 }
0x191f   :  { %v3415_v29 = vadd.f32 %v1962_v40, %v1958_v5 }
0x1921   :  { %2458 = vtanh.f32 %v3415_v29  ;;  %v2061_v52 = vrot.slane %v3415_v29, 6  ;;  %v2083_v29 = vrot.slane %v3388_v46, 6 }
0x1926   :  { %v2113_v28 = vpop.permute.xlu1 %2112 }
0x1927   :  { %v2459_v45 = vpop.eup %2458 }
0x1928   :  { %v3418_v48 = vmul.f32 %v2459_v45, %v1952_v47 }
0x192a   :  { %v1968_v39 = vrot.slane %v3418_v48, 4  ;;  %v3426_v37 = vsel %vm950_vm12, %v2075_v49, %v3418_v48  ;;  %v2081_v40 = vrot.slane %v3418_v48, 2 }
0x192c   :  { %1969 = vrot.lane.b32.xlu0 %v1968_v39, %s2473_s7 }
0x192e   :  { %v2144_v59 = vpop.permute.xlu1 %2143 }
0x192f   :  { %2259 = vmatmul.msk.f32.vlgmr.msra.gmra.mxu1 %vm993_vm6, %v2144_v59 }
0x199e   :  { %v1970_v7 = vpop.permute.xlu0 %1969 }
0x199f   :  { %2253 = vmatmul.msk.f32.vlgmr.msrb.gmra.mxu2 %vm127_vm9, %v1970_v7  ;;  %2254 = vmatmul.msk.f32.vlgmr.msrb.gmra.mxu3 %vm127_vm9, %v1970_v7 }
0x19a7   :  { %2258 = vmatmul.msk.f32.vlgmr.msra.gmra.mxu2 %vm993_vm6, %v2113_v28 }
0x19ac   :  { %v2168_v45 = vpop.f32.mrf.mxu1 }
0x1a22   :  { %v1990_v30 = vpop.f32.mrf.mxu2  ;;  %v2010_v0 = vpop.f32.mrf.mxu3 }
0x1a23   :  { %v2015_v25 = vrot.slane %v1990_v30, 2  ;;  %v2016_v3 = vrot.slane %v2010_v0, 2 }
0x1a25   :  { %v2019_v15 = vadd.f32 %v2015_v25, %v3369_v36  ;;  %v2020_v4 = vadd.f32 %v2016_v3, %v3375_v24 }
0x1a27   :  { %v2255_v1 = vmul.f32 -1.442695, %v2019_v15  ;;  %v2256_v24 = vmul.f32 -1.442695, %v2020_v4 }
0x1a29   :  { %2460 = vpow2.f32 %v2255_v1 }
0x1a2a   :  { %v2138_v33 = vpop.f32.mrf.mxu2 }
0x1a2f   :  { %v2461_v51 = vpop.eup %2460 }
0x1a30   :  { %v2027_v12 = vadd.f32 1.0, %v2461_v51 }
0x1a32   :  { %2462 = vrcp.f32 %v2027_v12  ;;  %v2040_v17 = vand.u32 2147483648, %v2027_v12  ;;  %v2038_v41 = vand.u32 2147483647, %v2027_v12  ;;  %vm2034_vm4 = vweird.f32 %v2027_v12 }
0x1a33   :  { %2464 = vtanh.f32 %v2020_v4 }
0x1a34   :  { %v2041_v36 = vor.u32 1.1754944e-38, %v2040_v17  ;;  %vm2039_vm8 = vcmp.eq.f32.partialorder %v2038_v41, 8.507059e+37  ;;  %2466 = vpow2.f32 %v2256_v24 }
0x1a38   :  { %v2463_v14 = vpop.eup %2462 }
0x1a39   :  { %v2030_v6 = vmul.f32 %v2463_v14, %v2027_v12  ;;  %vm2035_vm9 = vweird.f32 %v2463_v14  ;;  %v2465_v54 = vpop.eup %2464 }
0x1a3a   :  { %vm2036_vm7 = vmor %vm2034_vm4, %vm2035_vm9  ;;  %v2467_v58 = vpop.eup %2466 }
0x1a3b   :  { %v2031_v8 = vsub.f32 1.0, %v2030_v6  ;;  %v2028_v23 = vadd.f32 1.0, %v2467_v58 }
0x1a3d   :  { %v2032_v50 = vmul.f32 %v2463_v14, %v2031_v8  ;;  %2468 = vrcp.f32 %v2028_v23  ;;  %v2055_v34 = vand.u32 2147483648, %v2028_v23  ;;  %vm2049_vm13 = vweird.f32 %v2028_v23 }
0x1a3e   :  { %v2053_v32 = vand.u32 2147483647, %v2028_v23 }
0x1a3f   :  { %v2033_v42 = vadd.f32 %v2463_v14, %v2032_v50  ;;  %v2056_v27 = vor.u32 1.1754944e-38, %v2055_v34 }
0x1a40   :  { %vm2054_vm15 = vcmp.eq.f32.partialorder %v2053_v32, 8.507059e+37 }
0x1a41   :  { %v2037_v53 = vsel %vm2036_vm7, %v2463_v14, %v2033_v42 }
0x1a42   :  { %v2042_v55 = vsel %vm2039_vm8, %v2041_v36, %v2037_v53 }
0x1a43   :  { %v2064_v56 = vmul.f32 %v2465_v54, %v2042_v55  ;;  %v2063_v57 = vmul.f32 %v2061_v52, %v2042_v55  ;;  %v2469_v60 = vpop.eup %2468 }
0x1a44   :  { %v2045_v61 = vmul.f32 %v2469_v60, %v2028_v23  ;;  %vm2050_vm10 = vweird.f32 %v2469_v60 }
0x1a45   :  { %2066 = vrot.lane.b32.xlu2 %v2064_v56, %s2473_s7  ;;  %vm2051_vm14 = vmor %vm2049_vm13, %vm2050_vm10 }
0x1a46   :  { %v2046_v5 = vsub.f32 1.0, %v2045_v61 }
0x1a48   :  { %v2047_v10 = vmul.f32 %v2469_v60, %v2046_v5 }
0x1a4a   :  { %v2048_v20 = vadd.f32 %v2469_v60, %v2047_v10 }
0x1a4c   :  { %v2052_v21 = vsel %vm2051_vm14, %v2469_v60, %v2048_v20 }
0x1a4d   :  { %v2057_v35 = vsel %vm2054_vm15, %v2056_v27, %v2052_v21 }
0x1a9f   :  { %v2067_v16 = vpop.permute.xlu2 %2066 }
0x1aa0   :  { %v2069_v11 = vadd.f32 %v2067_v16, %v2063_v57 }
0x1aa2   :  { %2470 = vtanh.f32 %v2069_v11 }
0x1aa8   :  { %v2471_v43 = vpop.eup %2470 }
0x1aa9   :  { %v2071_v38 = vmul.f32 %v2471_v43, %v2057_v35 }
0x1aab   :  { %v2077_v44 = vsel %vm952_vm5, %v3426_v37, %v2071_v38  ;;  %v2079_v31 = vrot.slane %v2071_v38, 6 }
0x1aac   :  { %2145 = vrot.lane.b32.xlu0 %v2077_v44, %s2473_s7 }
0x1aad   :  { %v2094_v13 = vsel %vm948_vm11, %v2079_v31, %v2081_v40 }
0x1aae   :  { %v2095_v22 = vsel %vm950_vm12, %v2094_v13, %v2083_v29 }
0x1aaf   :  { %v2096_v18 = vsel %vm952_vm5, %v2095_v22, %v2085_v9 }
0x1ab0   :  { %2110 = vrot.lane.b32.xlu2 %v2096_v18, %s2474_s27 }
0x1b0a   :  { %v2111_v26 = vpop.permute.xlu2 %2110 }
0x1b0b   :  { %2257 = vmatmul.msk.f32.vlgmr.msra.gmra.mxu0 %vm993_vm6, %v2111_v26 }
0x1b1e   :  { %v2146_v28 = vpop.permute.xlu0 %2145 }
0x1b1f   :  { %2260 = vmatmul.msk.f32.vlgmr.msra.gmra.mxu3 %vm993_vm6, %v2146_v28 }
0x1b88   :  { %v2135_v47 = vpop.f32.mrf.mxu0 }
0x1b89   :  { %v2169_v46 = vadd.f32 %v2168_v45, %v2135_v47 }
0x1b8b   :  { %2175 = vst.msk [vmem:[%s3478_s11] sm:$0xff] %vm2174_vm0, %v2169_v46 }
0x1ba2   :  { %v2171_v48 = vpop.f32.mrf.mxu3 }
0x1ba3   :  { %v2172_v49 = vadd.f32 %v2171_v48, %v2138_v33 }
0x1ba5   :  { %2176 = vst.msk [vmem:[%s3478_s11 + $0x8] sm:$0xff] %vm2174_vm0, %v2172_v49 }

</bundles_post_ra>
